<compile_context>
chip_gen: v5e
topology: v5e:2x2
jax: 0.10.0
libtpu: 0.0.40
codegen_flags: <defaults>
</compile_context>

<pallas_src>
import jax
import jax.numpy as jnp
from jax.experimental import pallas as pl
from jax.experimental.pallas import tpu as pltpu


N_LATENT = 32
IMG_SIZE = 16
OUT_DIM = IMG_SIZE * IMG_SIZE          # 256
HIDDENS = (128, 256, 512, 1024)
BN_EPS = 1e-5
M_ROWS = 8                             # one full sublane tile for the matmul LHS


def _generator_kernel(
    z_ref,
    w1_ref, b1_ref,
    w2_ref, b2_ref,
    w3_ref, b3_ref,
    w4_hbm, b4_ref,
    w5_hbm, b5_ref,
    out_ref,
    w4_vmem, w5_vmem, dma_sems,
):
    # Prefetch the two largest weight matrices (~80% of total bytes) into VMEM
    # while layers 1-3 compute on the small, already-resident weights.
    w4_cp = pltpu.make_async_copy(w4_hbm, w4_vmem, dma_sems.at[0])
    w5_cp = pltpu.make_async_copy(w5_hbm, w5_vmem, dma_sems.at[1])
    w4_cp.start()
    w5_cp.start()

    def linear(x_f32, w_bf16, b_f32):
        return jnp.dot(x_f32.astype(jnp.bfloat16), w_bf16,
                       preferred_element_type=jnp.float32) + b_f32

    def lrelu(x):
        # LeakyReLU(0.2): since 0 < 0.2 < 1, max(x, 0.2x) == where(x > 0, x, 0.2x)
        return jnp.maximum(x, 0.2 * x)

    # Broadcast the single latent row across a full sublane tile so every matmul
    # LHS is (8, K) -- avoids degenerate M=1 codegen; cost is negligible.
    x = jnp.broadcast_to(z_ref[...].astype(jnp.float32), (M_ROWS, N_LATENT))

    # layers 1-4: Linear (BN already folded into w/b for 2-4) -> LeakyReLU.
    # Dropout is identity in eval mode.
    h = lrelu(linear(x, w1_ref[...], b1_ref[...]))
    h = lrelu(linear(h, w2_ref[...], b2_ref[...]))
    h = lrelu(linear(h, w3_ref[...], b3_ref[...]))

    w4_cp.wait()
    h = lrelu(linear(h, w4_vmem[...], b4_ref[...]))

    w5_cp.wait()
    g = jnp.tanh(linear(h, w5_vmem[...], b5_ref[...]))

    # Only row 0 corresponds to the real (batch==1) latent.
    out_ref[...] = g[:1, :]


def _full_spec(shape):
    # whole-array block resident in VMEM (no grid)
    return pl.BlockSpec(shape, lambda: (0,) * len(shape))


def init_generator_params(key):
    """PyTorch-default-style init, with eval-mode BatchNorm folded into the Linears
    and weights stored in bf16 (biases stay f32)."""
    dims = (N_LATENT,) + HIDDENS + (OUT_DIM,)
    n_layers = len(dims) - 1
    keys = jax.random.split(key, 2 * n_layers + 2 * 3)
    ki = 0
    raw = {}
    for li in range(n_layers):
        fan_in, fan_out = dims[li], dims[li + 1]
        bound = 1.0 / (fan_in ** 0.5)
        raw[f"w{li + 1}"] = jax.random.uniform(
            keys[ki], (fan_in, fan_out), jnp.float32, -bound, bound)
        ki += 1
        raw[f"b{li + 1}"] = jax.random.uniform(
            keys[ki], (1, fan_out), jnp.float32, -bound, bound)
        ki += 1

    # BatchNorm1d on layers 2, 3, 4 (features 256, 512, 1024). Eval mode with
    # running_mean=0, running_var=1. Fold affine into the preceding Linear:
    #   W' = W * s (per output column),  b' = b * s + t,  s = gamma/sqrt(var+eps), t = beta.
    for li, feat in zip((2, 3, 4), HIDDENS[1:]):
        gamma = 1.0 + 0.1 * jax.random.normal(keys[ki], (1, feat), jnp.float32)
        ki += 1
        beta = 0.1 * jax.random.normal(keys[ki], (1, feat), jnp.float32)
        ki += 1
        scale = gamma / jnp.sqrt(1.0 + BN_EPS)
        raw[f"w{li}"] = raw[f"w{li}"] * scale
        raw[f"b{li}"] = raw[f"b{li}"] * scale + beta

    params = {}
    for li in range(1, n_layers + 1):
        params[f"w{li}"] = raw[f"w{li}"].astype(jnp.bfloat16)   # halve HBM bytes
        params[f"b{li}"] = raw[f"b{li}"]                        # tiny, keep f32
    return params


@jax.jit
def generator_forward(z, params):
    """z: (1, N_LATENT) float32 -> image (1, IMG_SIZE, IMG_SIZE) float32."""
    z = z.astype(jnp.float32)
    args = (
        z,
        params["w1"], params["b1"],
        params["w2"], params["b2"],
        params["w3"], params["b3"],
        params["w4"], params["b4"],
        params["w5"], params["b5"],
    )
    in_specs = []
    for idx, a in enumerate(args):
        if idx in (7, 9):   # w4, w5: leave in HBM, DMA'd manually inside the kernel
            in_specs.append(pl.BlockSpec(memory_space=pl.ANY))
        else:
            in_specs.append(_full_spec(a.shape))

    out = pl.pallas_call(
        _generator_kernel,
        out_shape=jax.ShapeDtypeStruct((1, OUT_DIM), jnp.float32),
        in_specs=in_specs,
        out_specs=_full_spec((1, OUT_DIM)),
        scratch_shapes=[
            pltpu.VMEM((HIDDENS[2], HIDDENS[3]), jnp.bfloat16),   # w4 staging buffer
            pltpu.VMEM((HIDDENS[3], OUT_DIM), jnp.bfloat16),      # w5 staging buffer
            pltpu.SemaphoreType.DMA((2,)),
        ],
        compiler_params=pltpu.CompilerParams(vmem_limit_bytes=16 << 20),
    )(*args)

    return out.reshape(1, IMG_SIZE, IMG_SIZE)


def _reference_forward(z, params):
    """Pure-JAX f32 reference using the same (bf16-stored, BN-folded) parameters."""
    def lrelu(x):
        return jnp.maximum(x, 0.2 * x)
    f32 = lambda w: w.astype(jnp.float32)
    h = lrelu(z @ f32(params["w1"]) + params["b1"])
    h = lrelu(h @ f32(params["w2"]) + params["b2"])
    h = lrelu(h @ f32(params["w3"]) + params["b3"])
    h = lrelu(h @ f32(params["w4"]) + params["b4"])
    h = jnp.tanh(h @ f32(params["w5"]) + params["b5"])
    return h.reshape(1, IMG_SIZE, IMG_SIZE)


if __name__ == "__main__":
    key = jax.random.PRNGKey(0)
    pkey, zkey = jax.random.split(key)
    params = init_generator_params(pkey)

    z = jax.random.normal(zkey, (1, N_LATENT), jnp.float32)   # latent vector, batch=1

    img = generator_forward(z, params)
    jax.block_until_ready(img)

    ref = _reference_forward(z.astype(jnp.float32), params)
    assert img.shape == (1, IMG_SIZE, IMG_SIZE), img.shape
    # bf16 activations in the kernel vs f32 activations in the reference -> loose tol.
    assert jnp.allclose(img, ref, atol=5e-2, rtol=0.0), "mismatch vs reference"

    print("KERNEL_OK")
</pallas_src>

<mosaic_0001>
module attributes {stable_mosaic.version = 11 : i64} {
  func.func @_generator_kernel(%arg0: memref<1x32xf32, #tpu.memory_space<vmem>>, %arg1: memref<32x128xbf16, #tpu.memory_space<vmem>>, %arg2: memref<1x128xf32, #tpu.memory_space<vmem>>, %arg3: memref<128x256xbf16, #tpu.memory_space<vmem>>, %arg4: memref<1x256xf32, #tpu.memory_space<vmem>>, %arg5: memref<256x512xbf16, #tpu.memory_space<vmem>>, %arg6: memref<1x512xf32, #tpu.memory_space<vmem>>, %arg7: memref<512x1024xbf16, #tpu.memory_space<any>>, %arg8: memref<1x1024xf32, #tpu.memory_space<vmem>>, %arg9: memref<1024x256xbf16, #tpu.memory_space<any>>, %arg10: memref<1x256xf32, #tpu.memory_space<vmem>>, %arg11: memref<1x256xf32, #tpu.memory_space<vmem>>, %arg12: memref<512x1024xbf16, #tpu.memory_space<vmem>>, %arg13: memref<1024x256xbf16, #tpu.memory_space<vmem>>, %arg14: memref<2x!tpu.dma_semaphore, #tpu.memory_space<semaphore_mem>>) attributes {dimension_semantics = [], scalar_prefetch = 0 : i64, scratch_operands = 3 : i64, tpu.core_type = #tpu.core_type<tc>} {
    %c0_i32 = arith.constant 0 : i32
    %0 = tpu.memref_slice %arg14[%c0_i32] : memref<2x!tpu.dma_semaphore, #tpu.memory_space<semaphore_mem>> -> memref<1x!tpu.dma_semaphore, #tpu.memory_space<semaphore_mem>>
    %1 = tpu.memref_squeeze %0 : memref<1x!tpu.dma_semaphore, #tpu.memory_space<semaphore_mem>> -> memref<!tpu.dma_semaphore, #tpu.memory_space<semaphore_mem>>
    tpu.enqueue_dma source(%arg7 : memref<512x1024xbf16, #tpu.memory_space<any>>) target(%arg12 : memref<512x1024xbf16, #tpu.memory_space<vmem>>) target_semaphore(%1 : memref<!tpu.dma_semaphore, #tpu.memory_space<semaphore_mem>>)
    %c1_i32 = arith.constant 1 : i32
    %2 = tpu.memref_slice %arg14[%c1_i32] : memref<2x!tpu.dma_semaphore, #tpu.memory_space<semaphore_mem>> -> memref<1x!tpu.dma_semaphore, #tpu.memory_space<semaphore_mem>>
    %3 = tpu.memref_squeeze %2 : memref<1x!tpu.dma_semaphore, #tpu.memory_space<semaphore_mem>> -> memref<!tpu.dma_semaphore, #tpu.memory_space<semaphore_mem>>
    tpu.enqueue_dma source(%arg9 : memref<1024x256xbf16, #tpu.memory_space<any>>) target(%arg13 : memref<1024x256xbf16, #tpu.memory_space<vmem>>) target_semaphore(%3 : memref<!tpu.dma_semaphore, #tpu.memory_space<semaphore_mem>>)
    %c0 = arith.constant 0 : index
    %c0_0 = arith.constant 0 : index
    %4 = vector.load %arg0[%c0, %c0_0] : memref<1x32xf32, #tpu.memory_space<vmem>>, vector<1x32xf32>
    %5 = vector.shape_cast %4 : vector<1x32xf32> to vector<1x32xf32>
    %6 = vector.broadcast %5 : vector<1x32xf32> to vector<8x32xf32>
    %c0_1 = arith.constant 0 : index
    %c0_2 = arith.constant 0 : index
    %7 = vector.load %arg1[%c0_1, %c0_2] : memref<32x128xbf16, #tpu.memory_space<vmem>>, vector<32x128xbf16>
    %c0_3 = arith.constant 0 : index
    %c0_4 = arith.constant 0 : index
    %8 = vector.load %arg2[%c0_3, %c0_4] : memref<1x128xf32, #tpu.memory_space<vmem>>, vector<1x128xf32>
    %9 = arith.truncf %6 : vector<8x32xf32> to vector<8x32xbf16>
    %cst = arith.constant dense<0.000000e+00> : vector<8x128xf32>
    %10 = tpu.matmul %9, %7, %cst {dimension_numbers = #tpu.dot_dimension_numbers<[1], [0], [0], [1], [0, 0, 1, 1], [], []>} : vector<8x32xbf16>, vector<32x128xbf16>, vector<8x128xf32> -> vector<8x128xf32>
    %11 = vector.broadcast %8 : vector<1x128xf32> to vector<8x128xf32>
    %12 = arith.addf %10, %11 : vector<8x128xf32>
    %cst_5 = arith.constant 2.000000e-01 : f32
    %13 = vector.broadcast %cst_5 : f32 to vector<8x128xf32>
    %14 = arith.mulf %13, %12 : vector<8x128xf32>
    %15 = arith.maximumf %12, %14 : vector<8x128xf32>
    %c0_6 = arith.constant 0 : index
    %c0_7 = arith.constant 0 : index
    %16 = vector.load %arg3[%c0_6, %c0_7] : memref<128x256xbf16, #tpu.memory_space<vmem>>, vector<128x256xbf16>
    %c0_8 = arith.constant 0 : index
    %c0_9 = arith.constant 0 : index
    %17 = vector.load %arg4[%c0_8, %c0_9] : memref<1x256xf32, #tpu.memory_space<vmem>>, vector<1x256xf32>
    %18 = arith.truncf %15 : vector<8x128xf32> to vector<8x128xbf16>
    %cst_10 = arith.constant dense<0.000000e+00> : vector<8x256xf32>
    %19 = tpu.matmul %18, %16, %cst_10 {dimension_numbers = #tpu.dot_dimension_numbers<[1], [0], [0], [1], [0, 0, 1, 1], [], []>} : vector<8x128xbf16>, vector<128x256xbf16>, vector<8x256xf32> -> vector<8x256xf32>
    %20 = vector.broadcast %17 : vector<1x256xf32> to vector<8x256xf32>
    %21 = arith.addf %19, %20 : vector<8x256xf32>
    %cst_11 = arith.constant 2.000000e-01 : f32
    %22 = vector.broadcast %cst_11 : f32 to vector<8x256xf32>
    %23 = arith.mulf %22, %21 : vector<8x256xf32>
    %24 = arith.maximumf %21, %23 : vector<8x256xf32>
    %c0_12 = arith.constant 0 : index
    %c0_13 = arith.constant 0 : index
    %25 = vector.load %arg5[%c0_12, %c0_13] : memref<256x512xbf16, #tpu.memory_space<vmem>>, vector<256x512xbf16>
    %c0_14 = arith.constant 0 : index
    %c0_15 = arith.constant 0 : index
    %26 = vector.load %arg6[%c0_14, %c0_15] : memref<1x512xf32, #tpu.memory_space<vmem>>, vector<1x512xf32>
    %27 = arith.truncf %24 : vector<8x256xf32> to vector<8x256xbf16>
    %cst_16 = arith.constant dense<0.000000e+00> : vector<8x512xf32>
    %28 = tpu.matmul %27, %25, %cst_16 {dimension_numbers = #tpu.dot_dimension_numbers<[1], [0], [0], [1], [0, 0, 1, 1], [], []>} : vector<8x256xbf16>, vector<256x512xbf16>, vector<8x512xf32> -> vector<8x512xf32>
    %29 = vector.broadcast %26 : vector<1x512xf32> to vector<8x512xf32>
    %30 = arith.addf %28, %29 : vector<8x512xf32>
    %cst_17 = arith.constant 2.000000e-01 : f32
    %31 = vector.broadcast %cst_17 : f32 to vector<8x512xf32>
    %32 = arith.mulf %31, %30 : vector<8x512xf32>
    %33 = arith.maximumf %30, %32 : vector<8x512xf32>
    %c0_i32_18 = arith.constant 0 : i32
    %34 = tpu.memref_slice %arg14[%c0_i32_18] : memref<2x!tpu.dma_semaphore, #tpu.memory_space<semaphore_mem>> -> memref<1x!tpu.dma_semaphore, #tpu.memory_space<semaphore_mem>>
    %35 = tpu.memref_squeeze %34 : memref<1x!tpu.dma_semaphore, #tpu.memory_space<semaphore_mem>> -> memref<!tpu.dma_semaphore, #tpu.memory_space<semaphore_mem>>
    tpu.wait_dma2 semaphore(%35 : memref<!tpu.dma_semaphore, #tpu.memory_space<semaphore_mem>>) src(%arg7 : memref<512x1024xbf16, #tpu.memory_space<any>>) dst(%arg12 : memref<512x1024xbf16, #tpu.memory_space<vmem>>)
    %c0_19 = arith.constant 0 : index
    %c0_20 = arith.constant 0 : index
    %36 = vector.load %arg12[%c0_19, %c0_20] : memref<512x1024xbf16, #tpu.memory_space<vmem>>, vector<512x1024xbf16>
    %c0_21 = arith.constant 0 : index
    %c0_22 = arith.constant 0 : index
    %37 = vector.load %arg8[%c0_21, %c0_22] : memref<1x1024xf32, #tpu.memory_space<vmem>>, vector<1x1024xf32>
    %38 = arith.truncf %33 : vector<8x512xf32> to vector<8x512xbf16>
    %cst_23 = arith.constant dense<0.000000e+00> : vector<8x1024xf32>
    %39 = tpu.matmul %38, %36, %cst_23 {dimension_numbers = #tpu.dot_dimension_numbers<[1], [0], [0], [1], [0, 0, 1, 1], [], []>} : vector<8x512xbf16>, vector<512x1024xbf16>, vector<8x1024xf32> -> vector<8x1024xf32>
    %40 = vector.broadcast %37 : vector<1x1024xf32> to vector<8x1024xf32>
    %41 = arith.addf %39, %40 : vector<8x1024xf32>
    %cst_24 = arith.constant 2.000000e-01 : f32
    %42 = vector.broadcast %cst_24 : f32 to vector<8x1024xf32>
    %43 = arith.mulf %42, %41 : vector<8x1024xf32>
    %44 = arith.maximumf %41, %43 : vector<8x1024xf32>
    %c1_i32_25 = arith.constant 1 : i32
    %45 = tpu.memref_slice %arg14[%c1_i32_25] : memref<2x!tpu.dma_semaphore, #tpu.memory_space<semaphore_mem>> -> memref<1x!tpu.dma_semaphore, #tpu.memory_space<semaphore_mem>>
    %46 = tpu.memref_squeeze %45 : memref<1x!tpu.dma_semaphore, #tpu.memory_space<semaphore_mem>> -> memref<!tpu.dma_semaphore, #tpu.memory_space<semaphore_mem>>
    tpu.wait_dma2 semaphore(%46 : memref<!tpu.dma_semaphore, #tpu.memory_space<semaphore_mem>>) src(%arg9 : memref<1024x256xbf16, #tpu.memory_space<any>>) dst(%arg13 : memref<1024x256xbf16, #tpu.memory_space<vmem>>)
    %c0_26 = arith.constant 0 : index
    %c0_27 = arith.constant 0 : index
    %47 = vector.load %arg13[%c0_26, %c0_27] : memref<1024x256xbf16, #tpu.memory_space<vmem>>, vector<1024x256xbf16>
    %c0_28 = arith.constant 0 : index
    %c0_29 = arith.constant 0 : index
    %48 = vector.load %arg10[%c0_28, %c0_29] : memref<1x256xf32, #tpu.memory_space<vmem>>, vector<1x256xf32>
    %49 = arith.truncf %44 : vector<8x1024xf32> to vector<8x1024xbf16>
    %cst_30 = arith.constant dense<0.000000e+00> : vector<8x256xf32>
    %50 = tpu.matmul %49, %47, %cst_30 {dimension_numbers = #tpu.dot_dimension_numbers<[1], [0], [0], [1], [0, 0, 1, 1], [], []>} : vector<8x1024xbf16>, vector<1024x256xbf16>, vector<8x256xf32> -> vector<8x256xf32>
    %51 = vector.broadcast %48 : vector<1x256xf32> to vector<8x256xf32>
    %52 = arith.addf %50, %51 : vector<8x256xf32>
    %53 = math.tanh %52 : vector<8x256xf32>
    %54 = vector.extract_strided_slice %53 {offsets = [0, 0], sizes = [1, 256], strides = [1, 1]} : vector<8x256xf32> to vector<1x256xf32>
    %c0_31 = arith.constant 0 : index
    %c0_32 = arith.constant 0 : index
    %55 = vector.load %arg11[%c0_31, %c0_32] : memref<1x256xf32, #tpu.memory_space<vmem>>, vector<1x256xf32>
    tpu.vector_store %arg11[%c0_31, %c0_32], %54 {strides = array<i32>} : memref<1x256xf32, #tpu.memory_space<vmem>>, vector<1x256xf32>,
    return
  }
}

</mosaic_0001>

<bundles_post_ra>
// kernel: generator_forward.1
= control target key start
LH: loop header
LB: loop body
LE: loop exit
PB: predicated region body
PF: predicated region fallthrough
CT: control target
= control target key end

     0   :  { %16 = vsyncpa [#allocation6], 0  ;;  %s6736_s0 = inlined_call_operand.hbm [shape: f32[1,32], index: 0, kind: input, shape index: {}]   ;;  %s6737_s1 = inlined_call_operand.hbm [shape: bf16[32,128], index: 1, kind: input, shape index: {}]   ;;  %s6738_s2 = inlined_call_operand.hbm [shape: f32[1,128], index: 2, kind: input, shape index: {}]   ;;  %s6739_s3 = inlined_call_operand.hbm [shape: bf16[128,256], index: 3, kind: input, shape index: {}]   ;;  %s6740_s4 = inlined_call_operand.hbm [shape: f32[1,256], index: 4, kind: input, shape index: {}]   ;;  %s6741_s5 = inlined_call_operand.hbm [shape: bf16[256,512], index: 5, kind: input, shape index: {}]   ;;  %s6742_s6 = inlined_call_operand.hbm [shape: f32[1,512], index: 6, kind: input, shape index: {}]   ;;  %s6743_s7 = inlined_call_operand.hbm [shape: bf16[512,1024], index: 7, kind: input, shape index: {}]   ;;  %s6744_s8 = inlined_call_operand.hbm [shape: f32[1,1024], index: 8, kind: input, shape index: {}]   ;;  %s6745_s9 = inlined_call_operand.hbm [shape: bf16[1024,256], index: 9, kind: input, shape index: {}]   ;;  %s6746_s10 = inlined_call_operand.vmem [shape: f32[1,256], index: 10, kind: input, shape index: {}]   ;;  %s6747_s11 = inlined_call_operand.vmem [shape: f32[1,256], index: 11, kind: output, shape index: {}]  }
   0x1   :  { %17 = vsyncpa [#allocation8], 0 }
   0x2   :  { %18 = vsyncpa [#allocation11], 0 }
   0x3   :  { %19 = vsyncpa [#allocation14], 0  ;;  %s36_s19 = sshll.u32 %s6737_s1, 4  ;;  %s37_s19 = int_to_ptr.hbm [resolvable:$true] %s36_s19 }
   0x4   :  { %20 = vsyncpa [#allocation17], 0  ;;  %s6494_s20 = smov [#allocation7]   ;;  %s60_s24 = sshll.u32 %s6739_s3, 4  ;;  %s61_s24 = int_to_ptr.hbm [resolvable:$true] %s60_s24 }
   0x5   :  { %s38_s21 = sshll.u32 %s6494_s20, 4  ;;  %s6495_s25 = smov 64   ;;  %s39_s21 = int_to_ptr.vmem [resolvable:$true] %s38_s21 }
   0x6   :  { %s6496_s26 = smov 4   ;;  %s6497_s27 = smov [#allocation10]  }
   0x7   :  { %44 = dma.hbm_to_vmem [thread:$0]  %s37_s19, 256, %s39_s21, [#allocation8], %s6495_s25, %s6495_s25, %s6496_s26  }
   0x8   :  { %s62_s28 = sshll.u32 %s6497_s27, 4  ;;  %s6498_s29 = smov 128   ;;  %s63_s28 = int_to_ptr.vmem [resolvable:$true] %s62_s28 }
   0x9   :  { %s6499_s30 = smov 8   ;;  %s84_s13 = sshll.u32 %s6741_s5, 4  ;;  %s85_s13 = int_to_ptr.hbm [resolvable:$true] %s84_s13 }
   0xa   :  { %68 = dma.hbm_to_vmem [thread:$0]  %s61_s24, 2048, %s63_s28, [#allocation11], %s6498_s29, %s6498_s29, %s6499_s30  }
   0xb   :  { %s6500_s14 = smov [#allocation13]   ;;  %s26_s17 = sshll.u32 %s6736_s0, 4  ;;  %s27_s17 = int_to_ptr.hbm [resolvable:$true] %s26_s17 }
   0xc   :  { %s86_s15 = sshll.u32 %s6500_s14, 4  ;;  %s6501_s18 = smov 256   ;;  %s87_s15 = int_to_ptr.vmem [resolvable:$true] %s86_s15 }
   0xd   :  { %s6502_s19 = smov 16   ;;  %s6503_s20 = smov [#allocation5]  }
   0xe   :  { %92 = dma.hbm_to_vmem [thread:$0]  %s85_s13, 8192, %s87_s15, [#allocation14], %s6501_s18, %s6501_s18, %s6502_s19  }
   0xf   :  { %s28_s21 = sshll.u32 %s6503_s20, 4  ;;  %s50_s24 = sshll.u32 %s6738_s2, 4  ;;  %s29_s21 = int_to_ptr.vmem [resolvable:$true] %s28_s21  ;;  %s51_s24 = int_to_ptr.hbm [resolvable:$true] %s50_s24 }
  0x10   :  { %31 = dma.hbm_to_vmem [thread:$0]  %s27_s17, 16, %s29_s21, [#allocation6]  }
  0x11   :  { %s74_s26 = sshll.u32 %s6740_s4, 4  ;;  %s6504_s27 = smov [#allocation9]   ;;  %s75_s26 = int_to_ptr.hbm [resolvable:$true] %s74_s26 }
  0x12   :  { %s52_s28 = sshll.u32 %s6504_s27, 4  ;;  %s6505_s0 = smov [#allocation12]   ;;  %s53_s28 = int_to_ptr.vmem [resolvable:$true] %s52_s28 }
  0x13   :  { %55 = dma.hbm_to_vmem [thread:$0]  %s51_s24, 16, %s53_s28, [#allocation8]  }
  0x14   :  { %s76_s29 = sshll.u32 %s6505_s0, 4  ;;  %s98_s12 = sshll.u32 %s6742_s6, 4  ;;  %s77_s29 = int_to_ptr.vmem [resolvable:$true] %s76_s29  ;;  %s99_s12 = int_to_ptr.hbm [resolvable:$true] %s98_s12 }
  0x15   :  { %79 = dma.hbm_to_vmem [thread:$0]  %s75_s26, 32, %s77_s29, [#allocation11]  }
  0x16   :  { %s109_s14 = sshll.u32 %s6744_s8, 4  ;;  %s6506_s15 = smov [#allocation15]   ;;  %s110_s14 = int_to_ptr.hbm [resolvable:$true] %s109_s14 }
  0x17   :  { %s100_s4 = sshll.u32 %s6506_s15, 4  ;;  %s6507_s16 = smov [#allocation16]   ;;  %s101_s4 = int_to_ptr.vmem [resolvable:$true] %s100_s4 }
  0x18   :  { %103 = dma.hbm_to_vmem [thread:$0]  %s99_s12, 64, %s101_s4, [#allocation14]  }
  0x19   :  { %s111_s3 = sshll.u32 %s6507_s16, 4  ;;  %s112_s3 = int_to_ptr.vmem [resolvable:$true] %s111_s3 }
  0x1a   :  { %114 = dma.hbm_to_vmem [thread:$0]  %s110_s14, 128, %s112_s3, [#allocation17]  }
  0x1b   :  { %6480 = dma.done.wait [#allocation6], 16  }
  0x1c   :  { %6481 = vsyncadd [#allocation6], 4294967280 }
  0x1d   :  { %6482 = dma.done.wait [#allocation8], 272  }
  0x1e   :  { %6483 = vsyncadd [#allocation8], 4294967024 }
  0x1f   :  { %6484 = dma.done.wait [#allocation11], 2080  }
  0x20   :  { %6485 = vsyncadd [#allocation11], 4294965216 }
  0x21   :  { %6486 = dma.done.wait [#allocation14], 8256  }
  0x22   :  { %6487 = vsyncadd [#allocation14], 4294959040 }
  0x23   :  { %6488 = dma.done.wait [#allocation17], 128  }
  0x24   :  { %6489 = vsyncadd [#allocation17], 4294967168  ;;  %v5753_v0 = vld [vmem:[#allocation7 + $0x8] sm:$0xff]  ;;  %v5752_v1 = vld [vmem:[#allocation7] sm:$0xff]  ;;  %vm202_vm0 = vcmask 261120   ;;  %s157_s17 = sshll.u32 %s6743_s7, 4  ;;  %s158_s17 = int_to_ptr.hbm [resolvable:$true] %s157_s17 }
  0x25   :  { %v6234_v2 = vld [vmem:[#allocation5] ss:$0 sm:$0xff]  ;;  %v3952_v3 = vld [vmem:[#allocation10 + $0x70] sm:$0xf]  ;;  %v5769_v4 = vld [vmem:[#allocation10 + $0x74] sm:$0xf0]  ;;  %212 = vmatpush.bf16.msra.mxu0 %v5753_v0 }
  0x26   :  { %v3953_v5 = vor.u32 %v5769_v4, %v3952_v3  ;;  %v5768_v6 = vld [vmem:[#allocation10 + $0x74] sm:$0xf]  ;;  %v3954_v7 = vld [vmem:[#allocation10 + $0x78] sm:$0xf0]  ;;  %v3944_v8 = vld [vmem:[#allocation10 + $0x60] sm:$0xf]  ;;  %v186_v14 = vpack.c.bf16 %v6234_v2, %v6234_v2 }
  0x27   :  { %v3957_v9 = vor.u32 %v5768_v6, %v3954_v7  ;;  %v5767_v10 = vld [vmem:[#allocation10 + $0x64] sm:$0xf0]  ;;  %v5766_v11 = vld [vmem:[#allocation10 + $0x64] sm:$0xf]  ;;  %v3946_v12 = vld [vmem:[#allocation10 + $0x68] sm:$0xf0] }
  0x28   :  { %324 = vmatpush.bf16.msra.mxu1 %v3953_v5  ;;  %v3945_v13 = vor.u32 %v5767_v10, %v3944_v8  ;;  %v3949_v15 = vor.u32 %v5766_v11, %v3946_v12  ;;  %v3936_v16 = vld [vmem:[#allocation10 + $0x50] sm:$0xf]  ;;  %v5765_v17 = vld [vmem:[#allocation10 + $0x54] sm:$0xf0]  ;;  %v5764_v18 = vld [vmem:[#allocation10 + $0x54] sm:$0xf] }
  0x29   :  { %337 = vmatpush.bf16.msra.mxu2 %v3957_v9  ;;  %213 = vmatpush.bf16.msra.mxu0 %v5752_v1  ;;  %v3938_v19 = vld [vmem:[#allocation10 + $0x58] sm:$0xf0]  ;;  %v3937_v20 = vor.u32 %v5765_v17, %v3936_v16  ;;  %v3928_v22 = vld [vmem:[#allocation10 + $0x40] sm:$0xf]  ;;  %v5763_v23 = vld [vmem:[#allocation10 + $0x44] sm:$0xf0] }
  0x2a   :  { %v3941_v21 = vor.u32 %v5764_v18, %v3938_v19  ;;  %v5762_v24 = vld [vmem:[#allocation10 + $0x44] sm:$0xf]  ;;  %v3930_v25 = vld [vmem:[#allocation10 + $0x48] sm:$0xf0]  ;;  %v3929_v26 = vor.u32 %v5763_v23, %v3928_v22  ;;  %v3920_v28 = vld [vmem:[#allocation10 + $0x30] sm:$0xf] }
  0x2b   :  { %v3933_v27 = vor.u32 %v5762_v24, %v3930_v25  ;;  %v5761_v29 = vld [vmem:[#allocation10 + $0x34] sm:$0xf0]  ;;  %v5760_v30 = vld [vmem:[#allocation10 + $0x34] sm:$0xf]  ;;  %v3922_v31 = vld [vmem:[#allocation10 + $0x38] sm:$0xf0] }
  0x2c   :  { %325 = vmatpush.bf16.msra.mxu1 %v3945_v13  ;;  %3893 = vmatmul.msk.bf16.vlgmr.msra.gmra.mxu0 %vm202_vm0, %v186_v14  ;;  %v3921_v32 = vor.u32 %v5761_v29, %v3920_v28  ;;  %v3925_v33 = vor.u32 %v5760_v30, %v3922_v31  ;;  %v3912_v34 = vld [vmem:[#allocation10 + $0x20] sm:$0xf]  ;;  %v5759_v35 = vld [vmem:[#allocation10 + $0x24] sm:$0xf0]  ;;  %v5758_v36 = vld [vmem:[#allocation10 + $0x24] sm:$0xf] }
  0x2d   :  { %338 = vmatpush.bf16.msra.mxu2 %v3949_v15  ;;  %v3914_v37 = vld [vmem:[#allocation10 + $0x28] sm:$0xf0]  ;;  %v3913_v38 = vor.u32 %v5759_v35, %v3912_v34  ;;  %v3904_v40 = vld [vmem:[#allocation10 + $0x10] sm:$0xf]  ;;  %v5757_v41 = vld [vmem:[#allocation10 + $0x14] sm:$0xf0] }
  0x2e   :  { %v3917_v39 = vor.u32 %v5758_v36, %v3914_v37  ;;  %v5756_v42 = vld [vmem:[#allocation10 + $0x14] sm:$0xf]  ;;  %v3905_v43 = vor.u32 %v5757_v41, %v3904_v40  ;;  %v3906_v44 = vld [vmem:[#allocation10 + $0x18] sm:$0xf0]  ;;  %v3896_v46 = vld [vmem:[#allocation10] sm:$0xf] }
  0x2f   :  { %v3909_v45 = vor.u32 %v5756_v42, %v3906_v44  ;;  %v5755_v47 = vld [vmem:[#allocation10 + $0x4] sm:$0xf0]  ;;  %v5754_v48 = vld [vmem:[#allocation10 + $0x4] sm:$0xf]  ;;  %v3898_v50 = vld [vmem:[#allocation10 + $0x8] sm:$0xf0] }
  0x30   :  { %326 = vmatpush.bf16.msra.mxu1 %v3937_v20  ;;  %v3897_v49 = vor.u32 %v5755_v47, %v3896_v46  ;;  %v3901_v51 = vor.u32 %v5754_v48, %v3898_v50  ;;  %v4072_v52 = vld [vmem:[#allocation13 + $0xe0] sm:$0xf]  ;;  %v5800_v53 = vld [vmem:[#allocation13 + $0xec] sm:$0xf0]  ;;  %v5798_v54 = vld [vmem:[#allocation13 + $0xe4] sm:$0xf] }
  0x31   :  { %339 = vmatpush.bf16.msra.mxu2 %v3941_v21  ;;  %v4073_v55 = vor.u32 %v5800_v53, %v4072_v52  ;;  %v4074_v56 = vld [vmem:[#allocation13 + $0xf0] sm:$0xf0]  ;;  %v4056_v57 = vld [vmem:[#allocation13 + $0xc0] sm:$0xf]  ;;  %v5796_v58 = vld [vmem:[#allocation13 + $0xcc] sm:$0xf0] }
  0x32   :  { %v4077_v59 = vor.u32 %v5798_v54, %v4074_v56  ;;  %v5794_v60 = vld [vmem:[#allocation13 + $0xc4] sm:$0xf]  ;;  %v4058_v61 = vld [vmem:[#allocation13 + $0xd0] sm:$0xf0]  ;;  %v4200_v62 = vld [vmem:[#allocation13 + $0x1e0] sm:$0xf]  ;;  %v4057_v63 = vor.u32 %v5796_v58, %v4056_v57 }
  0x33   :  { %750 = vmatpush.bf16.msra.mxu3 %v4073_v55  ;;  %v5832_v0 = vld [vmem:[#allocation13 + $0x1ec] sm:$0xf0]  ;;  %v5830_v1 = vld [vmem:[#allocation13 + $0x1e4] sm:$0xf]  ;;  %v4202_v2 = vld [vmem:[#allocation13 + $0x1f0] sm:$0xf0]  ;;  %v4061_v3 = vor.u32 %v5794_v60, %v4058_v61 }
  0x34   :  { %327 = vmatpush.bf16.msra.mxu1 %v3929_v26  ;;  %v4201_v4 = vor.u32 %v5832_v0, %v4200_v62  ;;  %v4205_v5 = vor.u32 %v5830_v1, %v4202_v2  ;;  %v4040_v6 = vld [vmem:[#allocation13 + $0xa0] sm:$0xf]  ;;  %v5792_v7 = vld [vmem:[#allocation13 + $0xac] sm:$0xf0]  ;;  %v5790_v8 = vld [vmem:[#allocation13 + $0xa4] sm:$0xf] }
  0x35   :  { %340 = vmatpush.bf16.msra.mxu2 %v3933_v27  ;;  %v4042_v9 = vld [vmem:[#allocation13 + $0xb0] sm:$0xf0]  ;;  %v4184_v10 = vld [vmem:[#allocation13 + $0x1c0] sm:$0xf]  ;;  %v5828_v11 = vld [vmem:[#allocation13 + $0x1cc] sm:$0xf0]  ;;  %v4041_v15 = vor.u32 %v5792_v7, %v4040_v6 }
  0x36   :  { %763 = vmatpush.bf16.msrb.mxu0 %v4201_v4  ;;  %v4185_v12 = vor.u32 %v5828_v11, %v4184_v10  ;;  %v5826_v13 = vld [vmem:[#allocation13 + $0x1c4] sm:$0xf]  ;;  %v4186_v14 = vld [vmem:[#allocation13 + $0x1d0] sm:$0xf0]  ;;  %v4024_v17 = vld [vmem:[#allocation13 + $0x80] sm:$0xf]  ;;  %v4045_v19 = vor.u32 %v5790_v8, %v4042_v9 }
  0x37   :  { %751 = vmatpush.bf16.msra.mxu3 %v4057_v63  ;;  %v4189_v16 = vor.u32 %v5826_v13, %v4186_v14  ;;  %v5788_v18 = vld [vmem:[#allocation13 + $0x8c] sm:$0xf0]  ;;  %v4168_v20 = vld [vmem:[#allocation13 + $0x1a0] sm:$0xf]  ;;  %v5822_v22 = vld [vmem:[#allocation13 + $0x1a4] sm:$0xf] }
  0x38   :  { %328 = vmatpush.bf16.msra.mxu1 %v3921_v32  ;;  %v5824_v21 = vld [vmem:[#allocation13 + $0x1ac] sm:$0xf0]  ;;  %v5786_v23 = vld [vmem:[#allocation13 + $0x84] sm:$0xf]  ;;  %v4026_v24 = vld [vmem:[#allocation13 + $0x90] sm:$0xf0]  ;;  %v4025_v29 = vor.u32 %v5788_v18, %v4024_v17 }
  0x39   :  { %341 = vmatpush.bf16.msra.mxu2 %v3925_v33  ;;  %v4170_v25 = vld [vmem:[#allocation13 + $0x1b0] sm:$0xf0]  ;;  %v4169_v26 = vor.u32 %v5824_v21, %v4168_v20  ;;  %v4152_v28 = vld [vmem:[#allocation13 + $0x180] sm:$0xf]  ;;  %v5820_v30 = vld [vmem:[#allocation13 + $0x18c] sm:$0xf0]  ;;  %v4029_v33 = vor.u32 %v5786_v23, %v4026_v24 }
  0x3a   :  { %764 = vmatpush.bf16.msrb.mxu0 %v4185_v12  ;;  %v4173_v27 = vor.u32 %v5822_v22, %v4170_v25  ;;  %v5818_v31 = vld [vmem:[#allocation13 + $0x184] sm:$0xf]  ;;  %v4154_v32 = vld [vmem:[#allocation13 + $0x190] sm:$0xf0]  ;;  %v4008_v34 = vld [vmem:[#allocation13 + $0x60] sm:$0xf] }
  0x3b   :  { %752 = vmatpush.bf16.msra.mxu3 %v4041_v15  ;;  %v5784_v35 = vld [vmem:[#allocation13 + $0x6c] sm:$0xf0]  ;;  %v5782_v36 = vld [vmem:[#allocation13 + $0x64] sm:$0xf]  ;;  %v4010_v37 = vld [vmem:[#allocation13 + $0x70] sm:$0xf0] }
  0x3c   :  { %329 = vmatpush.bf16.msra.mxu1 %v3913_v38  ;;  %v4153_v38 = vor.u32 %v5820_v30, %v4152_v28  ;;  %v4136_v40 = vld [vmem:[#allocation13 + $0x160] sm:$0xf]  ;;  %v4009_v41 = vor.u32 %v5784_v35, %v4008_v34  ;;  %v5816_v42 = vld [vmem:[#allocation13 + $0x16c] sm:$0xf0]  ;;  %v4138_v44 = vld [vmem:[#allocation13 + $0x170] sm:$0xf0] }
  0x3d   :  { %342 = vmatpush.bf16.msra.mxu2 %v3917_v39  ;;  %v4157_v39 = vor.u32 %v5818_v31, %v4154_v32  ;;  %v3992_v46 = vld [vmem:[#allocation13 + $0x40] sm:$0xf]  ;;  %v5780_v47 = vld [vmem:[#allocation13 + $0x4c] sm:$0xf0]  ;;  %v5778_v48 = vld [vmem:[#allocation13 + $0x44] sm:$0xf]  ;;  %v4137_v50 = vor.u32 %v5816_v42, %v4136_v40 }
  0x3e   :  { %765 = vmatpush.bf16.msrb.mxu0 %v4169_v26  ;;  %v4120_v52 = vld [vmem:[#allocation13 + $0x140] sm:$0xf]  ;;  %v3993_v53 = vor.u32 %v5780_v47, %v3992_v46  ;;  %v5812_v54 = vld [vmem:[#allocation13 + $0x14c] sm:$0xf0]  ;;  %v5810_v55 = vld [vmem:[#allocation13 + $0x144] sm:$0xf] }
  0x3f   :  { %753 = vmatpush.bf16.msra.mxu3 %v4025_v29  ;;  %v4122_v56 = vld [vmem:[#allocation13 + $0x150] sm:$0xf0]  ;;  %v6235_v57 = vld [vmem:[#allocation9] ss:$0 sm:$0xff]  ;;  %v5776_v60 = vld [vmem:[#allocation13 + $0x2c] sm:$0xf0]  ;;  %v4121_v63 = vor.u32 %v5812_v54, %v4120_v52 }
  0x40   :  { %330 = vmatpush.bf16.msra.mxu1 %v3905_v43  ;;  %v5814_v43 = vld [vmem:[#allocation13 + $0x164] sm:$0xf]  ;;  %v3978_v62 = vld [vmem:[#allocation13 + $0x30] sm:$0xf0]  ;;  %v4125_v0 = vor.u32 %v5810_v55, %v4122_v56  ;;  %v4104_v1 = vld [vmem:[#allocation13 + $0x120] sm:$0xf] }
  0x41   :  { %343 = vmatpush.bf16.msra.mxu2 %v3909_v45  ;;  %v4013_v45 = vor.u32 %v5782_v36, %v4010_v37  ;;  %v5774_v61 = vld [vmem:[#allocation13 + $0x24] sm:$0xf]  ;;  %v5808_v4 = vld [vmem:[#allocation13 + $0x12c] sm:$0xf0]  ;;  %v4106_v6 = vld [vmem:[#allocation13 + $0x130] sm:$0xf0] }
  0x42   :  { %766 = vmatpush.bf16.msrb.mxu0 %v4153_v38  ;;  %v3981_v8 = vor.u32 %v5774_v61, %v3978_v62  ;;  %v3960_v9 = vld [vmem:[#allocation13] sm:$0xf]  ;;  %v5772_v10 = vld [vmem:[#allocation13 + $0xc] sm:$0xf0]  ;;  %v5770_v11 = vld [vmem:[#allocation13 + $0x4] sm:$0xf]  ;;  %v4105_v17 = vor.u32 %v5808_v4, %v4104_v1 }
  0x43   :  { %754 = vmatpush.bf16.msra.mxu3 %v4009_v41  ;;  %v3962_v12 = vld [vmem:[#allocation13 + $0x10] sm:$0xf0]  ;;  %v4080_v13 = vld [vmem:[#allocation13 + $0xe8] sm:$0xf]  ;;  %v5801_v15 = vld [vmem:[#allocation13 + $0xf4] sm:$0xf0] }
  0x44   :  { %331 = vmatpush.bf16.msra.mxu1 %v3897_v49  ;;  %v3994_v49 = vld [vmem:[#allocation13 + $0x50] sm:$0xf0]  ;;  %v4082_v20 = vld [vmem:[#allocation13 + $0xf8] sm:$0xf0]  ;;  %v4088_v21 = vld [vmem:[#allocation13 + $0x100] sm:$0xf]  ;;  %v3965_v26 = vor.u32 %v5770_v11, %v3962_v12 }
  0x45   :  { %344 = vmatpush.bf16.msra.mxu2 %v3901_v51  ;;  %v4141_v51 = vor.u32 %v5814_v43, %v4138_v44  ;;  %v3997_v58 = vor.u32 %v5778_v48, %v3994_v49  ;;  %v5804_v22 = vld [vmem:[#allocation13 + $0x10c] sm:$0xf0]  ;;  %v5802_v24 = vld [vmem:[#allocation13 + $0x104] sm:$0xf]  ;;  %v4090_v25 = vld [vmem:[#allocation13 + $0x110] sm:$0xf0] }
  0x46   :  { %767 = vmatpush.bf16.msrb.mxu0 %v4137_v50  ;;  %v4064_v30 = vld [vmem:[#allocation13 + $0xc8] sm:$0xf]  ;;  %v5797_v31 = vld [vmem:[#allocation13 + $0xd4] sm:$0xf0]  ;;  %v4089_v32 = vor.u32 %v5804_v22, %v4088_v21  ;;  %v5795_v34 = vld [vmem:[#allocation13 + $0xcc] sm:$0xf]  ;;  %v4093_v36 = vor.u32 %v5802_v24, %v4090_v25 }
  0x47   :  { %755 = vmatpush.bf16.msra.mxu3 %v3993_v53  ;;  %v4066_v35 = vld [vmem:[#allocation13 + $0xd8] sm:$0xf0]  ;;  %v4065_v37 = vor.u32 %v5797_v31, %v4064_v30  ;;  %v5833_v40 = vld [vmem:[#allocation13 + $0x1f4] sm:$0xf0]  ;;  %v5831_v41 = vld [vmem:[#allocation13 + $0x1ec] sm:$0xf] }
  0x48   :  { %776 = vmatpush.bf16.msrb.mxu1 %v4077_v59  ;;  %v3976_v59 = vld [vmem:[#allocation13 + $0x20] sm:$0xf]  ;;  %v4069_v38 = vor.u32 %v5795_v34, %v4066_v35  ;;  %v4210_v43 = vld [vmem:[#allocation13 + $0x1f8] sm:$0xf0]  ;;  %v5793_v46 = vld [vmem:[#allocation13 + $0xb4] sm:$0xf0] }
  0x49   :  { %789 = vmatpush.bf16.msrb.mxu2 %v4205_v5  ;;  %v5806_v5 = vld [vmem:[#allocation13 + $0x124] sm:$0xf]  ;;  %v4213_v44 = vor.u32 %v5831_v41, %v4210_v43  ;;  %v5791_v47 = vld [vmem:[#allocation13 + $0xac] sm:$0xf]  ;;  %v4050_v49 = vld [vmem:[#allocation13 + $0xb8] sm:$0xf0] }
  0x4a   :  { %768 = vmatpush.bf16.msrb.mxu0 %v4121_v63  ;;  %v4109_v18 = vor.u32 %v5806_v5, %v4106_v6  ;;  %v4053_v50 = vor.u32 %v5791_v47, %v4050_v49  ;;  %v5829_v52 = vld [vmem:[#allocation13 + $0x1d4] sm:$0xf0]  ;;  %v5827_v53 = vld [vmem:[#allocation13 + $0x1cc] sm:$0xf]  ;;  %v4194_v55 = vld [vmem:[#allocation13 + $0x1d8] sm:$0xf0] }
  0x4b   :  { %v4197_v56 = vor.u32 %v5827_v53, %v4194_v55  ;;  %v4034_v61 = vld [vmem:[#allocation13 + $0x98] sm:$0xf0]  ;;  %v4176_v63 = vld [vmem:[#allocation13 + $0x1a8] sm:$0xf]  ;;  %v5785_v6 = vld [vmem:[#allocation13 + $0x74] sm:$0xf0] }
  0x4c   :  { %777 = vmatpush.bf16.msrb.mxu1 %v4061_v3  ;;  %v3977_v3 = vor.u32 %v5776_v60, %v3976_v59  ;;  %v5787_v59 = vld [vmem:[#allocation13 + $0x8c] sm:$0xf]  ;;  %v4016_v5 = vld [vmem:[#allocation13 + $0x68] sm:$0xf]  ;;  %v5821_v12 = vld [vmem:[#allocation13 + $0x194] sm:$0xf0] }
  0x4d   :  { %790 = vmatpush.bf16.msrb.mxu2 %v4189_v16  ;;  %v5799_v16 = vld [vmem:[#allocation13 + $0xec] sm:$0xf]  ;;  %v4037_v62 = vor.u32 %v5787_v59, %v4034_v61  ;;  %v4160_v11 = vld [vmem:[#allocation13 + $0x188] sm:$0xf]  ;;  %v4002_v21 = vld [vmem:[#allocation13 + $0x58] sm:$0xf0] }
  0x4e   :  { %756 = vmatpush.bf16.msra.mxu3 %v3977_v3  ;;  %v4085_v29 = vor.u32 %v5799_v16, %v4082_v20  ;;  %769 = vmatpush.bf16.msrb.mxu0 %v4105_v17  ;;  %v4178_v3 = vld [vmem:[#allocation13 + $0x1b8] sm:$0xf0]  ;;  %v4000_v17 = vld [vmem:[#allocation13 + $0x48] sm:$0xf]  ;;  %v5817_v24 = vld [vmem:[#allocation13 + $0x174] sm:$0xf0] }
  0x4f   :  { %v5815_v25 = vld [vmem:[#allocation13 + $0x16c] sm:$0xf]  ;;  %v5777_v30 = vld [vmem:[#allocation13 + $0x34] sm:$0xf0]  ;;  %v4128_v34 = vld [vmem:[#allocation13 + $0x148] sm:$0xf] }
  0x50   :  { %778 = vmatpush.bf16.msrb.mxu1 %v4045_v19  ;;  %v3961_v19 = vor.u32 %v5772_v10, %v3960_v9  ;;  %v4018_v9 = vld [vmem:[#allocation13 + $0x78] sm:$0xf0]  ;;  %v5775_v31 = vld [vmem:[#allocation13 + $0x2c] sm:$0xf]  ;;  %v5813_v35 = vld [vmem:[#allocation13 + $0x154] sm:$0xf0] }
  0x51   :  { %791 = vmatpush.bf16.msrb.mxu2 %v4173_v27  ;;  %v4081_v27 = vor.u32 %v5801_v15, %v4080_v13  ;;  %v5819_v13 = vld [vmem:[#allocation13 + $0x18c] sm:$0xf]  ;;  %v4162_v15 = vld [vmem:[#allocation13 + $0x198] sm:$0xf0]  ;;  %v4112_v47 = vld [vmem:[#allocation13 + $0x128] sm:$0xf] }
  0x52   :  { %757 = vmatpush.bf16.msra.mxu3 %v3961_v19  ;;  %770 = vmatpush.bf16.msrb.mxu0 %v4089_v32  ;;  %v4165_v16 = vor.u32 %v5819_v13, %v4162_v15  ;;  %v5779_v19 = vld [vmem:[#allocation13 + $0x4c] sm:$0xf]  ;;  %v4096_v53 = vld [vmem:[#allocation13 + $0x108] sm:$0xf]  ;;  %s6508_s18 = smov [#allocation2]   ;;  %s171_s22 = sshll.u32 %s6745_s9, 4  ;;  %s172_s22 = int_to_ptr.hbm [resolvable:$true] %s171_s22 }
  0x53   :  { %v4005_v22 = vor.u32 %v5779_v19, %v4002_v21  ;;  %v5771_v43 = vld [vmem:[#allocation13 + $0xc] sm:$0xf]  ;;  %s159_s19 = sshll.u32 %s6508_s18, 4  ;;  %s6509_s23 = smov [#allocation3]   ;;  %s160_s19 = int_to_ptr.vmem [resolvable:$true] %s159_s19 }
  0x54   :  { %779 = vmatpush.bf16.msrb.mxu1 %v4029_v33  ;;  %v5807_v49 = vld [vmem:[#allocation13 + $0x12c] sm:$0xf]  ;;  %162 = dma.hbm_to_vmem [thread:$0]  %s158_s17, 32768, %s160_s19, [#allocation4] }
  0x55   :  { %792 = vmatpush.bf16.msrb.mxu2 %v4157_v39  ;;  %v4208_v39 = vld [vmem:[#allocation13 + $0x1e8] sm:$0xf]  ;;  %v5803_v55 = vld [vmem:[#allocation13 + $0x10c] sm:$0xf]  ;;  %s173_s24 = sshll.u32 %s6509_s23, 4  ;;  %s174_s24 = int_to_ptr.vmem [resolvable:$true] %s173_s24 }
  0x56   :  { %802 = vmatpush.bf16.msrb.mxu3 %v4081_v27  ;;  %v4209_v42 = vor.u32 %v5833_v40, %v4208_v39  ;;  %v4146_v27 = vld [vmem:[#allocation13 + $0x178] sm:$0xf0]  ;;  %v3968_v40 = vld [vmem:[#allocation13 + $0x8] sm:$0xf]  ;;  %176 = dma.hbm_to_vmem [thread:$0]  %s172_s22, 16384, %s174_s24, [#allocation4 + $0x1] }
  0x57   :  { %v4130_v39 = vld [vmem:[#allocation13 + $0x158] sm:$0xf0] }
  0x58   :  { %780 = vmatpush.bf16.msrb.mxu1 %v4013_v45  ;;  %v4048_v45 = vld [vmem:[#allocation13 + $0xa8] sm:$0xf]  ;;  %815 = vmatpush.bf16.msra.mxu0 %v4209_v42  ;;  %v5773_v42 = vld [vmem:[#allocation13 + $0x14] sm:$0xf0] }
  0x59   :  { %793 = vmatpush.bf16.msrb.mxu2 %v4141_v51  ;;  %v4049_v48 = vor.u32 %v5793_v46, %v4048_v45  ;;  %v4192_v51 = vld [vmem:[#allocation13 + $0x1c8] sm:$0xf]  ;;  %v3969_v45 = vor.u32 %v5773_v42, %v3968_v40 }
  0x5a   :  { %803 = vmatpush.bf16.msrb.mxu3 %v4065_v37  ;;  %v4193_v54 = vor.u32 %v5829_v52, %v4192_v51  ;;  %v4129_v37 = vor.u32 %v5813_v35, %v4128_v34  ;;  %v4114_v51 = vld [vmem:[#allocation13 + $0x138] sm:$0xf0] }
  0x5b   :  { %v4117_v52 = vor.u32 %v5807_v49, %v4114_v51 }
  0x5c   :  { %781 = vmatpush.bf16.msrb.mxu1 %v3997_v58  ;;  %v5789_v58 = vld [vmem:[#allocation13 + $0x94] sm:$0xf0]  ;;  %816 = vmatpush.bf16.msra.mxu0 %v4193_v54 }
  0x5d   :  { %794 = vmatpush.bf16.msrb.mxu2 %v4125_v0  ;;  %v5825_v0 = vld [vmem:[#allocation13 + $0x1b4] sm:$0xf0] }
  0x5e   :  { %804 = vmatpush.bf16.msrb.mxu3 %v4049_v48  ;;  %v4177_v1 = vor.u32 %v5825_v0, %v4176_v63  ;;  %v5809_v48 = vld [vmem:[#allocation13 + $0x134] sm:$0xf0] }
  0x5f   :  { %v5805_v54 = vld [vmem:[#allocation13 + $0x114] sm:$0xf0] }
  0x60   :  { %782 = vmatpush.bf16.msrb.mxu1 %v3981_v8  ;;  %817 = vmatpush.bf16.msra.mxu0 %v4177_v1  ;;  %v4017_v8 = vor.u32 %v5785_v6, %v4016_v5 }
  0x61   :  { %795 = vmatpush.bf16.msrb.mxu2 %v4109_v18  ;;  %v5781_v18 = vld [vmem:[#allocation13 + $0x54] sm:$0xf0] }
  0x62   :  { %v4001_v20 = vor.u32 %v5781_v18, %v4000_v17 }
  0x64   :  { %783 = vmatpush.bf16.msrb.mxu1 %v3965_v26 }
  0x65   :  { %796 = vmatpush.bf16.msrb.mxu2 %v4093_v36 }
  0xa9   :  { %v215_v2 = vpop.f32.mrf.mxu0 }
  0xaa   :  { %v216_v7 = vadd.f32 %v6235_v57, %v215_v2  ;;  %v4032_v57 = vld [vmem:[#allocation13 + $0x88] sm:$0xf]  ;;  %v5823_v2 = vld [vmem:[#allocation13 + $0x1ac] sm:$0xf] }
  0xab   :  { %v4033_v60 = vor.u32 %v5789_v58, %v4032_v57  ;;  %v4181_v4 = vor.u32 %v5823_v2, %v4178_v3  ;;  %v4097_v57 = vor.u32 %v5805_v54, %v4096_v53  ;;  %v4098_v58 = vld [vmem:[#allocation13 + $0x118] sm:$0xf0] }
  0xac   :  { %v219_v14 = vmul.f32 0.2, %v216_v7  ;;  %v4101_v59 = vor.u32 %v5803_v55, %v4098_v58 }
  0xad   :  { %805 = vmatpush.bf16.msrb.mxu3 %v4033_v60 }
  0xae   :  { %v220_v23 = vmax.f32 %v216_v7, %v219_v14  ;;  %v5783_v7 = vld [vmem:[#allocation13 + $0x6c] sm:$0xf]  ;;  %v4161_v14 = vor.u32 %v5821_v12, %v4160_v11  ;;  %v418_v11 = vld [vmem:[#allocation15] sm:$0xf] }
  0xaf   :  { %v4021_v10 = vor.u32 %v5783_v7, %v4018_v9  ;;  %v422_v12 = vperm.slane %v418_v11, 0  ;;  %v423_v15 = vperm.slane %v418_v11, 1 }
  0xb0   :  { %v238_v28 = vpack.c.bf16 %v220_v23, %v220_v23  ;;  %818 = vmatpush.bf16.msra.mxu0 %v4161_v14  ;;  %v4144_v23 = vld [vmem:[#allocation13 + $0x168] sm:$0xf] }
  0xb1   :  { %v217_v33 = vpop.f32.mrf.mxu0  ;;  %806 = vmatpush.bf16.msrb.mxu3 %v4017_v8  ;;  %v4145_v26 = vor.u32 %v5817_v24, %v4144_v23 }
  0xb2   :  { %332 = vmatmul.bf16.vlgmr.msra.gmra.mxu1 %v238_v28  ;;  %345 = vmatmul.bf16.vlgmr.msra.gmra.mxu2 %v238_v28  ;;  %v4149_v28 = vor.u32 %v5815_v25, %v4146_v27  ;;  %v3986_v33 = vld [vmem:[#allocation13 + $0x38] sm:$0xf0] }
  0xb3   :  { %828 = vmatpush.bf16.msra.mxu1 %v4085_v29  ;;  %841 = vmatpush.bf16.msra.mxu2 %v4213_v44  ;;  %v3984_v29 = vld [vmem:[#allocation13 + $0x28] sm:$0xf]  ;;  %v3989_v36 = vor.u32 %v5775_v31, %v3986_v33  ;;  %v3970_v44 = vld [vmem:[#allocation13 + $0x18] sm:$0xf0]  ;;  %v425_v33 = vperm.slane %v418_v11, 3 }
  0xb4   :  { %819 = vmatpush.bf16.msra.mxu0 %v4145_v26  ;;  %v3985_v32 = vor.u32 %v5777_v30, %v3984_v29  ;;  %v3973_v46 = vor.u32 %v5771_v43, %v3970_v44  ;;  %v424_v29 = vperm.slane %v418_v11, 2 }
  0xb5   :  { %807 = vmatpush.bf16.msrb.mxu3 %v4001_v20 }
  0xb7   :  { %829 = vmatpush.bf16.msra.mxu1 %v4069_v38  ;;  %842 = vmatpush.bf16.msra.mxu2 %v4197_v56  ;;  %v5811_v38 = vld [vmem:[#allocation13 + $0x14c] sm:$0xf]  ;;  %v237_v56 = vld [vmem:[#allocation12] sm:$0x3] }
  0xb8   :  { %v4133_v41 = vor.u32 %v5811_v38, %v4130_v39  ;;  %820 = vmatpush.bf16.msra.mxu0 %v4129_v37  ;;  %v240_v60 = vperm.slane %v237_v56, 0  ;;  %v241_v0 = vperm.slane %v237_v56, 1 }
  0xb9   :  { %808 = vmatpush.bf16.msrb.mxu3 %v3985_v32 }
  0xbb   :  { %830 = vmatpush.bf16.msra.mxu1 %v4053_v50  ;;  %843 = vmatpush.bf16.msra.mxu2 %v4181_v4  ;;  %v4113_v50 = vor.u32 %v5809_v48, %v4112_v47 }
  0xbd   :  { %809 = vmatpush.bf16.msrb.mxu3 %v3969_v45  ;;  %821 = vmatpush.bf16.msra.mxu0 %v4113_v50 }
  0xbf   :  { %831 = vmatpush.bf16.msra.mxu1 %v4037_v62  ;;  %844 = vmatpush.bf16.msra.mxu2 %v4165_v16 }
  0xc1   :  { %822 = vmatpush.bf16.msra.mxu0 %v4097_v57 }
  0xc3   :  { %832 = vmatpush.bf16.msra.mxu1 %v4021_v10  ;;  %845 = vmatpush.bf16.msra.mxu2 %v4149_v28 }
  0xc7   :  { %833 = vmatpush.bf16.msra.mxu1 %v4005_v22  ;;  %846 = vmatpush.bf16.msra.mxu2 %v4133_v41 }
  0xcb   :  { %834 = vmatpush.bf16.msra.mxu1 %v3989_v36  ;;  %847 = vmatpush.bf16.msra.mxu2 %v4117_v52 }
  0xcf   :  { %835 = vmatpush.bf16.msra.mxu1 %v3973_v46  ;;  %848 = vmatpush.bf16.msra.mxu2 %v4101_v59 }
 0x12f   :  { %v333_v61 = vpop.f32.mrf.mxu1 }
 0x130   :  { %v334_v62 = vadd.f32 %v333_v61, %v240_v60 }
 0x132   :  { %v350_v63 = vmul.f32 0.2, %v334_v62 }
 0x134   :  { %v352_v1 = vmax.f32 %v334_v62, %v350_v63 }
 0x135   :  { %v346_v2 = vpop.f32.mrf.mxu2 }
 0x136   :  { %v419_v3 = vpack.c.bf16 %v352_v1, %v352_v1  ;;  %v347_v4 = vadd.f32 %v346_v2, %v241_v0 }
 0x137   :  { %v335_v5 = vpop.f32.mrf.mxu1 }
 0x138   :  { %v351_v6 = vmul.f32 0.2, %v347_v4  ;;  %758 = vmatmul.bf16.vlgmr.msra.gmra.mxu3 %v419_v3  ;;  %784 = vmatmul.bf16.vlgmr.msrb.gmra.mxu1 %v419_v3 }
 0x13a   :  { %v353_v7 = vmax.f32 %v347_v4, %v351_v6 }
 0x13c   :  { %v420_v8 = vpack.c.bf16 %v353_v7, %v353_v7 }
 0x13d   :  { %v348_v9 = vpop.f32.mrf.mxu2 }
 0x13e   :  { %771 = vmatmul.bf16.vlgmr.msrb.gmra.mxu0 %v420_v8  ;;  %797 = vmatmul.bf16.vlgmr.msrb.gmra.mxu2 %v420_v8 }
 0x148   :  { %810 = vmatmul.bf16.vlgmr.msrb.gmra.mxu3 %v419_v3  ;;  %836 = vmatmul.bf16.vlgmr.msra.gmra.mxu1 %v419_v3 }
 0x14e   :  { %823 = vmatmul.bf16.vlgmr.msra.gmra.mxu0 %v420_v8  ;;  %849 = vmatmul.bf16.vlgmr.msra.gmra.mxu2 %v420_v8 }
 0x1b5   :  { %v785_v10 = vpop.f32.mrf.mxu1 }
 0x1b6   :  { %v786_v19 = vadd.f32 %v785_v10, %v423_v15 }
 0x1bb   :  { %v759_v13 = vpop.f32.mrf.mxu3  ;;  %v772_v14 = vpop.f32.mrf.mxu0 }
 0x1bc   :  { %v760_v16 = vadd.f32 %v759_v13, %v422_v12 }
 0x1bd   :  { %v787_v17 = vpop.f32.mrf.mxu1 }
 0x1be   :  { %v773_v18 = vadd.f32 %v772_v14, %v760_v16 }
 0x1c0   :  { %v854_v20 = vmul.f32 0.2, %v773_v18 }
 0x1c1   :  { %v798_v21 = vpop.f32.mrf.mxu2 }
 0x1c2   :  { %v6600_v22 = vmax.f32 %v773_v18, %v854_v20  ;;  %v799_v23 = vadd.f32 %v798_v21, %v786_v19 }
 0x1c3   :  { %v761_v24 = vpop.f32.mrf.mxu3  ;;  %v774_v25 = vpop.f32.mrf.mxu0 }
 0x1c4   :  { %v855_v26 = vmul.f32 0.2, %v799_v23 }
 0x1c5   :  { %v837_v27 = vpop.f32.mrf.mxu1 }
 0x1c6   :  { %v6602_v28 = vmax.f32 %v799_v23, %v855_v26  ;;  %v838_v37 = vadd.f32 %v837_v27, %v425_v33 }
 0x1c9   :  { %v800_v30 = vpop.f32.mrf.mxu2 }
 0x1cb   :  { %v811_v31 = vpop.f32.mrf.mxu3  ;;  %v824_v32 = vpop.f32.mrf.mxu0 }
 0x1cc   :  { %v812_v34 = vadd.f32 %v811_v31, %v424_v29 }
 0x1cd   :  { %v839_v35 = vpop.f32.mrf.mxu1 }
 0x1ce   :  { %v825_v36 = vadd.f32 %v824_v32, %v812_v34 }
 0x1d0   :  { %v856_v38 = vmul.f32 0.2, %v825_v36 }
 0x1d1   :  { %v850_v39 = vpop.f32.mrf.mxu2 }
 0x1d2   :  { %v6604_v40 = vmax.f32 %v825_v36, %v856_v38  ;;  %v851_v41 = vadd.f32 %v850_v39, %v838_v37 }
 0x1d3   :  { %v813_v42 = vpop.f32.mrf.mxu3  ;;  %v826_v43 = vpop.f32.mrf.mxu0 }
 0x1d4   :  { %v857_v44 = vmul.f32 0.2, %v851_v41 }
 0x1d6   :  { %v6606_v45 = vmax.f32 %v851_v41, %v857_v44 }
 0x1d9   :  { %v852_v46 = vpop.f32.mrf.mxu2 }
 0x1da   :  { %6490 = dma.done.wait [#allocation4], 32768 }
 0x1db   :  { %6491 = vsyncadd [#allocation4], 4294934528  ;;  %v4440_v47 = vld [vmem:[#allocation2 + $0x1c0] sm:$0xf] }
 0x1dc   :  { %v5894_v48 = vld [vmem:[#allocation2 + $0x1dc] sm:$0xf0] }
 0x1dd   :  { %v4696_v49 = vld [vmem:[#allocation2 + $0x3c0] sm:$0xf]  ;;  %v4441_v50 = vor.u32 %v5894_v48, %v4440_v47 }
 0x1de   :  { %v5958_v51 = vld [vmem:[#allocation2 + $0x3dc] sm:$0xf0] }
 0x1df   :  { %v5208_v52 = vld [vmem:[#allocation2 + $0x7c0] sm:$0xf]  ;;  %v4697_v54 = vor.u32 %v5958_v51, %v4696_v49  ;;  %2424 = vmatpush.bf16.msra.mxu3 %v4441_v50 }
 0x1e0   :  { %v6086_v53 = vld [vmem:[#allocation2 + $0x7dc] sm:$0xf0] }
 0x1e1   :  { %v5209_v55 = vor.u32 %v6086_v53, %v5208_v52  ;;  %v4952_v56 = vld [vmem:[#allocation2 + $0x5c0] sm:$0xf]  ;;  %2437 = vmatpush.bf16.msrb.mxu0 %v4697_v54 }
 0x1e2   :  { %v6022_v57 = vld [vmem:[#allocation2 + $0x5dc] sm:$0xf0] }
 0x1e3   :  { %v4408_v58 = vld [vmem:[#allocation2 + $0x180] sm:$0xf]  ;;  %v4953_v59 = vor.u32 %v6022_v57, %v4952_v56  ;;  %2463 = vmatpush.bf16.msrb.mxu2 %v5209_v55 }
 0x1e4   :  { %v5886_v60 = vld [vmem:[#allocation2 + $0x19c] sm:$0xf0] }
 0x1e5   :  { %v4664_v61 = vld [vmem:[#allocation2 + $0x380] sm:$0xf]  ;;  %v4409_v63 = vor.u32 %v5886_v60, %v4408_v58  ;;  %2450 = vmatpush.bf16.msrb.mxu1 %v4953_v59 }
 0x1e6   :  { %v5950_v62 = vld [vmem:[#allocation2 + $0x39c] sm:$0xf0] }
 0x1e7   :  { %v4665_v0 = vor.u32 %v5950_v62, %v4664_v61  ;;  %v5176_v1 = vld [vmem:[#allocation2 + $0x780] sm:$0xf]  ;;  %2425 = vmatpush.bf16.msra.mxu3 %v4409_v63 }
 0x1e8   :  { %v6078_v2 = vld [vmem:[#allocation2 + $0x79c] sm:$0xf0] }
 0x1e9   :  { %v4920_v3 = vld [vmem:[#allocation2 + $0x580] sm:$0xf]  ;;  %v5177_v4 = vor.u32 %v6078_v2, %v5176_v1  ;;  %2438 = vmatpush.bf16.msrb.mxu0 %v4665_v0 }
 0x1ea   :  { %v6014_v5 = vld [vmem:[#allocation2 + $0x59c] sm:$0xf0] }
 0x1eb   :  { %v4376_v6 = vld [vmem:[#allocation2 + $0x140] sm:$0xf]  ;;  %v4921_v8 = vor.u32 %v6014_v5, %v4920_v3  ;;  %2464 = vmatpush.bf16.msrb.mxu2 %v5177_v4 }
 0x1ec   :  { %v5878_v7 = vld [vmem:[#allocation2 + $0x15c] sm:$0xf0] }
 0x1ed   :  { %v4632_v9 = vld [vmem:[#allocation2 + $0x340] sm:$0xf]  ;;  %v4377_v12 = vor.u32 %v5878_v7, %v4376_v6  ;;  %2451 = vmatpush.bf16.msrb.mxu1 %v4921_v8 }
 0x1ee   :  { %v5942_v10 = vld [vmem:[#allocation2 + $0x35c] sm:$0xf0] }
 0x1ef   :  { %v5144_v11 = vld [vmem:[#allocation2 + $0x740] sm:$0xf]  ;;  %v4633_v16 = vor.u32 %v5942_v10, %v4632_v9  ;;  %2426 = vmatpush.bf16.msra.mxu3 %v4377_v12 }
 0x1f0   :  { %v6070_v13 = vld [vmem:[#allocation2 + $0x75c] sm:$0xf0] }
 0x1f1   :  { %v4888_v14 = vld [vmem:[#allocation2 + $0x540] sm:$0xf]  ;;  %v5145_v17 = vor.u32 %v6070_v13, %v5144_v11  ;;  %2439 = vmatpush.bf16.msrb.mxu0 %v4633_v16  ;;  %v4442_v16 = vld [vmem:[#allocation2 + $0x1e0] sm:$0xf0] }
 0x1f2   :  { %v6006_v15 = vld [vmem:[#allocation2 + $0x55c] sm:$0xf0] }
 0x1f3   :  { %v4344_v18 = vld [vmem:[#allocation2 + $0x100] sm:$0xf]  ;;  %v4889_v21 = vor.u32 %v6006_v15, %v4888_v14  ;;  %2465 = vmatpush.bf16.msrb.mxu2 %v5145_v17  ;;  %v5890_v15 = vld [vmem:[#allocation2 + $0x1c4] sm:$0xf] }
 0x1f4   :  { %v5870_v19 = vld [vmem:[#allocation2 + $0x11c] sm:$0xf0]  ;;  %v5954_v17 = vld [vmem:[#allocation2 + $0x3c4] sm:$0xf] }
 0x1f5   :  { %v4600_v20 = vld [vmem:[#allocation2 + $0x300] sm:$0xf]  ;;  %v4345_v29 = vor.u32 %v5870_v19, %v4344_v18  ;;  %2452 = vmatpush.bf16.msrb.mxu1 %v4889_v21  ;;  %v4698_v19 = vld [vmem:[#allocation2 + $0x3e0] sm:$0xf0] }
 0x1f6   :  { %v5934_v23 = vld [vmem:[#allocation2 + $0x31c] sm:$0xf0]  ;;  %v5210_v21 = vld [vmem:[#allocation2 + $0x7e0] sm:$0xf0] }
 0x1f7   :  { %v5112_v24 = vld [vmem:[#allocation2 + $0x700] sm:$0xf]  ;;  %v4601_v30 = vor.u32 %v5934_v23, %v4600_v20  ;;  %2427 = vmatpush.bf16.msra.mxu3 %v4345_v29  ;;  %v6082_v20 = vld [vmem:[#allocation2 + $0x7c4] sm:$0xf]  ;;  %v4445_v29 = vor.u32 %v5890_v15, %v4442_v16 }
 0x1f8   :  { %v6062_v25 = vld [vmem:[#allocation2 + $0x71c] sm:$0xf0] }
 0x1f9   :  { %v4856_v26 = vld [vmem:[#allocation2 + $0x500] sm:$0xf]  ;;  %v5113_v31 = vor.u32 %v6062_v25, %v5112_v24  ;;  %2440 = vmatpush.bf16.msrb.mxu0 %v4601_v30  ;;  %v6018_v25 = vld [vmem:[#allocation2 + $0x5c4] sm:$0xf]  ;;  %v4701_v30 = vor.u32 %v5954_v17, %v4698_v19 }
 0x1fa   :  { %v5998_v27 = vld [vmem:[#allocation2 + $0x51c] sm:$0xf0]  ;;  %v4282_v19 = vld [vmem:[#allocation2 + $0xa0] sm:$0xf0] }
 0x1fb   :  { %v4312_v32 = vld [vmem:[#allocation2 + $0xc0] sm:$0xf]  ;;  %v4857_v35 = vor.u32 %v5998_v27, %v4856_v26  ;;  %2466 = vmatpush.bf16.msrb.mxu2 %v5113_v31  ;;  %v4954_v26 = vld [vmem:[#allocation2 + $0x5e0] sm:$0xf0]  ;;  %v5213_v31 = vor.u32 %v6082_v20, %v5210_v21 }
 0x1fc   :  { %v5862_v33 = vld [vmem:[#allocation2 + $0xdc] sm:$0xf0]  ;;  %v5914_v20 = vld [vmem:[#allocation2 + $0x284] sm:$0xf] }
 0x1fd   :  { %v4568_v34 = vld [vmem:[#allocation2 + $0x2c0] sm:$0xf]  ;;  %v4313_v42 = vor.u32 %v5862_v33, %v4312_v32  ;;  %2453 = vmatpush.bf16.msrb.mxu1 %v4857_v35  ;;  %v5882_v32 = vld [vmem:[#allocation2 + $0x184] sm:$0xf]  ;;  %v4957_v35 = vor.u32 %v6018_v25, %v4954_v26 }
 0x1fe   :  { %v5926_v36 = vld [vmem:[#allocation2 + $0x2dc] sm:$0xf0]  ;;  %v4410_v33 = vld [vmem:[#allocation2 + $0x1a0] sm:$0xf0] }
 0x1ff   :  { %v5080_v37 = vld [vmem:[#allocation2 + $0x6c0] sm:$0xf]  ;;  %v4569_v43 = vor.u32 %v5926_v36, %v4568_v34  ;;  %2428 = vmatpush.bf16.msra.mxu3 %v4313_v42  ;;  %v5946_v34 = vld [vmem:[#allocation2 + $0x384] sm:$0xf] }
 0x200   :  { %v6054_v38 = vld [vmem:[#allocation2 + $0x6dc] sm:$0xf0]  ;;  %v4666_v36 = vld [vmem:[#allocation2 + $0x3a0] sm:$0xf0] }
 0x201   :  { %v4824_v39 = vld [vmem:[#allocation2 + $0x4c0] sm:$0xf]  ;;  %v5081_v44 = vor.u32 %v6054_v38, %v5080_v37  ;;  %2441 = vmatpush.bf16.msrb.mxu0 %v4569_v43  ;;  %v6074_v37 = vld [vmem:[#allocation2 + $0x784] sm:$0xf]  ;;  %v6614_v43 = vpack.c.bf16 %v6606_v45, %v6606_v45 }
 0x202   :  { %v5990_v41 = vld [vmem:[#allocation2 + $0x4dc] sm:$0xf0]  ;;  %v5178_v38 = vld [vmem:[#allocation2 + $0x7a0] sm:$0xf0] }
 0x203   :  { %v4280_v46 = vld [vmem:[#allocation2 + $0x80] sm:$0xf]  ;;  %v4825_v49 = vor.u32 %v5990_v41, %v4824_v39  ;;  %2467 = vmatpush.bf16.msrb.mxu2 %v5081_v44  ;;  %v6610_v39 = vpack.c.bf16 %v6600_v22, %v6600_v22  ;;  %v6010_v41 = vld [vmem:[#allocation2 + $0x584] sm:$0xf]  ;;  %v6618_v44 = vpack.c.bf16 %v6602_v28, %v6602_v28  ;;  %v4669_v22 = vor.u32 %v5946_v34, %v4666_v36 }
 0x204   :  { %v5854_v47 = vld [vmem:[#allocation2 + $0x9c] sm:$0xf0]  ;;  %v4922_v42 = vld [vmem:[#allocation2 + $0x5a0] sm:$0xf0] }
 0x205   :  { %v4536_v48 = vld [vmem:[#allocation2 + $0x280] sm:$0xf]  ;;  %v4281_v55 = vor.u32 %v5854_v47, %v4280_v46  ;;  %2454 = vmatpush.bf16.msrb.mxu1 %v4825_v49  ;;  %v4413_v46 = vor.u32 %v5882_v32, %v4410_v33  ;;  %v6622_v47 = vpack.c.bf16 %v6604_v40, %v6604_v40  ;;  %v5874_v49 = vld [vmem:[#allocation2 + $0x144] sm:$0xf]  ;;  %v4925_v45 = vor.u32 %v6010_v41, %v4922_v42 }
 0x206   :  { %v5918_v50 = vld [vmem:[#allocation2 + $0x29c] sm:$0xf0]  ;;  %v5146_v28 = vld [vmem:[#allocation2 + $0x760] sm:$0xf0] }
 0x207   :  { %v5048_v51 = vld [vmem:[#allocation2 + $0x680] sm:$0xf]  ;;  %v4537_v56 = vor.u32 %v5918_v50, %v4536_v48  ;;  %2429 = vmatpush.bf16.msra.mxu3 %v4281_v55  ;;  %v5181_v48 = vor.u32 %v6074_v37, %v5178_v38  ;;  %v4378_v50 = vld [vmem:[#allocation2 + $0x160] sm:$0xf0] }
 0x208   :  { %v6046_v52 = vld [vmem:[#allocation2 + $0x69c] sm:$0xf0]  ;;  %v4890_v55 = vld [vmem:[#allocation2 + $0x560] sm:$0xf0]  ;;  %v4381_v40 = vor.u32 %v5874_v49, %v4378_v50 }
 0x209   :  { %v4792_v53 = vld [vmem:[#allocation2 + $0x480] sm:$0xf]  ;;  %v5049_v57 = vor.u32 %v6046_v52, %v5048_v51  ;;  %2442 = vmatpush.bf16.msrb.mxu0 %v4537_v56  ;;  %v5938_v51 = vld [vmem:[#allocation2 + $0x344] sm:$0xf] }
 0x20a   :  { %v5982_v54 = vld [vmem:[#allocation2 + $0x49c] sm:$0xf0]  ;;  %v4634_v52 = vld [vmem:[#allocation2 + $0x360] sm:$0xf0] }
 0x20b   :  { %v4248_v58 = vld [vmem:[#allocation2 + $0x40] sm:$0xf]  ;;  %v4793_v61 = vor.u32 %v5982_v54, %v4792_v53  ;;  %2468 = vmatpush.bf16.msrb.mxu2 %v5049_v57  ;;  %v6066_v53 = vld [vmem:[#allocation2 + $0x744] sm:$0xf]  ;;  %v4637_v56 = vor.u32 %v5938_v51, %v4634_v52 }
 0x20c   :  { %v5846_v59 = vld [vmem:[#allocation2 + $0x5c] sm:$0xf0]  ;;  %v6002_v54 = vld [vmem:[#allocation2 + $0x544] sm:$0xf]  ;;  %v5149_v57 = vor.u32 %v6066_v53, %v5146_v28 }
 0x20d   :  { %v4504_v60 = vld [vmem:[#allocation2 + $0x240] sm:$0xf]  ;;  %v4249_v3 = vor.u32 %v5846_v59, %v4248_v58  ;;  %2455 = vmatpush.bf16.msrb.mxu1 %v4793_v61  ;;  %v5866_v58 = vld [vmem:[#allocation2 + $0x104] sm:$0xf]  ;;  %v4893_v61 = vor.u32 %v6002_v54, %v4890_v55 }
 0x20e   :  { %v5910_v62 = vld [vmem:[#allocation2 + $0x25c] sm:$0xf0]  ;;  %v4346_v59 = vld [vmem:[#allocation2 + $0x120] sm:$0xf0] }
 0x20f   :  { %v5016_v63 = vld [vmem:[#allocation2 + $0x640] sm:$0xf]  ;;  %v4505_v6 = vor.u32 %v5910_v62, %v4504_v60  ;;  %2430 = vmatpush.bf16.msra.mxu3 %v4249_v3  ;;  %v5930_v60 = vld [vmem:[#allocation2 + $0x304] sm:$0xf]  ;;  %v4349_v3 = vor.u32 %v5866_v58, %v4346_v59  ;;  %v5959_v59 = vld [vmem:[#allocation2 + $0x3e4] sm:$0xf0] }
 0x210   :  { %v6038_v0 = vld [vmem:[#allocation2 + $0x65c] sm:$0xf0]  ;;  %v4602_v62 = vld [vmem:[#allocation2 + $0x320] sm:$0xf0] }
 0x211   :  { %v4760_v1 = vld [vmem:[#allocation2 + $0x440] sm:$0xf]  ;;  %v5017_v7 = vor.u32 %v6038_v0, %v5016_v63  ;;  %2443 = vmatpush.bf16.msrb.mxu0 %v4505_v6  ;;  %v6058_v63 = vld [vmem:[#allocation2 + $0x704] sm:$0xf] }
 0x212   :  { %v5974_v2 = vld [vmem:[#allocation2 + $0x45c] sm:$0xf0]  ;;  %v5114_v0 = vld [vmem:[#allocation2 + $0x720] sm:$0xf0] }
 0x213   :  { %v4216_v4 = vld [vmem:[#allocation2] sm:$0xf]  ;;  %v4761_v11 = vor.u32 %v5974_v2, %v4760_v1  ;;  %2469 = vmatpush.bf16.msrb.mxu2 %v5017_v7  ;;  %v5994_v1 = vld [vmem:[#allocation2 + $0x504] sm:$0xf] }
 0x214   :  { %v5838_v5 = vld [vmem:[#allocation2 + $0x1c] sm:$0xf0]  ;;  %v4858_v2 = vld [vmem:[#allocation2 + $0x520] sm:$0xf0] }
 0x215   :  { %v4472_v8 = vld [vmem:[#allocation2 + $0x200] sm:$0xf]  ;;  %v4217_v18 = vor.u32 %v5838_v5, %v4216_v4  ;;  %2456 = vmatpush.bf16.msrb.mxu1 %v4761_v11  ;;  %v4605_v4 = vor.u32 %v5930_v60, %v4602_v62  ;;  %v5117_v5 = vor.u32 %v6058_v63, %v5114_v0  ;;  %v5858_v6 = vld [vmem:[#allocation2 + $0xc4] sm:$0xf]  ;;  %v5216_v60 = vld [vmem:[#allocation2 + $0x7c8] sm:$0xf] }
 0x216   :  { %v5902_v9 = vld [vmem:[#allocation2 + $0x21c] sm:$0xf0]  ;;  %v4314_v7 = vld [vmem:[#allocation2 + $0xe0] sm:$0xf0]  ;;  %v4960_v0 = vld [vmem:[#allocation2 + $0x5c8] sm:$0xf] }
 0x217   :  { %v4984_v10 = vld [vmem:[#allocation2 + $0x600] sm:$0xf]  ;;  %v4473_v23 = vor.u32 %v5902_v9, %v4472_v8  ;;  %2431 = vmatpush.bf16.msra.mxu3 %v4217_v18  ;;  %v5922_v8 = vld [vmem:[#allocation2 + $0x2c4] sm:$0xf]  ;;  %v4861_v9 = vor.u32 %v5994_v1, %v4858_v2  ;;  %v4317_v15 = vor.u32 %v5858_v6, %v4314_v7  ;;  %v6023_v1 = vld [vmem:[#allocation2 + $0x5e4] sm:$0xf0] }
 0x218   :  { %v6030_v12 = vld [vmem:[#allocation2 + $0x61c] sm:$0xf0]  ;;  %v6050_v11 = vld [vmem:[#allocation2 + $0x6c4] sm:$0xf]  ;;  %v4416_v6 = vld [vmem:[#allocation2 + $0x188] sm:$0xf] }
 0x219   :  { %v4728_v13 = vld [vmem:[#allocation2 + $0x400] sm:$0xf]  ;;  %v4985_v24 = vor.u32 %v6030_v12, %v4984_v10  ;;  %2444 = vmatpush.bf16.msrb.mxu0 %v4473_v23  ;;  %v4570_v10 = vld [vmem:[#allocation2 + $0x2e0] sm:$0xf0]  ;;  %v5887_v7 = vld [vmem:[#allocation2 + $0x1a4] sm:$0xf0] }
 0x21a   :  { %v5966_v14 = vld [vmem:[#allocation2 + $0x41c] sm:$0xf0]  ;;  %2432 = vmatmul.bf16.vlgmr.msra.gmra.mxu3 %v6610_v39  ;;  %v5082_v12 = vld [vmem:[#allocation2 + $0x6e0] sm:$0xf0]  ;;  %v4573_v16 = vor.u32 %v5922_v8, %v4570_v10  ;;  %v4672_v8 = vld [vmem:[#allocation2 + $0x388] sm:$0xf] }
 0x21b   :  { %v4729_v27 = vor.u32 %v5966_v14, %v4728_v13  ;;  %2470 = vmatpush.bf16.msrb.mxu2 %v4985_v24  ;;  %2476 = vmatpush.bf16.msrb.mxu3 %v4445_v29  ;;  %v5986_v13 = vld [vmem:[#allocation2 + $0x4c4] sm:$0xf]  ;;  %v5085_v17 = vor.u32 %v6050_v11, %v5082_v12  ;;  %v5951_v10 = vld [vmem:[#allocation2 + $0x3a4] sm:$0xf0] }
 0x21c   :  { %2445 = vmatmul.bf16.vlgmr.msrb.gmra.mxu0 %v6618_v44  ;;  %v4826_v14 = vld [vmem:[#allocation2 + $0x4e0] sm:$0xf0]  ;;  %v5184_v11 = vld [vmem:[#allocation2 + $0x788] sm:$0xf] }
 0x21d   :  { %2457 = vmatpush.bf16.msrb.mxu1 %v4729_v27  ;;  %2489 = vmatpush.bf16.msra.mxu0 %v4701_v30  ;;  %v5850_v18 = vld [vmem:[#allocation2 + $0x84] sm:$0xf]  ;;  %v4829_v21 = vor.u32 %v5986_v13, %v4826_v14  ;;  %v6079_v12 = vld [vmem:[#allocation2 + $0x7a4] sm:$0xf0] }
 0x21e   :  { %2471 = vmatmul.bf16.vlgmr.msrb.gmra.mxu2 %v6614_v43  ;;  %v4538_v23 = vld [vmem:[#allocation2 + $0x2a0] sm:$0xf0]  ;;  %v4285_v29 = vor.u32 %v5850_v18, %v4282_v19  ;;  %v4928_v13 = vld [vmem:[#allocation2 + $0x588] sm:$0xf] }
 0x21f   :  { %2515 = vmatpush.bf16.msra.mxu2 %v5213_v31  ;;  %2477 = vmatpush.bf16.msrb.mxu3 %v4413_v46  ;;  %v6042_v24 = vld [vmem:[#allocation2 + $0x684] sm:$0xf]  ;;  %v4541_v30 = vor.u32 %v5914_v20, %v4538_v23  ;;  %v6015_v14 = vld [vmem:[#allocation2 + $0x5a4] sm:$0xf0] }
 0x220   :  { %2458 = vmatmul.bf16.vlgmr.msrb.gmra.mxu1 %v6622_v47  ;;  %v5050_v25 = vld [vmem:[#allocation2 + $0x6a0] sm:$0xf0]  ;;  %v4384_v18 = vld [vmem:[#allocation2 + $0x148] sm:$0xf] }
 0x221   :  { %2502 = vmatpush.bf16.msra.mxu1 %v4957_v35  ;;  %2490 = vmatpush.bf16.msra.mxu0 %v4669_v22  ;;  %v5978_v26 = vld [vmem:[#allocation2 + $0x484] sm:$0xf]  ;;  %v5053_v31 = vor.u32 %v6042_v24, %v5050_v25  ;;  %v5879_v19 = vld [vmem:[#allocation2 + $0x164] sm:$0xf0] }
 0x222   :  { %v4794_v27 = vld [vmem:[#allocation2 + $0x4a0] sm:$0xf0]  ;;  %v4640_v20 = vld [vmem:[#allocation2 + $0x348] sm:$0xf] }
 0x223   :  { %2516 = vmatpush.bf16.msra.mxu2 %v5181_v48  ;;  %2478 = vmatpush.bf16.msrb.mxu3 %v4381_v40  ;;  %v5842_v32 = vld [vmem:[#allocation2 + $0x44] sm:$0xf]  ;;  %v4797_v35 = vor.u32 %v5978_v26, %v4794_v27  ;;  %v4448_v40 = vld [vmem:[#allocation2 + $0x1c8] sm:$0xf] }
 0x224   :  { %v4250_v33 = vld [vmem:[#allocation2 + $0x60] sm:$0xf0]  ;;  %v5943_v23 = vld [vmem:[#allocation2 + $0x364] sm:$0xf0] }
 0x225   :  { %2503 = vmatpush.bf16.msra.mxu1 %v4925_v45  ;;  %2491 = vmatpush.bf16.msra.mxu0 %v4637_v56  ;;  %v5906_v34 = vld [vmem:[#allocation2 + $0x244] sm:$0xf]  ;;  %v4253_v46 = vor.u32 %v5842_v32, %v4250_v33  ;;  %v5895_v56 = vld [vmem:[#allocation2 + $0x1e4] sm:$0xf0] }
 0x226   :  { %v4506_v36 = vld [vmem:[#allocation2 + $0x260] sm:$0xf0]  ;;  %v5152_v24 = vld [vmem:[#allocation2 + $0x748] sm:$0xf] }
 0x227   :  { %2517 = vmatpush.bf16.msra.mxu2 %v5149_v57  ;;  %2479 = vmatpush.bf16.msrb.mxu3 %v4349_v3  ;;  %v6034_v37 = vld [vmem:[#allocation2 + $0x644] sm:$0xf]  ;;  %v4509_v49 = vor.u32 %v5906_v34, %v4506_v36  ;;  %v4704_v57 = vld [vmem:[#allocation2 + $0x3c8] sm:$0xf]  ;;  %v4449_v3 = vor.u32 %v5895_v56, %v4448_v40 }
 0x228   :  { %v5018_v38 = vld [vmem:[#allocation2 + $0x660] sm:$0xf0]  ;;  %v6071_v25 = vld [vmem:[#allocation2 + $0x764] sm:$0xf0] }
 0x229   :  { %2504 = vmatpush.bf16.msra.mxu1 %v4893_v61  ;;  %2492 = vmatpush.bf16.msra.mxu0 %v4605_v4  ;;  %v5970_v41 = vld [vmem:[#allocation2 + $0x444] sm:$0xf]  ;;  %v5021_v50 = vor.u32 %v6034_v37, %v5018_v38  ;;  %v6087_v61 = vld [vmem:[#allocation2 + $0x7e4] sm:$0xf0]  ;;  %v4705_v4 = vor.u32 %v5959_v59, %v4704_v57 }
 0x22a   :  { %v4762_v42 = vld [vmem:[#allocation2 + $0x460] sm:$0xf0]  ;;  %v4896_v26 = vld [vmem:[#allocation2 + $0x548] sm:$0xf] }
 0x22b   :  { %2518 = vmatpush.bf16.msra.mxu2 %v5117_v5  ;;  %2480 = vmatpush.bf16.msrb.mxu3 %v4317_v15  ;;  %v5834_v22 = vld [vmem:[#allocation2 + $0x4] sm:$0xf]  ;;  %v4765_v53 = vor.u32 %v5970_v41, %v4762_v42  ;;  %v5217_v5 = vor.u32 %v6087_v61, %v5216_v60  ;;  %v4417_v15 = vor.u32 %v5887_v7, %v4416_v6  ;;  %v6007_v27 = vld [vmem:[#allocation2 + $0x564] sm:$0xf0] }
 0x22c   :  { %v4218_v48 = vld [vmem:[#allocation2 + $0x20] sm:$0xf0]  ;;  %v4352_v32 = vld [vmem:[#allocation2 + $0x108] sm:$0xf] }
 0x22d   :  { %2505 = vmatpush.bf16.msra.mxu1 %v4861_v9  ;;  %2493 = vmatpush.bf16.msra.mxu0 %v4573_v16  ;;  %v5898_v51 = vld [vmem:[#allocation2 + $0x204] sm:$0xf]  ;;  %v4221_v58 = vor.u32 %v5834_v22, %v4218_v48  ;;  %v4961_v9 = vor.u32 %v6023_v1, %v4960_v0  ;;  %v4673_v16 = vor.u32 %v5951_v10, %v4672_v8  ;;  %v5871_v33 = vld [vmem:[#allocation2 + $0x124] sm:$0xf0] }
 0x22e   :  { %v4474_v45 = vld [vmem:[#allocation2 + $0x220] sm:$0xf0]  ;;  %v4608_v34 = vld [vmem:[#allocation2 + $0x308] sm:$0xf] }
 0x22f   :  { %2519 = vmatpush.bf16.msra.mxu2 %v5085_v17  ;;  %2481 = vmatpush.bf16.msrb.mxu3 %v4285_v29  ;;  %v6026_v52 = vld [vmem:[#allocation2 + $0x604] sm:$0xf]  ;;  %v4477_v62 = vor.u32 %v5898_v51, %v4474_v45  ;;  %v5185_v17 = vor.u32 %v6079_v12, %v5184_v11  ;;  %v4385_v29 = vor.u32 %v5879_v19, %v4384_v18  ;;  %v5935_v36 = vld [vmem:[#allocation2 + $0x324] sm:$0xf0] }
 0x230   :  { %v4986_v28 = vld [vmem:[#allocation2 + $0x620] sm:$0xf0]  ;;  %v5120_v37 = vld [vmem:[#allocation2 + $0x708] sm:$0xf]  ;;  %v4609_v22 = vor.u32 %v5935_v36, %v4608_v34  ;;  %v6083_v34 = vld [vmem:[#allocation2 + $0x7cc] sm:$0xf] }
 0x231   :  { %2506 = vmatpush.bf16.msra.mxu1 %v4829_v21  ;;  %2494 = vmatpush.bf16.msra.mxu0 %v4541_v30  ;;  %v5962_v54 = vld [vmem:[#allocation2 + $0x404] sm:$0xf]  ;;  %v4989_v63 = vor.u32 %v6026_v52, %v4986_v28  ;;  %v4929_v21 = vor.u32 %v6015_v14, %v4928_v13  ;;  %v4641_v30 = vor.u32 %v5943_v23, %v4640_v20  ;;  %v6063_v38 = vld [vmem:[#allocation2 + $0x724] sm:$0xf0] }
 0x232   :  { %v4730_v55 = vld [vmem:[#allocation2 + $0x420] sm:$0xf0]  ;;  %v4864_v41 = vld [vmem:[#allocation2 + $0x508] sm:$0xf]  ;;  %v5121_v48 = vor.u32 %v6063_v38, %v5120_v37  ;;  %v6019_v38 = vld [vmem:[#allocation2 + $0x5cc] sm:$0xf] }
 0x233   :  { %2520 = vmatpush.bf16.msra.mxu2 %v5053_v31  ;;  %2482 = vmatpush.bf16.msrb.mxu3 %v4253_v46  ;;  %v4733_v2 = vor.u32 %v5962_v54, %v4730_v55  ;;  %v5153_v31 = vor.u32 %v6071_v25, %v5152_v24  ;;  %v5999_v42 = vld [vmem:[#allocation2 + $0x524] sm:$0xf0]  ;;  %v4353_v46 = vor.u32 %v5871_v33, %v4352_v32  ;;  %v4706_v33 = vld [vmem:[#allocation2 + $0x3e8] sm:$0xf0] }
 0x234   :  { %v4576_v51 = vld [vmem:[#allocation2 + $0x2c8] sm:$0xf]  ;;  %v4865_v45 = vor.u32 %v5999_v42, %v4864_v41  ;;  %v4962_v41 = vld [vmem:[#allocation2 + $0x5e8] sm:$0xf0] }
 0x235   :  { %2507 = vmatpush.bf16.msra.mxu1 %v4797_v35  ;;  %2495 = vmatpush.bf16.msra.mxu0 %v4509_v49  ;;  %v4897_v35 = vor.u32 %v6007_v27, %v4896_v26  ;;  %v4320_v49 = vld [vmem:[#allocation2 + $0xc8] sm:$0xf] }
 0x236   :  { %v5927_v52 = vld [vmem:[#allocation2 + $0x2e4] sm:$0xf0] }
 0x237   :  { %2521 = vmatpush.bf16.msra.mxu2 %v5021_v50  ;;  %2483 = vmatpush.bf16.msrb.mxu3 %v4221_v58  ;;  %v5863_v50 = vld [vmem:[#allocation2 + $0xe4] sm:$0xf0]  ;;  %v4577_v56 = vor.u32 %v5927_v52, %v4576_v51  ;;  %v5947_v51 = vld [vmem:[#allocation2 + $0x38c] sm:$0xf] }
 0x238   :  { %v6055_v28 = vld [vmem:[#allocation2 + $0x6e4] sm:$0xf0]  ;;  %v4321_v40 = vor.u32 %v5863_v50, %v4320_v49  ;;  %v5883_v49 = vld [vmem:[#allocation2 + $0x18c] sm:$0xf] }
 0x239   :  { %2508 = vmatpush.bf16.msra.mxu1 %v4765_v53  ;;  %2496 = vmatpush.bf16.msra.mxu0 %v4477_v62  ;;  %v5088_v53 = vld [vmem:[#allocation2 + $0x6c8] sm:$0xf]  ;;  %v4418_v50 = vld [vmem:[#allocation2 + $0x1a8] sm:$0xf0] }
 0x23a   :  { %2484 = vmatmul.bf16.vlgmr.msrb.gmra.mxu3 %v6610_v39  ;;  %v4832_v54 = vld [vmem:[#allocation2 + $0x4c8] sm:$0xf]  ;;  %v5089_v57 = vor.u32 %v6055_v28, %v5088_v53  ;;  %v4674_v52 = vld [vmem:[#allocation2 + $0x3a8] sm:$0xf0] }
 0x23b   :  { %2522 = vmatpush.bf16.msra.mxu2 %v4989_v63  ;;  %2528 = vmatpush.bf16.msra.mxu3 %v4449_v3  ;;  %v5991_v55 = vld [vmem:[#allocation2 + $0x4e4] sm:$0xf0]  ;;  %v6075_v53 = vld [vmem:[#allocation2 + $0x78c] sm:$0xf] }
 0x23c   :  { %2497 = vmatmul.bf16.vlgmr.msra.gmra.mxu0 %v6618_v44  ;;  %v4288_v58 = vld [vmem:[#allocation2 + $0x88] sm:$0xf]  ;;  %v4833_v61 = vor.u32 %v5991_v55, %v4832_v54  ;;  %v5186_v28 = vld [vmem:[#allocation2 + $0x7a8] sm:$0xf0] }
 0x23d   :  { %2509 = vmatpush.bf16.msra.mxu1 %v4733_v2  ;;  %2541 = vmatpush.bf16.msrb.mxu0 %v4705_v4  ;;  %v5855_v59 = vld [vmem:[#allocation2 + $0xa4] sm:$0xf0]  ;;  %v6011_v54 = vld [vmem:[#allocation2 + $0x58c] sm:$0xf] }
 0x23e   :  { %2523 = vmatmul.bf16.vlgmr.msra.gmra.mxu2 %v6614_v43  ;;  %v4544_v60 = vld [vmem:[#allocation2 + $0x288] sm:$0xf]  ;;  %v4289_v3 = vor.u32 %v5855_v59, %v4288_v58  ;;  %v4930_v55 = vld [vmem:[#allocation2 + $0x5a8] sm:$0xf0] }
 0x23f   :  { %2567 = vmatpush.bf16.msrb.mxu2 %v5217_v5  ;;  %2529 = vmatpush.bf16.msra.mxu3 %v4417_v15  ;;  %v5919_v62 = vld [vmem:[#allocation2 + $0x2a4] sm:$0xf0]  ;;  %v5875_v58 = vld [vmem:[#allocation2 + $0x14c] sm:$0xf] }
 0x240   :  { %2510 = vmatmul.bf16.vlgmr.msra.gmra.mxu1 %v6622_v47  ;;  %v5056_v63 = vld [vmem:[#allocation2 + $0x688] sm:$0xf]  ;;  %v4545_v4 = vor.u32 %v5919_v62, %v4544_v60  ;;  %v4386_v59 = vld [vmem:[#allocation2 + $0x168] sm:$0xf0] }
 0x241   :  { %2554 = vmatpush.bf16.msrb.mxu1 %v4961_v9  ;;  %2542 = vmatpush.bf16.msrb.mxu0 %v4673_v16  ;;  %v6047_v0 = vld [vmem:[#allocation2 + $0x6a4] sm:$0xf0]  ;;  %v5939_v60 = vld [vmem:[#allocation2 + $0x34c] sm:$0xf] }
 0x242   :  { %v4800_v1 = vld [vmem:[#allocation2 + $0x488] sm:$0xf]  ;;  %v5057_v5 = vor.u32 %v6047_v0, %v5056_v63  ;;  %v4642_v62 = vld [vmem:[#allocation2 + $0x368] sm:$0xf0] }
 0x243   :  { %2568 = vmatpush.bf16.msrb.mxu2 %v5185_v17  ;;  %2530 = vmatpush.bf16.msra.mxu3 %v4385_v29  ;;  %v5983_v2 = vld [vmem:[#allocation2 + $0x4a4] sm:$0xf0]  ;;  %v5891_v29 = vld [vmem:[#allocation2 + $0x1cc] sm:$0xf] }
 0x244   :  { %v4256_v6 = vld [vmem:[#allocation2 + $0x48] sm:$0xf]  ;;  %v4801_v9 = vor.u32 %v5983_v2, %v4800_v1  ;;  %v6067_v63 = vld [vmem:[#allocation2 + $0x74c] sm:$0xf] }
 0x245   :  { %2555 = vmatpush.bf16.msrb.mxu1 %v4929_v21  ;;  %2543 = vmatpush.bf16.msrb.mxu0 %v4641_v30  ;;  %v5847_v7 = vld [vmem:[#allocation2 + $0x64] sm:$0xf0]  ;;  %v4450_v30 = vld [vmem:[#allocation2 + $0x1e8] sm:$0xf0] }
 0x246   :  { %v4512_v8 = vld [vmem:[#allocation2 + $0x248] sm:$0xf]  ;;  %v4257_v15 = vor.u32 %v5847_v7, %v4256_v6  ;;  %v5154_v0 = vld [vmem:[#allocation2 + $0x768] sm:$0xf0] }
 0x247   :  { %2569 = vmatpush.bf16.msrb.mxu2 %v5153_v31  ;;  %2531 = vmatpush.bf16.msra.mxu3 %v4353_v46  ;;  %v5911_v10 = vld [vmem:[#allocation2 + $0x264] sm:$0xf0]  ;;  %v5955_v31 = vld [vmem:[#allocation2 + $0x3cc] sm:$0xf]  ;;  %v4453_v46 = vor.u32 %v5891_v29, %v4450_v30 }
 0x248   :  { %v5024_v11 = vld [vmem:[#allocation2 + $0x648] sm:$0xf]  ;;  %v4513_v18 = vor.u32 %v5911_v10, %v4512_v8  ;;  %v6003_v1 = vld [vmem:[#allocation2 + $0x54c] sm:$0xf] }
 0x249   :  { %2556 = vmatpush.bf16.msrb.mxu1 %v4897_v35  ;;  %2544 = vmatpush.bf16.msrb.mxu0 %v4609_v22  ;;  %v6039_v12 = vld [vmem:[#allocation2 + $0x664] sm:$0xf0]  ;;  %v5218_v35 = vld [vmem:[#allocation2 + $0x7e8] sm:$0xf0]  ;;  %v4709_v22 = vor.u32 %v5955_v31, %v4706_v33 }
 0x24a   :  { %v4768_v13 = vld [vmem:[#allocation2 + $0x448] sm:$0xf]  ;;  %v5025_v19 = vor.u32 %v6039_v12, %v5024_v11  ;;  %v4898_v2 = vld [vmem:[#allocation2 + $0x568] sm:$0xf0] }
 0x24b   :  { %2570 = vmatpush.bf16.msrb.mxu2 %v5121_v48  ;;  %2532 = vmatpush.bf16.msra.mxu3 %v4321_v40  ;;  %v5975_v14 = vld [vmem:[#allocation2 + $0x464] sm:$0xf0]  ;;  %v5221_v48 = vor.u32 %v6083_v34, %v5218_v35  ;;  %v4421_v40 = vor.u32 %v5883_v49, %v4418_v50  ;;  %v5867_v6 = vld [vmem:[#allocation2 + $0x10c] sm:$0xf] }
 0x24c   :  { %v4224_v16 = vld [vmem:[#allocation2 + $0x8] sm:$0xf]  ;;  %v4769_v24 = vor.u32 %v5975_v14, %v4768_v13  ;;  %v4354_v7 = vld [vmem:[#allocation2 + $0x128] sm:$0xf0] }
 0x24d   :  { %2557 = vmatpush.bf16.msrb.mxu1 %v4865_v45  ;;  %2545 = vmatpush.bf16.msrb.mxu0 %v4577_v56  ;;  %v5839_v17 = vld [vmem:[#allocation2 + $0x24] sm:$0xf0]  ;;  %v4965_v45 = vor.u32 %v6019_v38, %v4962_v41  ;;  %v4677_v56 = vor.u32 %v5947_v51, %v4674_v52  ;;  %v5931_v8 = vld [vmem:[#allocation2 + $0x30c] sm:$0xf] }
 0x24e   :  { %v4480_v20 = vld [vmem:[#allocation2 + $0x208] sm:$0xf]  ;;  %v4225_v32 = vor.u32 %v5839_v17, %v4224_v16  ;;  %v4610_v10 = vld [vmem:[#allocation2 + $0x328] sm:$0xf0] }
 0x24f   :  { %2571 = vmatpush.bf16.msrb.mxu2 %v5089_v57  ;;  %2533 = vmatpush.bf16.msra.mxu3 %v4289_v3  ;;  %v5903_v21 = vld [vmem:[#allocation2 + $0x224] sm:$0xf0]  ;;  %v5189_v57 = vor.u32 %v6075_v53, %v5186_v28  ;;  %v4389_v3 = vor.u32 %v5875_v58, %v4386_v59  ;;  %v6059_v11 = vld [vmem:[#allocation2 + $0x70c] sm:$0xf]  ;;  %v4613_v16 = vor.u32 %v5931_v8, %v4610_v10  ;;  %v5224_v8 = vld [vmem:[#allocation2 + $0x7d0] sm:$0xf] }
 0x250   :  { %v4992_v23 = vld [vmem:[#allocation2 + $0x608] sm:$0xf]  ;;  %v4481_v36 = vor.u32 %v5903_v21, %v4480_v20  ;;  %v5122_v12 = vld [vmem:[#allocation2 + $0x728] sm:$0xf0] }
 0x251   :  { %2558 = vmatpush.bf16.msrb.mxu1 %v4833_v61  ;;  %2546 = vmatpush.bf16.msrb.mxu0 %v4545_v4  ;;  %v6031_v25 = vld [vmem:[#allocation2 + $0x624] sm:$0xf0]  ;;  %v4933_v61 = vor.u32 %v6011_v54, %v4930_v55  ;;  %v4645_v4 = vor.u32 %v5939_v60, %v4642_v62  ;;  %v5995_v13 = vld [vmem:[#allocation2 + $0x50c] sm:$0xf]  ;;  %v5125_v17 = vor.u32 %v6059_v11, %v5122_v12  ;;  %v4968_v12 = vld [vmem:[#allocation2 + $0x5d0] sm:$0xf] }
 0x252   :  { %v4736_v26 = vld [vmem:[#allocation2 + $0x408] sm:$0xf]  ;;  %v4993_v37 = vor.u32 %v6031_v25, %v4992_v23  ;;  %v4866_v14 = vld [vmem:[#allocation2 + $0x528] sm:$0xf0] }
 0x253   :  { %2572 = vmatpush.bf16.msrb.mxu2 %v5057_v5  ;;  %v5967_v27 = vld [vmem:[#allocation2 + $0x424] sm:$0xf0]  ;;  %2534 = vmatpush.bf16.msra.mxu3 %v4257_v15  ;;  %v5157_v5 = vor.u32 %v6067_v63, %v5154_v0  ;;  %v4357_v15 = vor.u32 %v5867_v6, %v4354_v7  ;;  %v5923_v20 = vld [vmem:[#allocation2 + $0x2cc] sm:$0xf]  ;;  %v4869_v21 = vor.u32 %v5995_v13, %v4866_v14  ;;  %v5960_v7 = vld [vmem:[#allocation2 + $0x3ec] sm:$0xf0] }
 0x254   :  { %v4737_v42 = vor.u32 %v5967_v27, %v4736_v26  ;;  %v4578_v23 = vld [vmem:[#allocation2 + $0x2e8] sm:$0xf0]  ;;  %v6024_v13 = vld [vmem:[#allocation2 + $0x5ec] sm:$0xf0] }
 0x255   :  { %2559 = vmatpush.bf16.msrb.mxu1 %v4801_v9  ;;  %2547 = vmatpush.bf16.msrb.mxu0 %v4513_v18  ;;  %v4901_v9 = vor.u32 %v6003_v1, %v4898_v2  ;;  %v5859_v18 = vld [vmem:[#allocation2 + $0xcc] sm:$0xf]  ;;  %v4581_v30 = vor.u32 %v5923_v20, %v4578_v23  ;;  %v4680_v20 = vld [vmem:[#allocation2 + $0x390] sm:$0xf] }
 0x256   :  { %v5090_v25 = vld [vmem:[#allocation2 + $0x6e8] sm:$0xf0]  ;;  %v5952_v23 = vld [vmem:[#allocation2 + $0x3ac] sm:$0xf0] }
 0x257   :  { %2573 = vmatpush.bf16.msrb.mxu2 %v5025_v19  ;;  %2535 = vmatpush.bf16.msra.mxu3 %v4225_v32  ;;  %v4322_v19 = vld [vmem:[#allocation2 + $0xe8] sm:$0xf0] }
 0x258   :  { %v5987_v26 = vld [vmem:[#allocation2 + $0x4cc] sm:$0xf]  ;;  %v4325_v29 = vor.u32 %v5859_v18, %v4322_v19  ;;  %v4424_v18 = vld [vmem:[#allocation2 + $0x190] sm:$0xf] }
 0x259   :  { %2560 = vmatpush.bf16.msrb.mxu1 %v4769_v24  ;;  %2548 = vmatpush.bf16.msrb.mxu0 %v4481_v36  ;;  %v6051_v24 = vld [vmem:[#allocation2 + $0x6cc] sm:$0xf]  ;;  %v5888_v19 = vld [vmem:[#allocation2 + $0x1ac] sm:$0xf0] }
 0x25a   :  { %2536 = vmatmul.bf16.vlgmr.msra.gmra.mxu3 %v6610_v39  ;;  %v4834_v27 = vld [vmem:[#allocation2 + $0x4e8] sm:$0xf0]  ;;  %v5093_v31 = vor.u32 %v6051_v24, %v5090_v25  ;;  %v5192_v24 = vld [vmem:[#allocation2 + $0x790] sm:$0xf] }
 0x25b   :  { %2574 = vmatpush.bf16.msrb.mxu2 %v4993_v37  ;;  %2580 = vmatpush.bf16.msrb.mxu3 %v4453_v46  ;;  %v5851_v32 = vld [vmem:[#allocation2 + $0x8c] sm:$0xf]  ;;  %v4837_v35 = vor.u32 %v5987_v26, %v4834_v27  ;;  %v6080_v25 = vld [vmem:[#allocation2 + $0x7ac] sm:$0xf0] }
 0x25c   :  { %2549 = vmatmul.bf16.vlgmr.msrb.gmra.mxu0 %v6618_v44  ;;  %v4290_v33 = vld [vmem:[#allocation2 + $0xa8] sm:$0xf0]  ;;  %v4936_v26 = vld [vmem:[#allocation2 + $0x590] sm:$0xf] }
 0x25d   :  { %2561 = vmatpush.bf16.msrb.mxu1 %v4737_v42  ;;  %2593 = vmatpush.bf16.msra.mxu0 %v4709_v22  ;;  %v5915_v34 = vld [vmem:[#allocation2 + $0x28c] sm:$0xf]  ;;  %v4293_v46 = vor.u32 %v5851_v32, %v4290_v33  ;;  %v6016_v27 = vld [vmem:[#allocation2 + $0x5ac] sm:$0xf0] }
 0x25e   :  { %2575 = vmatmul.bf16.vlgmr.msrb.gmra.mxu2 %v6614_v43  ;;  %v4546_v36 = vld [vmem:[#allocation2 + $0x2a8] sm:$0xf0]  ;;  %v4392_v32 = vld [vmem:[#allocation2 + $0x150] sm:$0xf] }
 0x25f   :  { %2619 = vmatpush.bf16.msra.mxu2 %v5221_v48  ;;  %2581 = vmatpush.bf16.msrb.mxu3 %v4421_v40  ;;  %v6043_v37 = vld [vmem:[#allocation2 + $0x68c] sm:$0xf]  ;;  %v4549_v22 = vor.u32 %v5915_v34, %v4546_v36  ;;  %v5880_v33 = vld [vmem:[#allocation2 + $0x16c] sm:$0xf0] }
 0x260   :  { %2562 = vmatmul.bf16.vlgmr.msrb.gmra.mxu1 %v6622_v47  ;;  %v5058_v38 = vld [vmem:[#allocation2 + $0x6a8] sm:$0xf0]  ;;  %v4648_v34 = vld [vmem:[#allocation2 + $0x350] sm:$0xf] }
 0x261   :  { %2606 = vmatpush.bf16.msra.mxu1 %v4965_v45  ;;  %2594 = vmatpush.bf16.msra.mxu0 %v4677_v56  ;;  %v5979_v41 = vld [vmem:[#allocation2 + $0x48c] sm:$0xf]  ;;  %v5061_v48 = vor.u32 %v6043_v37, %v5058_v38  ;;  %v5944_v36 = vld [vmem:[#allocation2 + $0x36c] sm:$0xf0] }
 0x262   :  { %v4802_v42 = vld [vmem:[#allocation2 + $0x4a8] sm:$0xf0]  ;;  %v5160_v37 = vld [vmem:[#allocation2 + $0x750] sm:$0xf] }
 0x263   :  { %2620 = vmatpush.bf16.msra.mxu2 %v5189_v57  ;;  %2582 = vmatpush.bf16.msrb.mxu3 %v4389_v3  ;;  %v5843_v49 = vld [vmem:[#allocation2 + $0x4c] sm:$0xf]  ;;  %v4805_v45 = vor.u32 %v5979_v41, %v4802_v42  ;;  %v4456_v3 = vld [vmem:[#allocation2 + $0x1d0] sm:$0xf] }
 0x264   :  { %v4258_v50 = vld [vmem:[#allocation2 + $0x68] sm:$0xf0]  ;;  %v6072_v38 = vld [vmem:[#allocation2 + $0x76c] sm:$0xf0] }
 0x265   :  { %2607 = vmatpush.bf16.msra.mxu1 %v4933_v61  ;;  %2595 = vmatpush.bf16.msra.mxu0 %v4645_v4  ;;  %v5907_v51 = vld [vmem:[#allocation2 + $0x24c] sm:$0xf]  ;;  %v4261_v40 = vor.u32 %v5843_v49, %v4258_v50  ;;  %v5896_v4 = vld [vmem:[#allocation2 + $0x1ec] sm:$0xf0] }
 0x266   :  { %v4514_v52 = vld [vmem:[#allocation2 + $0x268] sm:$0xf0]  ;;  %v4904_v41 = vld [vmem:[#allocation2 + $0x550] sm:$0xf] }
 0x267   :  { %2621 = vmatpush.bf16.msra.mxu2 %v5157_v5  ;;  %2583 = vmatpush.bf16.msrb.mxu3 %v4357_v15  ;;  %v6035_v53 = vld [vmem:[#allocation2 + $0x64c] sm:$0xf]  ;;  %v4517_v58 = vor.u32 %v5907_v51, %v4514_v52  ;;  %v4712_v5 = vld [vmem:[#allocation2 + $0x3d0] sm:$0xf]  ;;  %v4457_v15 = vor.u32 %v5896_v4, %v4456_v3 }
 0x268   :  { %v5026_v28 = vld [vmem:[#allocation2 + $0x668] sm:$0xf0]  ;;  %v6008_v42 = vld [vmem:[#allocation2 + $0x56c] sm:$0xf0] }
 0x269   :  { %2608 = vmatpush.bf16.msra.mxu1 %v4901_v9  ;;  %2596 = vmatpush.bf16.msra.mxu0 %v4613_v16  ;;  %v5971_v54 = vld [vmem:[#allocation2 + $0x44c] sm:$0xf]  ;;  %v5029_v59 = vor.u32 %v6035_v53, %v5026_v28  ;;  %v6088_v9 = vld [vmem:[#allocation2 + $0x7ec] sm:$0xf0]  ;;  %v4713_v16 = vor.u32 %v5960_v7, %v4712_v5 }
 0x26a   :  { %v4770_v55 = vld [vmem:[#allocation2 + $0x468] sm:$0xf0]  ;;  %v4360_v49 = vld [vmem:[#allocation2 + $0x110] sm:$0xf] }
 0x26b   :  { %2622 = vmatpush.bf16.msra.mxu2 %v5125_v17  ;;  %2584 = vmatpush.bf16.msrb.mxu3 %v4325_v29  ;;  %v5835_v56 = vld [vmem:[#allocation2 + $0xc] sm:$0xf]  ;;  %v4773_v63 = vor.u32 %v5971_v54, %v4770_v55  ;;  %v5225_v17 = vor.u32 %v6088_v9, %v5224_v8  ;;  %v4425_v29 = vor.u32 %v5888_v19, %v4424_v18  ;;  %v5872_v50 = vld [vmem:[#allocation2 + $0x12c] sm:$0xf0] }
 0x26c   :  { %v4226_v57 = vld [vmem:[#allocation2 + $0x28] sm:$0xf0]  ;;  %v4616_v51 = vld [vmem:[#allocation2 + $0x310] sm:$0xf] }
 0x26d   :  { %2609 = vmatpush.bf16.msra.mxu1 %v4869_v21  ;;  %2597 = vmatpush.bf16.msra.mxu0 %v4581_v30  ;;  %v5899_v60 = vld [vmem:[#allocation2 + $0x20c] sm:$0xf]  ;;  %v4229_v6 = vor.u32 %v5835_v56, %v4226_v57  ;;  %v4969_v21 = vor.u32 %v6024_v13, %v4968_v12  ;;  %v4681_v30 = vor.u32 %v5952_v23, %v4680_v20  ;;  %v5936_v52 = vld [vmem:[#allocation2 + $0x32c] sm:$0xf0] }
 0x26e   :  { %v4482_v61 = vld [vmem:[#allocation2 + $0x228] sm:$0xf0]  ;;  %v5128_v53 = vld [vmem:[#allocation2 + $0x710] sm:$0xf]  ;;  %v4617_v56 = vor.u32 %v5936_v52, %v4616_v51  ;;  %v6084_v51 = vld [vmem:[#allocation2 + $0x7d4] sm:$0xf] }
 0x26f   :  { %2623 = vmatpush.bf16.msra.mxu2 %v5093_v31  ;;  %2585 = vmatpush.bf16.msrb.mxu3 %v4293_v46  ;;  %v6027_v62 = vld [vmem:[#allocation2 + $0x60c] sm:$0xf]  ;;  %v4485_v10 = vor.u32 %v5899_v60, %v4482_v61  ;;  %v5193_v31 = vor.u32 %v6080_v25, %v5192_v24  ;;  %v4393_v46 = vor.u32 %v5880_v33, %v4392_v32  ;;  %v6064_v28 = vld [vmem:[#allocation2 + $0x72c] sm:$0xf0] }
 0x270   :  { %v4994_v0 = vld [vmem:[#allocation2 + $0x628] sm:$0xf0]  ;;  %v4872_v54 = vld [vmem:[#allocation2 + $0x510] sm:$0xf]  ;;  %v5129_v57 = vor.u32 %v6064_v28, %v5128_v53  ;;  %v6020_v28 = vld [vmem:[#allocation2 + $0x5d4] sm:$0xf] }
 0x271   :  { %2610 = vmatpush.bf16.msra.mxu1 %v4837_v35  ;;  %2598 = vmatpush.bf16.msra.mxu0 %v4549_v22  ;;  %v5963_v1 = vld [vmem:[#allocation2 + $0x40c] sm:$0xf]  ;;  %v4997_v11 = vor.u32 %v6027_v62, %v4994_v0  ;;  %v4937_v35 = vor.u32 %v6016_v27, %v4936_v26  ;;  %v4649_v22 = vor.u32 %v5944_v36, %v4648_v34  ;;  %v6000_v55 = vld [vmem:[#allocation2 + $0x52c] sm:$0xf0] }
 0x272   :  { %v4738_v2 = vld [vmem:[#allocation2 + $0x428] sm:$0xf0]  ;;  %v4584_v60 = vld [vmem:[#allocation2 + $0x2d0] sm:$0xf]  ;;  %v4873_v61 = vor.u32 %v6000_v55, %v4872_v54  ;;  %v4970_v54 = vld [vmem:[#allocation2 + $0x5f0] sm:$0xf0] }
 0x273   :  { %2624 = vmatpush.bf16.msra.mxu2 %v5061_v48  ;;  %2586 = vmatpush.bf16.msrb.mxu3 %v4261_v40  ;;  %v4741_v14 = vor.u32 %v5963_v1, %v4738_v2  ;;  %v5161_v48 = vor.u32 %v6072_v38, %v5160_v37  ;;  %v4361_v40 = vor.u32 %v5872_v50, %v4360_v49  ;;  %v5928_v62 = vld [vmem:[#allocation2 + $0x2ec] sm:$0xf0]  ;;  %v4714_v50 = vld [vmem:[#allocation2 + $0x3f0] sm:$0xf0] }
 0x274   :  { %v6056_v0 = vld [vmem:[#allocation2 + $0x6ec] sm:$0xf0]  ;;  %v4585_v4 = vor.u32 %v5928_v62, %v4584_v60  ;;  %v5948_v60 = vld [vmem:[#allocation2 + $0x394] sm:$0xf] }
 0x275   :  { %2611 = vmatpush.bf16.msra.mxu1 %v4805_v45  ;;  %2599 = vmatpush.bf16.msra.mxu0 %v4517_v58  ;;  %v4905_v45 = vor.u32 %v6008_v42, %v4904_v41  ;;  %v4328_v58 = vld [vmem:[#allocation2 + $0xd0] sm:$0xf]  ;;  %v4682_v62 = vld [vmem:[#allocation2 + $0x3b0] sm:$0xf0] }
 0x276   :  { %v4840_v1 = vld [vmem:[#allocation2 + $0x4d0] sm:$0xf] }
 0x277   :  { %2625 = vmatpush.bf16.msra.mxu2 %v5029_v59  ;;  %2587 = vmatpush.bf16.msrb.mxu3 %v4229_v6  ;;  %v5864_v59 = vld [vmem:[#allocation2 + $0xec] sm:$0xf0] }
 0x278   :  { %v5992_v2 = vld [vmem:[#allocation2 + $0x4ec] sm:$0xf0]  ;;  %v4329_v3 = vor.u32 %v5864_v59, %v4328_v58  ;;  %v5884_v58 = vld [vmem:[#allocation2 + $0x194] sm:$0xf] }
 0x279   :  { %2612 = vmatpush.bf16.msra.mxu1 %v4773_v63  ;;  %2600 = vmatpush.bf16.msra.mxu0 %v4485_v10  ;;  %v5096_v63 = vld [vmem:[#allocation2 + $0x6d0] sm:$0xf]  ;;  %v4841_v9 = vor.u32 %v5992_v2, %v4840_v1  ;;  %v4426_v59 = vld [vmem:[#allocation2 + $0x1b0] sm:$0xf0] }
 0x27a   :  { %2588 = vmatmul.bf16.vlgmr.msrb.gmra.mxu3 %v6610_v39  ;;  %v5097_v5 = vor.u32 %v6056_v0, %v5096_v63  ;;  %v4296_v6 = vld [vmem:[#allocation2 + $0x90] sm:$0xf]  ;;  %v6076_v63 = vld [vmem:[#allocation2 + $0x794] sm:$0xf] }
 0x27b   :  { %2626 = vmatpush.bf16.msra.mxu2 %v4997_v11  ;;  %2632 = vmatpush.bf16.msra.mxu3 %v4457_v15  ;;  %v5856_v7 = vld [vmem:[#allocation2 + $0xac] sm:$0xf0]  ;;  %v5194_v0 = vld [vmem:[#allocation2 + $0x7b0] sm:$0xf0] }
 0x27c   :  { %2601 = vmatmul.bf16.vlgmr.msra.gmra.mxu0 %v6618_v44  ;;  %v4552_v8 = vld [vmem:[#allocation2 + $0x290] sm:$0xf]  ;;  %v4297_v15 = vor.u32 %v5856_v7, %v4296_v6  ;;  %v6012_v1 = vld [vmem:[#allocation2 + $0x594] sm:$0xf] }
 0x27d   :  { %2613 = vmatpush.bf16.msra.mxu1 %v4741_v14  ;;  %2645 = vmatpush.bf16.msrb.mxu0 %v4713_v16  ;;  %v5920_v10 = vld [vmem:[#allocation2 + $0x2ac] sm:$0xf0]  ;;  %v4938_v2 = vld [vmem:[#allocation2 + $0x5b0] sm:$0xf0] }
 0x27e   :  { %2627 = vmatmul.bf16.vlgmr.msra.gmra.mxu2 %v6614_v43  ;;  %v5064_v11 = vld [vmem:[#allocation2 + $0x690] sm:$0xf]  ;;  %v4553_v16 = vor.u32 %v5920_v10, %v4552_v8  ;;  %v5876_v6 = vld [vmem:[#allocation2 + $0x154] sm:$0xf] }
 0x27f   :  { %2671 = vmatpush.bf16.msrb.mxu2 %v5225_v17  ;;  %2633 = vmatpush.bf16.msra.mxu3 %v4425_v29  ;;  %v6048_v12 = vld [vmem:[#allocation2 + $0x6ac] sm:$0xf0]  ;;  %v4394_v7 = vld [vmem:[#allocation2 + $0x170] sm:$0xf0] }
 0x280   :  { %2614 = vmatmul.bf16.vlgmr.msra.gmra.mxu1 %v6622_v47  ;;  %v4808_v13 = vld [vmem:[#allocation2 + $0x490] sm:$0xf]  ;;  %v5065_v17 = vor.u32 %v6048_v12, %v5064_v11  ;;  %v5940_v8 = vld [vmem:[#allocation2 + $0x354] sm:$0xf] }
 0x281   :  { %2658 = vmatpush.bf16.msrb.mxu1 %v4969_v21  ;;  %2646 = vmatpush.bf16.msrb.mxu0 %v4681_v30  ;;  %v5984_v14 = vld [vmem:[#allocation2 + $0x4ac] sm:$0xf0]  ;;  %v4650_v10 = vld [vmem:[#allocation2 + $0x370] sm:$0xf0] }
 0x282   :  { %v4264_v18 = vld [vmem:[#allocation2 + $0x50] sm:$0xf]  ;;  %v4809_v21 = vor.u32 %v5984_v14, %v4808_v13  ;;  %v6068_v11 = vld [vmem:[#allocation2 + $0x754] sm:$0xf] }
 0x283   :  { %2672 = vmatpush.bf16.msrb.mxu2 %v5193_v31  ;;  %2634 = vmatpush.bf16.msra.mxu3 %v4393_v46  ;;  %v5848_v19 = vld [vmem:[#allocation2 + $0x6c] sm:$0xf0]  ;;  %v5892_v46 = vld [vmem:[#allocation2 + $0x1d4] sm:$0xf] }
 0x284   :  { %v4520_v20 = vld [vmem:[#allocation2 + $0x250] sm:$0xf]  ;;  %v4265_v29 = vor.u32 %v5848_v19, %v4264_v18  ;;  %v5162_v12 = vld [vmem:[#allocation2 + $0x770] sm:$0xf0] }
 0x285   :  { %2659 = vmatpush.bf16.msrb.mxu1 %v4937_v35  ;;  %2647 = vmatpush.bf16.msrb.mxu0 %v4649_v22  ;;  %v5912_v23 = vld [vmem:[#allocation2 + $0x26c] sm:$0xf0]  ;;  %v4458_v22 = vld [vmem:[#allocation2 + $0x1f0] sm:$0xf0] }
 0x286   :  { %v5032_v24 = vld [vmem:[#allocation2 + $0x650] sm:$0xf]  ;;  %v4521_v32 = vor.u32 %v5912_v23, %v4520_v20  ;;  %v6004_v13 = vld [vmem:[#allocation2 + $0x554] sm:$0xf] }
 0x287   :  { %2673 = vmatpush.bf16.msrb.mxu2 %v5161_v48  ;;  %2635 = vmatpush.bf16.msra.mxu3 %v4361_v40  ;;  %v6040_v25 = vld [vmem:[#allocation2 + $0x66c] sm:$0xf0]  ;;  %v5956_v48 = vld [vmem:[#allocation2 + $0x3d4] sm:$0xf]  ;;  %v4461_v40 = vor.u32 %v5892_v46, %v4458_v22 }
 0x288   :  { %v4776_v26 = vld [vmem:[#allocation2 + $0x450] sm:$0xf]  ;;  %v5033_v33 = vor.u32 %v6040_v25, %v5032_v24  ;;  %v4906_v14 = vld [vmem:[#allocation2 + $0x570] sm:$0xf0] }
 0x289   :  { %2660 = vmatpush.bf16.msrb.mxu1 %v4905_v45  ;;  %2648 = vmatpush.bf16.msrb.mxu0 %v4617_v56  ;;  %v5976_v27 = vld [vmem:[#allocation2 + $0x46c] sm:$0xf0]  ;;  %v5226_v45 = vld [vmem:[#allocation2 + $0x7f0] sm:$0xf0]  ;;  %v4717_v56 = vor.u32 %v5956_v48, %v4714_v50 }
 0x28a   :  { %v4232_v30 = vld [vmem:[#allocation2 + $0x10] sm:$0xf]  ;;  %v4777_v37 = vor.u32 %v5976_v27, %v4776_v26  ;;  %v5868_v18 = vld [vmem:[#allocation2 + $0x114] sm:$0xf] }
 0x28b   :  { %2674 = vmatpush.bf16.msrb.mxu2 %v5129_v57  ;;  %2636 = vmatpush.bf16.msra.mxu3 %v4329_v3  ;;  %v5840_v31 = vld [vmem:[#allocation2 + $0x2c] sm:$0xf0]  ;;  %v5229_v57 = vor.u32 %v6084_v51, %v5226_v45  ;;  %v4429_v3 = vor.u32 %v5884_v58, %v4426_v59  ;;  %v4362_v19 = vld [vmem:[#allocation2 + $0x130] sm:$0xf0] }
 0x28c   :  { %v4488_v34 = vld [vmem:[#allocation2 + $0x210] sm:$0xf]  ;;  %v4233_v49 = vor.u32 %v5840_v31, %v4232_v30  ;;  %v5932_v20 = vld [vmem:[#allocation2 + $0x314] sm:$0xf]  ;;  %v4365_v30 = vor.u32 %v5868_v18, %v4362_v19 }
 0x28d   :  { %2661 = vmatpush.bf16.msrb.mxu1 %v4873_v61  ;;  %2649 = vmatpush.bf16.msrb.mxu0 %v4585_v4  ;;  %v5904_v35 = vld [vmem:[#allocation2 + $0x22c] sm:$0xf0]  ;;  %v4973_v61 = vor.u32 %v6020_v28, %v4970_v54  ;;  %v4685_v4 = vor.u32 %v5948_v60, %v4682_v62  ;;  %v4618_v23 = vld [vmem:[#allocation2 + $0x330] sm:$0xf0] }
 0x28e   :  { %v5000_v36 = vld [vmem:[#allocation2 + $0x610] sm:$0xf]  ;;  %v4489_v52 = vor.u32 %v5904_v35, %v4488_v34  ;;  %v6060_v24 = vld [vmem:[#allocation2 + $0x714] sm:$0xf] }
 0x28f   :  { %2675 = vmatpush.bf16.msrb.mxu2 %v5097_v5  ;;  %2637 = vmatpush.bf16.msra.mxu3 %v4297_v15  ;;  %v6032_v38 = vld [vmem:[#allocation2 + $0x62c] sm:$0xf0]  ;;  %v5197_v5 = vor.u32 %v6076_v63, %v5194_v0  ;;  %v4397_v15 = vor.u32 %v5876_v6, %v4394_v7  ;;  %v5130_v25 = vld [vmem:[#allocation2 + $0x730] sm:$0xf0] }
 0x290   :  { %v4744_v41 = vld [vmem:[#allocation2 + $0x410] sm:$0xf]  ;;  %v5001_v53 = vor.u32 %v6032_v38, %v5000_v36  ;;  %v5996_v26 = vld [vmem:[#allocation2 + $0x514] sm:$0xf]  ;;  %v5133_v34 = vor.u32 %v6060_v24, %v5130_v25 }
 0x291   :  { %2662 = vmatpush.bf16.msrb.mxu1 %v4841_v9  ;;  %2650 = vmatpush.bf16.msrb.mxu0 %v4553_v16  ;;  %v5968_v42 = vld [vmem:[#allocation2 + $0x42c] sm:$0xf0]  ;;  %v4941_v9 = vor.u32 %v6012_v1, %v4938_v2  ;;  %v4653_v16 = vor.u32 %v5940_v8, %v4650_v10  ;;  %v4874_v27 = vld [vmem:[#allocation2 + $0x530] sm:$0xf0] }
 0x292   :  { %v4745_v55 = vor.u32 %v5968_v42, %v4744_v41  ;;  %v5860_v31 = vld [vmem:[#allocation2 + $0xd4] sm:$0xf]  ;;  %v4877_v41 = vor.u32 %v5996_v26, %v4874_v27 }
 0x293   :  { %2676 = vmatpush.bf16.msrb.mxu2 %v5065_v17  ;;  %2638 = vmatpush.bf16.msra.mxu3 %v4265_v29  ;;  %v5165_v17 = vor.u32 %v6068_v11, %v5162_v12  ;;  %v6644_v29 = vld [vmem:[#allocation16] sm:$0xff]  ;;  %v4330_v35 = vld [vmem:[#allocation2 + $0xf0] sm:$0xf0] }
 0x294   :  { %v5924_v36 = vld [vmem:[#allocation2 + $0x2d4] sm:$0xf]  ;;  %v1128_v22 = vperm.slane %v6644_v29, 0  ;;  %v4333_v50 = vor.u32 %v5860_v31, %v4330_v35  ;;  %v4720_v35 = vld [vmem:[#allocation2 + $0x3d8] sm:$0xf] }
 0x295   :  { %2663 = vmatpush.bf16.msrb.mxu1 %v4809_v21  ;;  %2651 = vmatpush.bf16.msrb.mxu0 %v4521_v32  ;;  %v4909_v21 = vor.u32 %v6004_v13, %v4906_v14  ;;  %v6052_v42 = vld [vmem:[#allocation2 + $0x6d4] sm:$0xf] }
 0x296   :  { %v5098_v46 = vld [vmem:[#allocation2 + $0x6f0] sm:$0xf0] }
 0x297   :  { %2677 = vmatpush.bf16.msrb.mxu2 %v5033_v33  ;;  %2639 = vmatpush.bf16.msra.mxu3 %v4233_v49  ;;  %v4621_v33 = vor.u32 %v5932_v20, %v4618_v23  ;;  %v5988_v48 = vld [vmem:[#allocation2 + $0x4d4] sm:$0xf]  ;;  %v5101_v45 = vor.u32 %v6052_v42, %v5098_v46 }
 0x298   :  { %v4842_v49 = vld [vmem:[#allocation2 + $0x4f0] sm:$0xf0] }
 0x299   :  { %2664 = vmatpush.bf16.msrb.mxu1 %v4777_v37  ;;  %2652 = vmatpush.bf16.msrb.mxu0 %v4489_v52  ;;  %v2446_v32 = vpop.f32.mrf.mxu0  ;;  %v4586_v37 = vld [vmem:[#allocation2 + $0x2f0] sm:$0xf0] }
 0x29a   :  { %2640 = vmatmul.bf16.vlgmr.msra.gmra.mxu3 %v6610_v39  ;;  %v4589_v51 = vor.u32 %v5924_v36, %v4586_v37  ;;  %v5852_v52 = vld [vmem:[#allocation2 + $0x94] sm:$0xf]  ;;  %v5961_v37 = vld [vmem:[#allocation2 + $0x3f4] sm:$0xf0] }
 0x29b   :  { %2678 = vmatpush.bf16.msrb.mxu2 %v5001_v53  ;;  %2684 = vmatpush.bf16.msrb.mxu3 %v4461_v40  ;;  %v4298_v53 = vld [vmem:[#allocation2 + $0xb0] sm:$0xf0] }
 0x29c   :  { %2653 = vmatmul.bf16.vlgmr.msrb.gmra.mxu0 %v6618_v44  ;;  %v5916_v28 = vld [vmem:[#allocation2 + $0x294] sm:$0xf]  ;;  %v4301_v62 = vor.u32 %v5852_v52, %v4298_v53  ;;  %v4432_v53 = vld [vmem:[#allocation2 + $0x198] sm:$0xf] }
 0x29d   :  { %2665 = vmatpush.bf16.msrb.mxu1 %v4745_v55  ;;  %2697 = vmatpush.bf16.msra.mxu0 %v4717_v56  ;;  %v2459_v38 = vpop.f32.mrf.mxu1  ;;  %v2433_v54 = vpop.f32.mrf.mxu3  ;;  %v4845_v55 = vor.u32 %v5988_v48, %v4842_v49  ;;  %v4554_v40 = vld [vmem:[#allocation2 + $0x2b0] sm:$0xf0]  ;;  %v4976_v48 = vld [vmem:[#allocation2 + $0x5d8] sm:$0xf] }
 0x29e   :  { %2679 = vmatmul.bf16.vlgmr.msrb.gmra.mxu2 %v6614_v43  ;;  %v6044_v56 = vld [vmem:[#allocation2 + $0x694] sm:$0xf]  ;;  %v2434_v58 = vadd.f32 %v2433_v54, %v1128_v22  ;;  %v4557_v1 = vor.u32 %v5916_v28, %v4554_v40  ;;  %v6025_v49 = vld [vmem:[#allocation2 + $0x5f4] sm:$0xf0] }
 0x29f   :  { %2723 = vmatpush.bf16.msra.mxu2 %v5229_v57  ;;  %2685 = vmatpush.bf16.msrb.mxu3 %v4429_v3  ;;  %v5066_v57 = vld [vmem:[#allocation2 + $0x6b0] sm:$0xf0]  ;;  %v5889_v28 = vld [vmem:[#allocation2 + $0x1b4] sm:$0xf0] }
 0x2a0   :  { %2666 = vmatmul.bf16.vlgmr.msrb.gmra.mxu1 %v6622_v47  ;;  %v5980_v60 = vld [vmem:[#allocation2 + $0x494] sm:$0xf]  ;;  %v2447_v63 = vadd.f32 %v2446_v32, %v2434_v58  ;;  %v5069_v2 = vor.u32 %v6044_v56, %v5066_v57  ;;  %v4688_v54 = vld [vmem:[#allocation2 + $0x398] sm:$0xf] }
 0x2a1   :  { %2710 = vmatpush.bf16.msra.mxu1 %v4973_v61  ;;  %2698 = vmatpush.bf16.msra.mxu0 %v4685_v4  ;;  %v2472_v59 = vpop.f32.mrf.mxu2  ;;  %v4810_v61 = vld [vmem:[#allocation2 + $0x4b0] sm:$0xf0]  ;;  %v2448_v0 = vpop.f32.mrf.mxu0  ;;  %v5953_v40 = vld [vmem:[#allocation2 + $0x3b4] sm:$0xf0] }
 0x2a2   :  { %v5844_v3 = vld [vmem:[#allocation2 + $0x54] sm:$0xf]  ;;  %v4813_v7 = vor.u32 %v5980_v60, %v4810_v61  ;;  %v2460_v11 = vadd.f32 %v2459_v38, %v2447_v63  ;;  %v5232_v38 = vld [vmem:[#allocation2 + $0x7d8] sm:$0xf]  ;;  %v4433_v60 = vor.u32 %v5889_v28, %v4432_v53  ;;  %v4689_v61 = vor.u32 %v5953_v40, %v4688_v54 }
 0x2a3   :  { %2724 = vmatpush.bf16.msra.mxu2 %v5197_v5  ;;  %2686 = vmatpush.bf16.msrb.mxu3 %v4397_v15  ;;  %v4266_v4 = vld [vmem:[#allocation2 + $0x70] sm:$0xf0]  ;;  %v5200_v56 = vld [vmem:[#allocation2 + $0x798] sm:$0xf] }
 0x2a4   :  { %v5908_v5 = vld [vmem:[#allocation2 + $0x254] sm:$0xf]  ;;  %v4269_v14 = vor.u32 %v5844_v3, %v4266_v4  ;;  %v2473_v18 = vadd.f32 %v2472_v59, %v2460_v11  ;;  %v6081_v57 = vld [vmem:[#allocation2 + $0x7b4] sm:$0xf0] }
 0x2a5   :  { %2711 = vmatpush.bf16.msra.mxu1 %v4941_v9  ;;  %2699 = vmatpush.bf16.msra.mxu0 %v4653_v16  ;;  %v2461_v6 = vpop.f32.mrf.mxu1  ;;  %v4522_v8 = vld [vmem:[#allocation2 + $0x270] sm:$0xf0]  ;;  %v2435_v25 = vpop.f32.mrf.mxu3  ;;  %v4944_v58 = vld [vmem:[#allocation2 + $0x598] sm:$0xf] }
 0x2a6   :  { %v6036_v9 = vld [vmem:[#allocation2 + $0x654] sm:$0xf]  ;;  %v4525_v19 = vor.u32 %v5908_v5, %v4522_v8  ;;  %v2840_v31 = vmul.f32 0.2, %v2473_v18  ;;  %v6017_v59 = vld [vmem:[#allocation2 + $0x5b4] sm:$0xf0] }
 0x2a7   :  { %2725 = vmatpush.bf16.msra.mxu2 %v5165_v17  ;;  %2687 = vmatpush.bf16.msrb.mxu3 %v4365_v30  ;;  %v5034_v10 = vld [vmem:[#allocation2 + $0x670] sm:$0xf0]  ;;  %v4400_v63 = vld [vmem:[#allocation2 + $0x158] sm:$0xf] }
 0x2a8   :  { %v5972_v12 = vld [vmem:[#allocation2 + $0x454] sm:$0xf]  ;;  %v5037_v20 = vor.u32 %v6036_v9, %v5034_v10  ;;  %v6647_v42 = vmax.f32 %v2473_v18, %v2840_v31  ;;  %v5881_v0 = vld [vmem:[#allocation2 + $0x174] sm:$0xf0] }
 0x2a9   :  { %2712 = vmatpush.bf16.msra.mxu1 %v4909_v21  ;;  %2700 = vmatpush.bf16.msra.mxu0 %v4621_v33  ;;  %v4778_v13 = vld [vmem:[#allocation2 + $0x470] sm:$0xf0]  ;;  %v2474_v32 = vpop.f32.mrf.mxu2  ;;  %v4464_v33 = vld [vmem:[#allocation2 + $0x1d8] sm:$0xf]  ;;  %v4401_v8 = vor.u32 %v5881_v0, %v4400_v63 }
 0x2aa   :  { %v5836_v15 = vld [vmem:[#allocation2 + $0x14] sm:$0xf]  ;;  %v4781_v26 = vor.u32 %v5972_v12, %v4778_v13  ;;  %v5945_v3 = vld [vmem:[#allocation2 + $0x374] sm:$0xf0] }
 0x2ab   :  { %2726 = vmatpush.bf16.msra.mxu2 %v5133_v34  ;;  %2688 = vmatpush.bf16.msrb.mxu3 %v4333_v50  ;;  %v4234_v16 = vld [vmem:[#allocation2 + $0x30] sm:$0xf0]  ;;  %v5897_v34 = vld [vmem:[#allocation2 + $0x1f4] sm:$0xf0] }
 0x2ac   :  { %v5900_v17 = vld [vmem:[#allocation2 + $0x214] sm:$0xf]  ;;  %v4237_v36 = vor.u32 %v5836_v15, %v4234_v16  ;;  %v5168_v4 = vld [vmem:[#allocation2 + $0x758] sm:$0xf] }
 0x2ad   :  { %2713 = vmatpush.bf16.msra.mxu1 %v4877_v41  ;;  %2701 = vmatpush.bf16.msra.mxu0 %v4589_v51  ;;  %v4490_v21 = vld [vmem:[#allocation2 + $0x230] sm:$0xf0]  ;;  %v6089_v41 = vld [vmem:[#allocation2 + $0x7f4] sm:$0xf0]  ;;  %v4465_v51 = vor.u32 %v5897_v34, %v4464_v33 }
 0x2ae   :  { %v6028_v23 = vld [vmem:[#allocation2 + $0x614] sm:$0xf]  ;;  %v4493_v46 = vor.u32 %v5900_v17, %v4490_v21  ;;  %v5233_v52 = vor.u32 %v6089_v41, %v5232_v38  ;;  %v6073_v5 = vld [vmem:[#allocation2 + $0x774] sm:$0xf0] }
 0x2af   :  { %2727 = vmatpush.bf16.msra.mxu2 %v5101_v45  ;;  %2689 = vmatpush.bf16.msrb.mxu3 %v4301_v62  ;;  %v5002_v24 = vld [vmem:[#allocation2 + $0x630] sm:$0xf0]  ;;  %v4721_v45 = vor.u32 %v5961_v37, %v4720_v35  ;;  %v5201_v62 = vor.u32 %v6081_v57, %v5200_v56  ;;  %v4912_v6 = vld [vmem:[#allocation2 + $0x558] sm:$0xf]  ;;  %v5169_v10 = vor.u32 %v6073_v5, %v5168_v4  ;;  %v1129_v35 = vperm.slane %v6644_v29, 1 }
 0x2b0   :  { %v5964_v27 = vld [vmem:[#allocation2 + $0x414] sm:$0xf]  ;;  %v5005_v22 = vor.u32 %v6028_v23, %v5002_v24  ;;  %v4368_v11 = vld [vmem:[#allocation2 + $0x118] sm:$0xf] }
 0x2b1   :  { %2714 = vmatpush.bf16.msra.mxu1 %v4845_v55  ;;  %2702 = vmatpush.bf16.msra.mxu0 %v4557_v1  ;;  %v4746_v30 = vld [vmem:[#allocation2 + $0x430] sm:$0xf0]  ;;  %v4977_v55 = vor.u32 %v6025_v49, %v4976_v48  ;;  %v4656_v1 = vld [vmem:[#allocation2 + $0x358] sm:$0xf] }
 0x2b2   :  { %v4749_v50 = vor.u32 %v5964_v27, %v4746_v30  ;;  %v4657_v9 = vor.u32 %v5945_v3, %v4656_v1  ;;  %v5873_v12 = vld [vmem:[#allocation2 + $0x134] sm:$0xf0] }
 0x2b3   :  { %2728 = vmatpush.bf16.msra.mxu2 %v5069_v2  ;;  %2690 = vmatpush.bf16.msrb.mxu3 %v4269_v14  ;;  %v4945_v2 = vor.u32 %v6017_v59, %v4944_v58  ;;  %v4624_v13 = vld [vmem:[#allocation2 + $0x318] sm:$0xf] }
 0x2b4   :  { %v5937_v15 = vld [vmem:[#allocation2 + $0x334] sm:$0xf0] }
 0x2b5   :  { %2715 = vmatpush.bf16.msra.mxu1 %v4813_v7  ;;  %2703 = vmatpush.bf16.msra.mxu0 %v4525_v19  ;;  %v6009_v7 = vld [vmem:[#allocation2 + $0x574] sm:$0xf0]  ;;  %v4625_v24 = vor.u32 %v5937_v15, %v4624_v13 }
 0x2b6   :  { %v4913_v14 = vor.u32 %v6009_v7, %v4912_v6  ;;  %v5136_v16 = vld [vmem:[#allocation2 + $0x718] sm:$0xf] }
 0x2b7   :  { %2729 = vmatpush.bf16.msra.mxu2 %v5037_v20  ;;  %2691 = vmatpush.bf16.msrb.mxu3 %v4237_v36  ;;  %v6065_v17 = vld [vmem:[#allocation2 + $0x734] sm:$0xf0]  ;;  %v4369_v20 = vor.u32 %v5873_v12, %v4368_v11 }
 0x2b8   :  { %v4880_v18 = vld [vmem:[#allocation2 + $0x518] sm:$0xf]  ;;  %v5137_v25 = vor.u32 %v6065_v17, %v5136_v16 }
 0x2b9   :  { %2716 = vmatpush.bf16.msra.mxu1 %v4781_v26  ;;  %2704 = vmatpush.bf16.msra.mxu0 %v4493_v46  ;;  %v6001_v19 = vld [vmem:[#allocation2 + $0x534] sm:$0xf0]  ;;  %v2498_v23 = vpop.f32.mrf.mxu0 }
 0x2ba   :  { %2692 = vmatmul.bf16.vlgmr.msrb.gmra.mxu3 %v6610_v39  ;;  %v4336_v21 = vld [vmem:[#allocation2 + $0xd8] sm:$0xf]  ;;  %v4881_v32 = vor.u32 %v6001_v19, %v4880_v18 }
 0x2bb   :  { %2730 = vmatpush.bf16.msra.mxu2 %v5005_v22  ;;  %2736 = vmatpush.bf16.msra.mxu3 %v4465_v51  ;;  %v5865_v26 = vld [vmem:[#allocation2 + $0xf4] sm:$0xf0] }
 0x2bc   :  { %2705 = vmatmul.bf16.vlgmr.msra.gmra.mxu0 %v6618_v44  ;;  %v4592_v27 = vld [vmem:[#allocation2 + $0x2d8] sm:$0xf]  ;;  %v4337_v38 = vor.u32 %v5865_v26, %v4336_v21  ;;  %v4466_v26 = vld [vmem:[#allocation2 + $0x1f8] sm:$0xf0] }
 0x2bd   :  { %2717 = vmatpush.bf16.msra.mxu1 %v4749_v50  ;;  %2749 = vmatpush.bf16.msrb.mxu0 %v4721_v45  ;;  %v5929_v30 = vld [vmem:[#allocation2 + $0x2f4] sm:$0xf0]  ;;  %v2511_v31 = vpop.f32.mrf.mxu1  ;;  %v2485_v50 = vpop.f32.mrf.mxu3 }
 0x2be   :  { %2731 = vmatmul.bf16.vlgmr.msra.gmra.mxu2 %v6614_v43  ;;  %v5104_v33 = vld [vmem:[#allocation2 + $0x6d8] sm:$0xf]  ;;  %v4593_v41 = vor.u32 %v5929_v30, %v4592_v27  ;;  %v2486_v28 = vadd.f32 %v2485_v50, %v1129_v35  ;;  %v5957_v27 = vld [vmem:[#allocation2 + $0x3dc] sm:$0xf] }
 0x2bf   :  { %2775 = vmatpush.bf16.msrb.mxu2 %v5233_v52  ;;  %2737 = vmatpush.bf16.msra.mxu3 %v4433_v60  ;;  %v6057_v34 = vld [vmem:[#allocation2 + $0x6f4] sm:$0xf0]  ;;  %v4434_v50 = vld [vmem:[#allocation2 + $0x1b8] sm:$0xf0] }
 0x2c0   :  { %2718 = vmatmul.bf16.vlgmr.msra.gmra.mxu1 %v6622_v47  ;;  %v4848_v36 = vld [vmem:[#allocation2 + $0x4d8] sm:$0xf]  ;;  %v5105_v46 = vor.u32 %v6057_v34, %v5104_v33  ;;  %v2499_v57 = vadd.f32 %v2498_v23, %v2486_v28  ;;  %v5234_v33 = vld [vmem:[#allocation2 + $0x7f8] sm:$0xf0] }
 0x2c1   :  { %2762 = vmatpush.bf16.msrb.mxu1 %v4977_v55  ;;  %2750 = vmatpush.bf16.msrb.mxu0 %v4689_v61  ;;  %v5993_v37 = vld [vmem:[#allocation2 + $0x4f4] sm:$0xf0]  ;;  %v2524_v54 = vpop.f32.mrf.mxu2  ;;  %v2500_v58 = vpop.f32.mrf.mxu0  ;;  %v5202_v28 = vld [vmem:[#allocation2 + $0x7b8] sm:$0xf0] }
 0x2c2   :  { %v4304_v22 = vld [vmem:[#allocation2 + $0x98] sm:$0xf]  ;;  %v4849_v51 = vor.u32 %v5993_v37, %v4848_v36  ;;  %v2512_v5 = vadd.f32 %v2511_v31, %v2499_v57  ;;  %v4722_v31 = vld [vmem:[#allocation2 + $0x3f8] sm:$0xf0] }
 0x2c3   :  { %2776 = vmatpush.bf16.msrb.mxu2 %v5201_v62  ;;  %2738 = vmatpush.bf16.msra.mxu3 %v4401_v8  ;;  %v5857_v48 = vld [vmem:[#allocation2 + $0xb4] sm:$0xf0]  ;;  %v6021_v37 = vld [vmem:[#allocation2 + $0x5dc] sm:$0xf] }
 0x2c4   :  { %v4560_v49 = vld [vmem:[#allocation2 + $0x298] sm:$0xf]  ;;  %v4305_v56 = vor.u32 %v5857_v48, %v4304_v22  ;;  %v2525_v12 = vadd.f32 %v2524_v54, %v2512_v5  ;;  %v4725_v22 = vor.u32 %v5957_v27, %v4722_v31  ;;  %v6013_v54 = vld [vmem:[#allocation2 + $0x59c] sm:$0xf] }
 0x2c5   :  { %2763 = vmatpush.bf16.msrb.mxu1 %v4945_v2  ;;  %2751 = vmatpush.bf16.msrb.mxu0 %v4657_v9  ;;  %v5921_v45 = vld [vmem:[#allocation2 + $0x2b4] sm:$0xf0]  ;;  %v2513_v0 = vpop.f32.mrf.mxu1  ;;  %v2487_v18 = vpop.f32.mrf.mxu3  ;;  %v5877_v58 = vld [vmem:[#allocation2 + $0x15c] sm:$0xf] }
 0x2c6   :  { %v5072_v52 = vld [vmem:[#allocation2 + $0x698] sm:$0xf]  ;;  %v4561_v59 = vor.u32 %v5921_v45, %v4560_v49  ;;  %v2841_v23 = vmul.f32 0.2, %v2525_v12  ;;  %v5885_v49 = vld [vmem:[#allocation2 + $0x19c] sm:$0xf] }
 0x2c7   :  { %2777 = vmatpush.bf16.msrb.mxu2 %v5169_v10  ;;  %2739 = vmatpush.bf16.msra.mxu3 %v4369_v20  ;;  %v6049_v53 = vld [vmem:[#allocation2 + $0x6b4] sm:$0xf0]  ;;  %v5170_v0 = vld [vmem:[#allocation2 + $0x778] sm:$0xf0] }
 0x2c8   :  { %v4816_v55 = vld [vmem:[#allocation2 + $0x498] sm:$0xf]  ;;  %v5073_v60 = vor.u32 %v6049_v53, %v5072_v52  ;;  %v6654_v34 = vmax.f32 %v2525_v12, %v2841_v23  ;;  %v4690_v52 = vld [vmem:[#allocation2 + $0x3b8] sm:$0xf0] }
 0x2c9   :  { %2764 = vmatpush.bf16.msrb.mxu1 %v4913_v14  ;;  %2752 = vmatpush.bf16.msrb.mxu0 %v4625_v24  ;;  %v5985_v40 = vld [vmem:[#allocation2 + $0x4b4] sm:$0xf0]  ;;  %v2526_v24 = vpop.f32.mrf.mxu2  ;;  %v6077_v53 = vld [vmem:[#allocation2 + $0x79c] sm:$0xf] }
 0x2ca   :  { %v4272_v61 = vld [vmem:[#allocation2 + $0x58] sm:$0xf]  ;;  %v4817_v1 = vor.u32 %v5985_v40, %v4816_v55  ;;  %v4946_v55 = vld [vmem:[#allocation2 + $0x5b8] sm:$0xf0]  ;;  %v4437_v40 = vor.u32 %v5885_v49, %v4434_v50  ;;  %v5205_v57 = vor.u32 %v6077_v53, %v5202_v28 }
 0x2cb   :  { %2778 = vmatpush.bf16.msrb.mxu2 %v5137_v25  ;;  %2740 = vmatpush.bf16.msra.mxu3 %v4337_v38  ;;  %v5849_v62 = vld [vmem:[#allocation2 + $0x74] sm:$0xf0]  ;;  %v5893_v25 = vld [vmem:[#allocation2 + $0x1dc] sm:$0xf] }
 0x2cc   :  { %v4528_v63 = vld [vmem:[#allocation2 + $0x258] sm:$0xf]  ;;  %v4273_v8 = vor.u32 %v5849_v62, %v4272_v61  ;;  %v4978_v38 = vld [vmem:[#allocation2 + $0x5f8] sm:$0xf0]  ;;  %v4949_v61 = vor.u32 %v6013_v54, %v4946_v55 }
 0x2cd   :  { %2765 = vmatpush.bf16.msrb.mxu1 %v4881_v32  ;;  %2753 = vmatpush.bf16.msrb.mxu0 %v4593_v41  ;;  %v5913_v2 = vld [vmem:[#allocation2 + $0x274] sm:$0xf0]  ;;  %v6085_v32 = vld [vmem:[#allocation2 + $0x7dc] sm:$0xf]  ;;  %v4981_v45 = vor.u32 %v6021_v37, %v4978_v38 }
 0x2ce   :  { %v5040_v3 = vld [vmem:[#allocation2 + $0x658] sm:$0xf]  ;;  %v4529_v13 = vor.u32 %v5913_v2, %v4528_v63  ;;  %v5237_v48 = vor.u32 %v6085_v32, %v5234_v33  ;;  %v4658_v62 = vld [vmem:[#allocation2 + $0x378] sm:$0xf0] }
 0x2cf   :  { %2779 = vmatpush.bf16.msrb.mxu2 %v5105_v46  ;;  %v6041_v4 = vld [vmem:[#allocation2 + $0x674] sm:$0xf0]  ;;  %2741 = vmatpush.bf16.msra.mxu3 %v4305_v56  ;;  %v4469_v46 = vor.u32 %v5893_v25, %v4466_v26  ;;  %v6069_v63 = vld [vmem:[#allocation2 + $0x75c] sm:$0xf] }
 0x2d0   :  { %v4784_v6 = vld [vmem:[#allocation2 + $0x458] sm:$0xf]  ;;  %v5041_v14 = vor.u32 %v6041_v4, %v5040_v3  ;;  %v4914_v2 = vld [vmem:[#allocation2 + $0x578] sm:$0xf0]  ;;  %v5173_v5 = vor.u32 %v6069_v63, %v5170_v0 }
 0x2d1   :  { %2766 = vmatpush.bf16.msrb.mxu1 %v4849_v51  ;;  %v5977_v7 = vld [vmem:[#allocation2 + $0x474] sm:$0xf0]  ;;  %2754 = vmatpush.bf16.msrb.mxu0 %v4561_v59  ;;  %v5949_v51 = vld [vmem:[#allocation2 + $0x39c] sm:$0xf] }
 0x2d2   :  { %v4240_v9 = vld [vmem:[#allocation2 + $0x18] sm:$0xf]  ;;  %v4785_v19 = vor.u32 %v5977_v7, %v4784_v6  ;;  %v4693_v56 = vor.u32 %v5949_v51, %v4690_v52  ;;  %v4402_v59 = vld [vmem:[#allocation2 + $0x178] sm:$0xf0] }
 0x2d3   :  { %v5841_v10 = vld [vmem:[#allocation2 + $0x34] sm:$0xf0]  ;;  %2780 = vmatpush.bf16.msrb.mxu2 %v5073_v60  ;;  %2742 = vmatpush.bf16.msra.mxu3 %v4273_v8  ;;  %v5941_v60 = vld [vmem:[#allocation2 + $0x35c] sm:$0xf]  ;;  %v4405_v3 = vor.u32 %v5877_v58, %v4402_v59 }
 0x2d4   :  { %v4496_v11 = vld [vmem:[#allocation2 + $0x218] sm:$0xf]  ;;  %v4241_v30 = vor.u32 %v5841_v10, %v4240_v9  ;;  %v4661_v4 = vor.u32 %v5941_v60, %v4658_v62  ;;  %v5869_v6 = vld [vmem:[#allocation2 + $0x11c] sm:$0xf] }
 0x2d5   :  { %v5905_v15 = vld [vmem:[#allocation2 + $0x234] sm:$0xf0]  ;;  %2767 = vmatpush.bf16.msrb.mxu1 %v4817_v1  ;;  %2755 = vmatpush.bf16.msrb.mxu0 %v4529_v13  ;;  %v6005_v1 = vld [vmem:[#allocation2 + $0x55c] sm:$0xf] }
 0x2d6   :  { %v5008_v16 = vld [vmem:[#allocation2 + $0x618] sm:$0xf]  ;;  %v4497_v35 = vor.u32 %v5905_v15, %v4496_v11  ;;  %v4370_v7 = vld [vmem:[#allocation2 + $0x138] sm:$0xf0]  ;;  %v4917_v9 = vor.u32 %v6005_v1, %v4914_v2 }
 0x2d7   :  { %v6033_v17 = vld [vmem:[#allocation2 + $0x634] sm:$0xf0]  ;;  %2781 = vmatpush.bf16.msrb.mxu2 %v5041_v14  ;;  %2743 = vmatpush.bf16.msra.mxu3 %v4241_v30  ;;  %v5933_v8 = vld [vmem:[#allocation2 + $0x31c] sm:$0xf]  ;;  %v4373_v15 = vor.u32 %v5869_v6, %v4370_v7  ;;  %v1130_v30 = vperm.slane %v6644_v29, 2 }
 0x2d8   :  { %v4752_v20 = vld [vmem:[#allocation2 + $0x418] sm:$0xf]  ;;  %v5009_v36 = vor.u32 %v6033_v17, %v5008_v16  ;;  %v4626_v10 = vld [vmem:[#allocation2 + $0x338] sm:$0xf0] }
 0x2d9   :  { %v5969_v21 = vld [vmem:[#allocation2 + $0x434] sm:$0xf0]  ;;  %2768 = vmatpush.bf16.msrb.mxu1 %v4785_v19  ;;  %2756 = vmatpush.bf16.msrb.mxu0 %v4497_v35  ;;  %v6061_v11 = vld [vmem:[#allocation2 + $0x71c] sm:$0xf]  ;;  %v2550_v17 = vpop.f32.mrf.mxu0  ;;  %v4629_v18 = vor.u32 %v5933_v8, %v4626_v10 }
 0x2da   :  { %v4753_v41 = vor.u32 %v5969_v21, %v4752_v20  ;;  %2744 = vmatmul.bf16.vlgmr.msra.gmra.mxu3 %v6610_v39  ;;  %v5138_v12 = vld [vmem:[#allocation2 + $0x738] sm:$0xf0] }
 0x2db   :  { %2782 = vmatpush.bf16.msrb.mxu2 %v5009_v36  ;;  %2788 = vmatpush.bf16.msrb.mxu3 %v4469_v46  ;;  %v5997_v13 = vld [vmem:[#allocation2 + $0x51c] sm:$0xf]  ;;  %v5141_v19 = vor.u32 %v6061_v11, %v5138_v12 }
 0x2dc   :  { %2757 = vmatmul.bf16.vlgmr.msrb.gmra.mxu0 %v6618_v44  ;;  %v4882_v14 = vld [vmem:[#allocation2 + $0x538] sm:$0xf0] }
 0x2dd   :  { %2769 = vmatpush.bf16.msrb.mxu1 %v4753_v41  ;;  %2801 = vmatpush.bf16.msra.mxu0 %v4725_v22  ;;  %v5861_v16 = vld [vmem:[#allocation2 + $0xdc] sm:$0xf]  ;;  %v2563_v24 = vpop.f32.mrf.mxu1  ;;  %v4885_v25 = vor.u32 %v5997_v13, %v4882_v14  ;;  %v2537_v46 = vpop.f32.mrf.mxu3 }
 0x2de   :  { %2783 = vmatmul.bf16.vlgmr.msrb.gmra.mxu2 %v6614_v43  ;;  %v4338_v20 = vld [vmem:[#allocation2 + $0xf8] sm:$0xf0]  ;;  %v2538_v51 = vadd.f32 %v2537_v46, %v1130_v30  ;;  %v1131_v30 = vperm.slane %v6644_v29, 3 }
 0x2df   :  { %2827 = vmatpush.bf16.msra.mxu2 %v5237_v48  ;;  %2789 = vmatpush.bf16.msrb.mxu3 %v4437_v40  ;;  %v5925_v21 = vld [vmem:[#allocation2 + $0x2dc] sm:$0xf]  ;;  %v4341_v33 = vor.u32 %v5861_v16, %v4338_v20 }
 0x2e0   :  { %2770 = vmatmul.bf16.vlgmr.msrb.gmra.mxu1 %v6622_v47  ;;  %v4594_v23 = vld [vmem:[#allocation2 + $0x2f8] sm:$0xf0]  ;;  %v2551_v54 = vadd.f32 %v2550_v17, %v2538_v51 }
 0x2e1   :  { %2814 = vmatpush.bf16.msra.mxu1 %v4981_v45  ;;  %2802 = vmatpush.bf16.msra.mxu0 %v4693_v56  ;;  %v6053_v26 = vld [vmem:[#allocation2 + $0x6dc] sm:$0xf]  ;;  %v4597_v35 = vor.u32 %v5925_v21, %v4594_v23  ;;  %v2576_v45 = vpop.f32.mrf.mxu2  ;;  %v2552_v55 = vpop.f32.mrf.mxu0 }
 0x2e2   :  { %v5106_v27 = vld [vmem:[#allocation2 + $0x6f8] sm:$0xf0]  ;;  %v2564_v1 = vadd.f32 %v2563_v24, %v2551_v54 }
 0x2e3   :  { %2828 = vmatpush.bf16.msra.mxu2 %v5205_v57  ;;  %2790 = vmatpush.bf16.msrb.mxu3 %v4405_v3  ;;  %v5989_v31 = vld [vmem:[#allocation2 + $0x4dc] sm:$0xf]  ;;  %v5109_v36 = vor.u32 %v6053_v26, %v5106_v27 }
 0x2e4   :  { %v4850_v32 = vld [vmem:[#allocation2 + $0x4f8] sm:$0xf0]  ;;  %v2577_v6 = vadd.f32 %v2576_v45, %v2564_v1 }
 0x2e5   :  { %2815 = vmatpush.bf16.msra.mxu1 %v4949_v61  ;;  %2803 = vmatpush.bf16.msra.mxu0 %v4661_v4  ;;  %v5853_v37 = vld [vmem:[#allocation2 + $0x9c] sm:$0xf]  ;;  %v4853_v22 = vor.u32 %v5989_v31, %v4850_v32  ;;  %v2565_v60 = vpop.f32.mrf.mxu1  ;;  %v2539_v12 = vpop.f32.mrf.mxu3 }
 0x2e6   :  { %v4306_v38 = vld [vmem:[#allocation2 + $0xb8] sm:$0xf0]  ;;  %v2842_v16 = vmul.f32 0.2, %v2577_v6  ;;  %v1133_v60 = vperm.slane %v6644_v29, 5 }
 0x2e7   :  { %2829 = vmatpush.bf16.msra.mxu2 %v5173_v5  ;;  %2791 = vmatpush.bf16.msrb.mxu3 %v4373_v15  ;;  %v5917_v41 = vld [vmem:[#allocation2 + $0x29c] sm:$0xf]  ;;  %v4309_v28 = vor.u32 %v5853_v37, %v4306_v38 }
 0x2e8   :  { %v4562_v48 = vld [vmem:[#allocation2 + $0x2b8] sm:$0xf0]  ;;  %v6661_v21 = vmax.f32 %v2577_v6, %v2842_v16 }
 0x2e9   :  { %2816 = vmatpush.bf16.msra.mxu1 %v4917_v9  ;;  %2804 = vmatpush.bf16.msra.mxu0 %v4629_v18  ;;  %v6045_v49 = vld [vmem:[#allocation2 + $0x69c] sm:$0xf]  ;;  %v4565_v40 = vor.u32 %v5917_v41, %v4562_v48  ;;  %v2578_v17 = vpop.f32.mrf.mxu2 }
 0x2ea   :  { %v5074_v50 = vld [vmem:[#allocation2 + $0x6b8] sm:$0xf0] }
 0x2eb   :  { %2830 = vmatpush.bf16.msra.mxu2 %v5141_v19  ;;  %v5981_v52 = vld [vmem:[#allocation2 + $0x49c] sm:$0xf]  ;;  %2792 = vmatpush.bf16.msrb.mxu3 %v4341_v33  ;;  %v5077_v56 = vor.u32 %v6045_v49, %v5074_v50 }
 0x2ec   :  { %v4818_v53 = vld [vmem:[#allocation2 + $0x4b8] sm:$0xf0] }
 0x2ed   :  { %2817 = vmatpush.bf16.msra.mxu1 %v4885_v25  ;;  %2805 = vmatpush.bf16.msra.mxu0 %v4597_v35  ;;  %v5845_v57 = vld [vmem:[#allocation2 + $0x5c] sm:$0xf]  ;;  %v4821_v61 = vor.u32 %v5981_v52, %v4818_v53 }
 0x2ee   :  { %v4274_v58 = vld [vmem:[#allocation2 + $0x78] sm:$0xf0] }
 0x2ef   :  { %2831 = vmatpush.bf16.msra.mxu2 %v5109_v36  ;;  %v5909_v59 = vld [vmem:[#allocation2 + $0x25c] sm:$0xf]  ;;  %2793 = vmatpush.bf16.msrb.mxu3 %v4309_v28  ;;  %v4277_v4 = vor.u32 %v5845_v57, %v4274_v58 }
 0x2f0   :  { %v4530_v62 = vld [vmem:[#allocation2 + $0x278] sm:$0xf0] }
 0x2f1   :  { %2818 = vmatpush.bf16.msra.mxu1 %v4853_v22  ;;  %v6037_v63 = vld [vmem:[#allocation2 + $0x65c] sm:$0xf]  ;;  %2806 = vmatpush.bf16.msra.mxu0 %v4565_v40  ;;  %v4533_v7 = vor.u32 %v5909_v59, %v4530_v62 }
 0x2f2   :  { %v5042_v0 = vld [vmem:[#allocation2 + $0x678] sm:$0xf0] }
 0x2f3   :  { %v5973_v2 = vld [vmem:[#allocation2 + $0x45c] sm:$0xf]  ;;  %2832 = vmatpush.bf16.msra.mxu2 %v5077_v56  ;;  %v5045_v8 = vor.u32 %v6037_v63, %v5042_v0  ;;  %2794 = vmatpush.bf16.msrb.mxu3 %v4277_v4 }
 0x2f4   :  { %v4786_v3 = vld [vmem:[#allocation2 + $0x478] sm:$0xf0] }
 0x2f5   :  { %v5837_v5 = vld [vmem:[#allocation2 + $0x1c] sm:$0xf]  ;;  %2819 = vmatpush.bf16.msra.mxu1 %v4821_v61  ;;  %v4789_v13 = vor.u32 %v5973_v2, %v4786_v3  ;;  %2807 = vmatpush.bf16.msra.mxu0 %v4533_v7 }
 0x2f6   :  { %v4242_v9 = vld [vmem:[#allocation2 + $0x38] sm:$0xf0] }
 0x2f7   :  { %v5901_v10 = vld [vmem:[#allocation2 + $0x21c] sm:$0xf]  ;;  %v4245_v20 = vor.u32 %v5837_v5, %v4242_v9  ;;  %2833 = vmatpush.bf16.msra.mxu2 %v5045_v8 }
 0x2f8   :  { %v4498_v11 = vld [vmem:[#allocation2 + $0x238] sm:$0xf0] }
 0x2f9   :  { %v6029_v14 = vld [vmem:[#allocation2 + $0x61c] sm:$0xf]  ;;  %v4501_v23 = vor.u32 %v5901_v10, %v4498_v11  ;;  %2820 = vmatpush.bf16.msra.mxu1 %v4789_v13  ;;  %2795 = vmatpush.bf16.msrb.mxu3 %v4245_v20  ;;  %v2602_v26 = vpop.f32.mrf.mxu0  ;;  %v1134_v11 = vperm.slane %v6644_v29, 6 }
 0x2fa   :  { %v5010_v15 = vld [vmem:[#allocation2 + $0x638] sm:$0xf0] }
 0x2fb   :  { %v5965_v18 = vld [vmem:[#allocation2 + $0x41c] sm:$0xf]  ;;  %v5013_v24 = vor.u32 %v6029_v14, %v5010_v15  ;;  %2808 = vmatpush.bf16.msra.mxu0 %v4501_v23 }
 0x2fc   :  { %v4754_v19 = vld [vmem:[#allocation2 + $0x438] sm:$0xf0]  ;;  %2796 = vmatmul.bf16.vlgmr.msrb.gmra.mxu3 %v6610_v39 }
 0x2fd   :  { %v4757_v25 = vor.u32 %v5965_v18, %v4754_v19  ;;  %2834 = vmatpush.bf16.msra.mxu2 %v5013_v24  ;;  %v2615_v27 = vpop.f32.mrf.mxu1  ;;  %v2589_v31 = vpop.f32.mrf.mxu3 }
 0x2fe   :  { %2809 = vmatmul.bf16.vlgmr.msra.gmra.mxu0 %v6618_v44  ;;  %v2590_v32 = vadd.f32 %v2589_v31, %v1131_v30  ;;  %v1135_v30 = vperm.slane %v6644_v29, 7 }
 0x2ff   :  { %2821 = vmatpush.bf16.msra.mxu1 %v4757_v25 }
 0x300   :  { %2835 = vmatmul.bf16.vlgmr.msra.gmra.mxu2 %v6614_v43  ;;  %v2603_v35 = vadd.f32 %v2602_v26, %v2590_v32 }
 0x301   :  { %v2628_v33 = vpop.f32.mrf.mxu2  ;;  %v2604_v36 = vpop.f32.mrf.mxu0 }
 0x302   :  { %2822 = vmatmul.bf16.vlgmr.msra.gmra.mxu1 %v6622_v47  ;;  %v2616_v38 = vadd.f32 %v2615_v27, %v2603_v35  ;;  %v1132_v47 = vperm.slane %v6644_v29, 4 }
 0x304   :  { %v2629_v41 = vadd.f32 %v2628_v33, %v2616_v38 }
 0x305   :  { %v2617_v37 = vpop.f32.mrf.mxu1  ;;  %v2591_v46 = vpop.f32.mrf.mxu3 }
 0x306   :  { %v2843_v39 = vmul.f32 0.2, %v2629_v41 }
 0x308   :  { %v6668_v44 = vmax.f32 %v2629_v41, %v2843_v39 }
 0x309   :  { %v2630_v22 = vpop.f32.mrf.mxu2 }
 0x319   :  { %v2654_v43 = vpop.f32.mrf.mxu0 }
 0x31d   :  { %v2667_v48 = vpop.f32.mrf.mxu1  ;;  %v2641_v49 = vpop.f32.mrf.mxu3 }
 0x31e   :  { %v2642_v50 = vadd.f32 %v2641_v49, %v1132_v47 }
 0x320   :  { %v2655_v45 = vadd.f32 %v2654_v43, %v2642_v50 }
 0x321   :  { %v2680_v51 = vpop.f32.mrf.mxu2  ;;  %v2656_v52 = vpop.f32.mrf.mxu0 }
 0x322   :  { %v2668_v28 = vadd.f32 %v2667_v48, %v2655_v45 }
 0x324   :  { %v2681_v54 = vadd.f32 %v2680_v51, %v2668_v28 }
 0x325   :  { %v2669_v53 = vpop.f32.mrf.mxu1  ;;  %v2643_v55 = vpop.f32.mrf.mxu3 }
 0x326   :  { %v2844_v40 = vmul.f32 0.2, %v2681_v54 }
 0x328   :  { %v6671_v57 = vmax.f32 %v2681_v54, %v2844_v40 }
 0x329   :  { %v2682_v56 = vpop.f32.mrf.mxu2 }
 0x339   :  { %v2706_v58 = vpop.f32.mrf.mxu0 }
 0x33d   :  { %v2719_v59 = vpop.f32.mrf.mxu1  ;;  %v2693_v61 = vpop.f32.mrf.mxu3 }
 0x33e   :  { %v2694_v62 = vadd.f32 %v2693_v61, %v1133_v60 }
 0x340   :  { %v2707_v0 = vadd.f32 %v2706_v58, %v2694_v62 }
 0x341   :  { %v2732_v63 = vpop.f32.mrf.mxu2  ;;  %v2708_v1 = vpop.f32.mrf.mxu0 }
 0x342   :  { %v2720_v3 = vadd.f32 %v2719_v59, %v2707_v0 }
 0x344   :  { %v2733_v4 = vadd.f32 %v2732_v63, %v2720_v3 }
 0x345   :  { %v2721_v2 = vpop.f32.mrf.mxu1  ;;  %v2695_v5 = vpop.f32.mrf.mxu3 }
 0x346   :  { %v2845_v6 = vmul.f32 0.2, %v2733_v4 }
 0x348   :  { %v6674_v8 = vmax.f32 %v2733_v4, %v2845_v6 }
 0x349   :  { %v2734_v7 = vpop.f32.mrf.mxu2 }
 0x359   :  { %v2758_v9 = vpop.f32.mrf.mxu0 }
 0x35d   :  { %v2771_v10 = vpop.f32.mrf.mxu1  ;;  %v2745_v12 = vpop.f32.mrf.mxu3 }
 0x35e   :  { %v2746_v13 = vadd.f32 %v2745_v12, %v1134_v11 }
 0x360   :  { %v2759_v15 = vadd.f32 %v2758_v9, %v2746_v13 }
 0x361   :  { %v2784_v14 = vpop.f32.mrf.mxu2  ;;  %v2760_v16 = vpop.f32.mrf.mxu0 }
 0x362   :  { %v2772_v18 = vadd.f32 %v2771_v10, %v2759_v15 }
 0x364   :  { %v2785_v19 = vadd.f32 %v2784_v14, %v2772_v18 }
 0x365   :  { %v2773_v17 = vpop.f32.mrf.mxu1  ;;  %v2747_v20 = vpop.f32.mrf.mxu3 }
 0x366   :  { %v2846_v23 = vmul.f32 0.2, %v2785_v19 }
 0x368   :  { %v6677_v25 = vmax.f32 %v2785_v19, %v2846_v23 }
 0x369   :  { %v2786_v24 = vpop.f32.mrf.mxu2 }
 0x37b   :  { %v2810_v26 = vpop.f32.mrf.mxu0 }
 0x37f   :  { %v2823_v27 = vpop.f32.mrf.mxu1  ;;  %v2797_v31 = vpop.f32.mrf.mxu3 }
 0x380   :  { %v2798_v32 = vadd.f32 %v2797_v31, %v1135_v30 }
 0x382   :  { %v2811_v35 = vadd.f32 %v2810_v26, %v2798_v32 }
 0x383   :  { %v2836_v33 = vpop.f32.mrf.mxu2  ;;  %v2812_v36 = vpop.f32.mrf.mxu0 }
 0x384   :  { %v2824_v38 = vadd.f32 %v2823_v27, %v2811_v35 }
 0x386   :  { %v2837_v41 = vadd.f32 %v2836_v33, %v2824_v38 }
 0x387   :  { %v2825_v37 = vpop.f32.mrf.mxu1  ;;  %v2799_v46 = vpop.f32.mrf.mxu3 }
 0x388   :  { %v2847_v39 = vmul.f32 0.2, %v2837_v41 }
 0x38a   :  { %v6680_v43 = vmax.f32 %v2837_v41, %v2847_v39 }
 0x38b   :  { %v2838_v22 = vpop.f32.mrf.mxu2 }
 0x38c   :  { %6492 = dma.done.wait [#allocation4 + $0x1], 16384 }
 0x38d   :  { %6493 = vsyncadd [#allocation4 + $0x1], 4294950912  ;;  %v5296_v48 = vld [vmem:[#allocation3 + $0x70] sm:$0xf]  ;;  %v6105_v47 = vld [vmem:[#allocation3 + $0x74] sm:$0xf0] }
 0x38e   :  { %v5360_v49 = vld [vmem:[#allocation3 + $0xf0] sm:$0xf]  ;;  %v5297_v50 = vor.u32 %v6105_v47, %v5296_v48  ;;  %v6121_v29 = vld [vmem:[#allocation3 + $0xf4] sm:$0xf0]  ;;  %v5288_v55 = vld [vmem:[#allocation3 + $0x60] sm:$0xf] }
 0x38f   :  { %v5488_v51 = vld [vmem:[#allocation3 + $0x1f0] sm:$0xf]  ;;  %v6153_v45 = vld [vmem:[#allocation3 + $0x1f4] sm:$0xf0]  ;;  %v5361_v52 = vor.u32 %v6121_v29, %v5360_v49  ;;  %v6103_v56 = vld [vmem:[#allocation3 + $0x64] sm:$0xf0] }
 0x390   :  { %v5489_v53 = vor.u32 %v6153_v45, %v5488_v51  ;;  %v5424_v28 = vld [vmem:[#allocation3 + $0x170] sm:$0xf]  ;;  %v6137_v54 = vld [vmem:[#allocation3 + $0x174] sm:$0xf0]  ;;  %3642 = vmatpush.bf16.msra.mxu3 %v5297_v50  ;;  %v5352_v58 = vld [vmem:[#allocation3 + $0xe0] sm:$0xf]  ;;  %v5289_v60 = vor.u32 %v6103_v56, %v5288_v55 }
 0x391   :  { %v5425_v40 = vor.u32 %v6137_v54, %v5424_v28  ;;  %v6119_v59 = vld [vmem:[#allocation3 + $0xe4] sm:$0xf0]  ;;  %3655 = vmatpush.bf16.msrb.mxu0 %v5361_v52  ;;  %v5480_v62 = vld [vmem:[#allocation3 + $0x1e0] sm:$0xf]  ;;  %v5280_v3 = vld [vmem:[#allocation3 + $0x50] sm:$0xf] }
 0x392   :  { %3681 = vmatpush.bf16.msrb.mxu2 %v5489_v53  ;;  %v5353_v61 = vor.u32 %v6119_v59, %v5352_v58  ;;  %v6151_v63 = vld [vmem:[#allocation3 + $0x1e4] sm:$0xf0]  ;;  %v5416_v0 = vld [vmem:[#allocation3 + $0x160] sm:$0xf]  ;;  %v6101_v4 = vld [vmem:[#allocation3 + $0x54] sm:$0xf0] }
 0x393   :  { %3668 = vmatpush.bf16.msrb.mxu1 %v5425_v40  ;;  %v5481_v1 = vor.u32 %v6151_v63, %v5480_v62  ;;  %v6135_v2 = vld [vmem:[#allocation3 + $0x164] sm:$0xf0]  ;;  %v5344_v6 = vld [vmem:[#allocation3 + $0xd0] sm:$0xf]  ;;  %v6117_v7 = vld [vmem:[#allocation3 + $0xd4] sm:$0xf0]  ;;  %v5281_v10 = vor.u32 %v6101_v4, %v5280_v3 }
 0x394   :  { %v5417_v5 = vor.u32 %v6135_v2, %v5416_v0  ;;  %v5472_v9 = vld [vmem:[#allocation3 + $0x1d0] sm:$0xf]  ;;  %3643 = vmatpush.bf16.msra.mxu3 %v5289_v60  ;;  %v6149_v11 = vld [vmem:[#allocation3 + $0x1d4] sm:$0xf0]  ;;  %v5345_v14 = vor.u32 %v6117_v7, %v5344_v6  ;;  %v5272_v16 = vld [vmem:[#allocation3 + $0x40] sm:$0xf] }
 0x395   :  { %v5408_v12 = vld [vmem:[#allocation3 + $0x150] sm:$0xf]  ;;  %v6133_v13 = vld [vmem:[#allocation3 + $0x154] sm:$0xf0]  ;;  %3656 = vmatpush.bf16.msrb.mxu0 %v5353_v61  ;;  %v5473_v15 = vor.u32 %v6149_v11, %v5472_v9  ;;  %v6099_v17 = vld [vmem:[#allocation3 + $0x44] sm:$0xf0] }
 0x396   :  { %3682 = vmatpush.bf16.msrb.mxu2 %v5481_v1  ;;  %v5336_v18 = vld [vmem:[#allocation3 + $0xc0] sm:$0xf]  ;;  %v5409_v19 = vor.u32 %v6133_v13, %v5408_v12  ;;  %v6115_v20 = vld [vmem:[#allocation3 + $0xc4] sm:$0xf0]  ;;  %v5273_v30 = vor.u32 %v6099_v17, %v5272_v16  ;;  %v5264_v33 = vld [vmem:[#allocation3 + $0x30] sm:$0xf] }
 0x397   :  { %3669 = vmatpush.bf16.msrb.mxu1 %v5417_v5  ;;  %v5464_v23 = vld [vmem:[#allocation3 + $0x1c0] sm:$0xf]  ;;  %v6147_v24 = vld [vmem:[#allocation3 + $0x1c4] sm:$0xf0]  ;;  %v5337_v31 = vor.u32 %v6115_v20, %v5336_v18  ;;  %v6097_v35 = vld [vmem:[#allocation3 + $0x34] sm:$0xf0] }
 0x398   :  { %v5400_v26 = vld [vmem:[#allocation3 + $0x140] sm:$0xf]  ;;  %v6131_v27 = vld [vmem:[#allocation3 + $0x144] sm:$0xf0]  ;;  %3644 = vmatpush.bf16.msra.mxu3 %v5281_v10  ;;  %v5465_v32 = vor.u32 %v6147_v24, %v5464_v23  ;;  %v5328_v36 = vld [vmem:[#allocation3 + $0xb0] sm:$0xf]  ;;  %v5265_v48 = vor.u32 %v6097_v35, %v5264_v33 }
 0x399   :  { %3657 = vmatpush.bf16.msrb.mxu0 %v5345_v14  ;;  %v5401_v37 = vor.u32 %v6131_v27, %v5400_v26  ;;  %v6113_v38 = vld [vmem:[#allocation3 + $0xb4] sm:$0xf0]  ;;  %v5456_v41 = vld [vmem:[#allocation3 + $0x1b0] sm:$0xf]  ;;  %v5256_v50 = vld [vmem:[#allocation3 + $0x20] sm:$0xf] }
 0x39a   :  { %3683 = vmatpush.bf16.msrb.mxu2 %v5473_v15  ;;  %v6145_v46 = vld [vmem:[#allocation3 + $0x1b4] sm:$0xf0]  ;;  %v5392_v39 = vld [vmem:[#allocation3 + $0x130] sm:$0xf]  ;;  %v5329_v47 = vor.u32 %v6113_v38, %v5328_v36  ;;  %v6095_v29 = vld [vmem:[#allocation3 + $0x24] sm:$0xf0] }
 0x39b   :  { %3670 = vmatpush.bf16.msrb.mxu1 %v5409_v19  ;;  %v6129_v22 = vld [vmem:[#allocation3 + $0x134] sm:$0xf0]  ;;  %v5457_v49 = vor.u32 %v6145_v46, %v5456_v41  ;;  %v5320_v51 = vld [vmem:[#allocation3 + $0xa0] sm:$0xf]  ;;  %v6111_v52 = vld [vmem:[#allocation3 + $0xa4] sm:$0xf0]  ;;  %v5257_v40 = vor.u32 %v6095_v29, %v5256_v50 }
 0x39c   :  { %3645 = vmatpush.bf16.msra.mxu3 %v5273_v30  ;;  %v5393_v45 = vor.u32 %v6129_v22, %v5392_v39  ;;  %v5448_v53 = vld [vmem:[#allocation3 + $0x1a0] sm:$0xf]  ;;  %v6143_v28 = vld [vmem:[#allocation3 + $0x1a4] sm:$0xf0]  ;;  %v5321_v56 = vor.u32 %v6111_v52, %v5320_v51  ;;  %v5248_v59 = vld [vmem:[#allocation3 + $0x10] sm:$0xf]  ;;  %v6688_v51 = vpack.c.bf16 %v6668_v44, %v6668_v44 }
 0x39d   :  { %3658 = vmatpush.bf16.msrb.mxu0 %v5337_v31  ;;  %v5384_v54 = vld [vmem:[#allocation3 + $0x120] sm:$0xf]  ;;  %v6127_v55 = vld [vmem:[#allocation3 + $0x124] sm:$0xf0]  ;;  %v5449_v58 = vor.u32 %v6143_v28, %v5448_v53  ;;  %v6093_v60 = vld [vmem:[#allocation3 + $0x14] sm:$0xf0] }
 0x39e   :  { %3684 = vmatpush.bf16.msrb.mxu2 %v5465_v32  ;;  %v5312_v61 = vld [vmem:[#allocation3 + $0x90] sm:$0xf]  ;;  %v5385_v62 = vor.u32 %v6127_v55, %v5384_v54  ;;  %v6109_v63 = vld [vmem:[#allocation3 + $0x94] sm:$0xf0]  ;;  %v5249_v4 = vor.u32 %v6093_v60, %v5248_v59  ;;  %v5240_v5 = vld [vmem:[#allocation3] sm:$0xf] }
 0x39f   :  { %3671 = vmatpush.bf16.msrb.mxu1 %v5401_v37  ;;  %v5440_v0 = vld [vmem:[#allocation3 + $0x190] sm:$0xf]  ;;  %v6141_v1 = vld [vmem:[#allocation3 + $0x194] sm:$0xf0]  ;;  %v6091_v6 = vld [vmem:[#allocation3 + $0x4] sm:$0xf0]  ;;  %v5313_v7 = vor.u32 %v6109_v63, %v5312_v61 }
 0x3a0   :  { %3646 = vmatpush.bf16.msra.mxu3 %v5265_v48  ;;  %v5376_v2 = vld [vmem:[#allocation3 + $0x110] sm:$0xf]  ;;  %v6125_v3 = vld [vmem:[#allocation3 + $0x114] sm:$0xf0]  ;;  %v5441_v9 = vor.u32 %v6141_v1, %v5440_v0  ;;  %v5304_v10 = vld [vmem:[#allocation3 + $0x80] sm:$0xf]  ;;  %v5241_v20 = vor.u32 %v6091_v6, %v5240_v5 }
 0x3a1   :  { %3659 = vmatpush.bf16.msrb.mxu0 %v5329_v47  ;;  %v6107_v11 = vld [vmem:[#allocation3 + $0x84] sm:$0xf0]  ;;  %v5432_v12 = vld [vmem:[#allocation3 + $0x180] sm:$0xf]  ;;  %v5377_v13 = vor.u32 %v6125_v3, %v5376_v2  ;;  %v5552_v15 = vld [vmem:[#allocation3 + $0x270] sm:$0xf] }
 0x3a2   :  { %3685 = vmatpush.bf16.msrb.mxu2 %v5457_v49  ;;  %v6139_v14 = vld [vmem:[#allocation3 + $0x184] sm:$0xf0]  ;;  %v6169_v16 = vld [vmem:[#allocation3 + $0x274] sm:$0xf0]  ;;  %v5616_v17 = vld [vmem:[#allocation3 + $0x2f0] sm:$0xf]  ;;  %v5305_v27 = vor.u32 %v6107_v11, %v5304_v10  ;;  %v6684_v49 = vpack.c.bf16 %v6647_v42, %v6647_v42 }
 0x3a3   :  { %3672 = vmatpush.bf16.msrb.mxu1 %v5393_v45  ;;  %v6185_v18 = vld [vmem:[#allocation3 + $0x2f4] sm:$0xf0]  ;;  %v5744_v19 = vld [vmem:[#allocation3 + $0x3f0] sm:$0xf]  ;;  %v5368_v24 = vld [vmem:[#allocation3 + $0x100] sm:$0xf]  ;;  %v5433_v30 = vor.u32 %v6139_v14, %v5432_v12  ;;  %v5553_v33 = vor.u32 %v6169_v16, %v5552_v15  ;;  %v6692_v45 = vpack.c.bf16 %v6654_v34, %v6654_v34 }
 0x3a4   :  { %3647 = vmatpush.bf16.msra.mxu3 %v5257_v40  ;;  %v6217_v23 = vld [vmem:[#allocation3 + $0x3f4] sm:$0xf0]  ;;  %v6123_v26 = vld [vmem:[#allocation3 + $0x104] sm:$0xf0]  ;;  %v5680_v31 = vld [vmem:[#allocation3 + $0x370] sm:$0xf]  ;;  %v5617_v35 = vor.u32 %v6185_v18, %v5616_v17 }
 0x3a5   :  { %3660 = vmatpush.bf16.msrb.mxu0 %v5321_v56  ;;  %v6201_v32 = vld [vmem:[#allocation3 + $0x374] sm:$0xf0]  ;;  %v5544_v36 = vld [vmem:[#allocation3 + $0x260] sm:$0xf]  ;;  %v5745_v37 = vor.u32 %v6217_v23, %v5744_v19  ;;  %v5369_v38 = vor.u32 %v6123_v26, %v5368_v24  ;;  %v6167_v41 = vld [vmem:[#allocation3 + $0x264] sm:$0xf0]  ;;  %v6696_v56 = vpack.c.bf16 %v6661_v21, %v6661_v21 }
 0x3a6   :  { %3686 = vmatpush.bf16.msrb.mxu2 %v5449_v58  ;;  %v5608_v46 = vld [vmem:[#allocation3 + $0x2e0] sm:$0xf]  ;;  %v6183_v39 = vld [vmem:[#allocation3 + $0x2e4] sm:$0xf0]  ;;  %v5681_v22 = vor.u32 %v6201_v32, %v5680_v31  ;;  %v5545_v52 = vor.u32 %v6167_v41, %v5544_v36  ;;  %v5536_v28 = vld [vmem:[#allocation3 + $0x250] sm:$0xf] }
 0x3a7   :  { %3673 = vmatpush.bf16.msrb.mxu1 %v5385_v62  ;;  %v5736_v48 = vld [vmem:[#allocation3 + $0x3e0] sm:$0xf]  ;;  %v6215_v47 = vld [vmem:[#allocation3 + $0x3e4] sm:$0xf0]  ;;  %v5609_v53 = vor.u32 %v6183_v39, %v5608_v46  ;;  %v6165_v54 = vld [vmem:[#allocation3 + $0x254] sm:$0xf0] }
 0x3a8   :  { %3648 = vmatpush.bf16.msra.mxu3 %v5249_v4  ;;  %v5672_v50 = vld [vmem:[#allocation3 + $0x360] sm:$0xf]  ;;  %v6199_v29 = vld [vmem:[#allocation3 + $0x364] sm:$0xf0]  ;;  %v5737_v42 = vor.u32 %v6215_v47, %v5736_v48  ;;  %v5600_v55 = vld [vmem:[#allocation3 + $0x2d0] sm:$0xf]  ;;  %v5537_v61 = vor.u32 %v6165_v54, %v5536_v28 }
 0x3a9   :  { %3661 = vmatpush.bf16.msrb.mxu0 %v5313_v7  ;;  %v6181_v40 = vld [vmem:[#allocation3 + $0x2d4] sm:$0xf0]  ;;  %v5673_v44 = vor.u32 %v6199_v29, %v5672_v50  ;;  %v5728_v58 = vld [vmem:[#allocation3 + $0x3d0] sm:$0xf]  ;;  %v5528_v63 = vld [vmem:[#allocation3 + $0x240] sm:$0xf] }
 0x3aa   :  { %3687 = vmatpush.bf16.msrb.mxu2 %v5441_v9  ;;  %v6213_v34 = vld [vmem:[#allocation3 + $0x3d4] sm:$0xf0]  ;;  %v5664_v59 = vld [vmem:[#allocation3 + $0x350] sm:$0xf]  ;;  %v5601_v62 = vor.u32 %v6181_v40, %v5600_v55  ;;  %v6163_v0 = vld [vmem:[#allocation3 + $0x244] sm:$0xf0] }
 0x3ab   :  { %3674 = vmatpush.bf16.msrb.mxu1 %v5377_v13  ;;  %v6197_v60 = vld [vmem:[#allocation3 + $0x354] sm:$0xf0]  ;;  %v5729_v21 = vor.u32 %v6213_v34, %v5728_v58  ;;  %v5592_v1 = vld [vmem:[#allocation3 + $0x2c0] sm:$0xf]  ;;  %v6179_v2 = vld [vmem:[#allocation3 + $0x2c4] sm:$0xf0]  ;;  %v5529_v9 = vor.u32 %v6163_v0, %v5528_v63 }
 0x3ac   :  { %3649 = vmatpush.bf16.msra.mxu3 %v5241_v20  ;;  %v5665_v3 = vor.u32 %v6197_v60, %v5664_v59  ;;  %v5720_v4 = vld [vmem:[#allocation3 + $0x3c0] sm:$0xf]  ;;  %v6211_v5 = vld [vmem:[#allocation3 + $0x3c4] sm:$0xf0]  ;;  %v5593_v10 = vor.u32 %v6179_v2, %v5592_v1  ;;  %v5520_v11 = vld [vmem:[#allocation3 + $0x230] sm:$0xf] }
 0x3ad   :  { %3662 = vmatpush.bf16.msrb.mxu0 %v5305_v27  ;;  %v5656_v6 = vld [vmem:[#allocation3 + $0x340] sm:$0xf]  ;;  %v6195_v7 = vld [vmem:[#allocation3 + $0x344] sm:$0xf0]  ;;  %v5721_v12 = vor.u32 %v6211_v5, %v5720_v4  ;;  %v6161_v13 = vld [vmem:[#allocation3 + $0x234] sm:$0xf0] }
 0x3ae   :  { %3688 = vmatpush.bf16.msrb.mxu2 %v5433_v30  ;;  %v5584_v14 = vld [vmem:[#allocation3 + $0x2b0] sm:$0xf]  ;;  %v6177_v15 = vld [vmem:[#allocation3 + $0x2b4] sm:$0xf0]  ;;  %v5657_v16 = vor.u32 %v6195_v7, %v5656_v6  ;;  %v5521_v23 = vor.u32 %v6161_v13, %v5520_v11  ;;  %v5512_v26 = vld [vmem:[#allocation3 + $0x220] sm:$0xf] }
 0x3af   :  { %3675 = vmatpush.bf16.msrb.mxu1 %v5369_v38  ;;  %3650 = vmatmul.bf16.vlgmr.msra.gmra.mxu3 %v6684_v49  ;;  %v5712_v17 = vld [vmem:[#allocation3 + $0x3b0] sm:$0xf]  ;;  %v6209_v18 = vld [vmem:[#allocation3 + $0x3b4] sm:$0xf0]  ;;  %v5585_v24 = vor.u32 %v6177_v15, %v5584_v14  ;;  %v6159_v30 = vld [vmem:[#allocation3 + $0x224] sm:$0xf0] }
 0x3b0   :  { %3694 = vmatpush.bf16.msrb.mxu3 %v5553_v33  ;;  %3663 = vmatmul.bf16.vlgmr.msrb.gmra.mxu0 %v6692_v45  ;;  %v5648_v19 = vld [vmem:[#allocation3 + $0x330] sm:$0xf]  ;;  %v6193_v20 = vld [vmem:[#allocation3 + $0x334] sm:$0xf0]  ;;  %v5713_v27 = vor.u32 %v6209_v18, %v5712_v17  ;;  %v5576_v31 = vld [vmem:[#allocation3 + $0x2a0] sm:$0xf]  ;;  %v5513_v41 = vor.u32 %v6159_v30, %v5512_v26 }
 0x3b1   :  { %3707 = vmatpush.bf16.msra.mxu0 %v5617_v35  ;;  %3689 = vmatmul.bf16.vlgmr.msrb.gmra.mxu2 %v6688_v51  ;;  %v6175_v32 = vld [vmem:[#allocation3 + $0x2a4] sm:$0xf0]  ;;  %v5649_v33 = vor.u32 %v6193_v20, %v5648_v19  ;;  %v5704_v35 = vld [vmem:[#allocation3 + $0x3a0] sm:$0xf]  ;;  %v5504_v39 = vld [vmem:[#allocation3 + $0x210] sm:$0xf] }
 0x3b2   :  { %3733 = vmatpush.bf16.msra.mxu2 %v5745_v37  ;;  %3676 = vmatmul.bf16.vlgmr.msrb.gmra.mxu1 %v6696_v56  ;;  %v6207_v36 = vld [vmem:[#allocation3 + $0x3a4] sm:$0xf0]  ;;  %v5640_v37 = vld [vmem:[#allocation3 + $0x320] sm:$0xf]  ;;  %v5577_v46 = vor.u32 %v6175_v32, %v5576_v31  ;;  %v6157_v48 = vld [vmem:[#allocation3 + $0x214] sm:$0xf0] }
 0x3b3   :  { %3720 = vmatpush.bf16.msra.mxu1 %v5681_v22  ;;  %v6191_v38 = vld [vmem:[#allocation3 + $0x324] sm:$0xf0]  ;;  %v5705_v22 = vor.u32 %v6207_v36, %v5704_v35  ;;  %v5568_v47 = vld [vmem:[#allocation3 + $0x290] sm:$0xf]  ;;  %v6173_v50 = vld [vmem:[#allocation3 + $0x294] sm:$0xf0]  ;;  %v5505_v54 = vor.u32 %v6157_v48, %v5504_v39  ;;  %v6717_v39 = vpack.c.bf16 %v6677_v25, %v6677_v25 }
 0x3b4   :  { %3695 = vmatpush.bf16.msrb.mxu3 %v5545_v52  ;;  %v5641_v29 = vor.u32 %v6191_v38, %v5640_v37  ;;  %v5696_v52 = vld [vmem:[#allocation3 + $0x390] sm:$0xf]  ;;  %v5569_v55 = vor.u32 %v6173_v50, %v5568_v47  ;;  %v5496_v40 = vld [vmem:[#allocation3 + $0x200] sm:$0xf]  ;;  %v6171_v59 = vld [vmem:[#allocation3 + $0x284] sm:$0xf0] }
 0x3b5   :  { %3708 = vmatpush.bf16.msra.mxu0 %v5609_v53  ;;  %v6205_v53 = vld [vmem:[#allocation3 + $0x394] sm:$0xf0]  ;;  %v5632_v28 = vld [vmem:[#allocation3 + $0x310] sm:$0xf]  ;;  %v5560_v58 = vld [vmem:[#allocation3 + $0x280] sm:$0xf] }
 0x3b6   :  { %3734 = vmatpush.bf16.msra.mxu2 %v5737_v42  ;;  %v6189_v42 = vld [vmem:[#allocation3 + $0x314] sm:$0xf0]  ;;  %v5697_v34 = vor.u32 %v6205_v53, %v5696_v52  ;;  %v5688_v60 = vld [vmem:[#allocation3 + $0x380] sm:$0xf]  ;;  %v6104_v63 = vld [vmem:[#allocation3 + $0x74] sm:$0xf]  ;;  %v5561_v5 = vor.u32 %v6171_v59, %v5560_v58 }
 0x3b7   :  { %3721 = vmatpush.bf16.msra.mxu1 %v5673_v44  ;;  %v6155_v44 = vld [vmem:[#allocation3 + $0x204] sm:$0xf0]  ;;  %v6120_v0 = vld [vmem:[#allocation3 + $0xf4] sm:$0xf]  ;;  %v5362_v1 = vld [vmem:[#allocation3 + $0xf8] sm:$0xf0] }
 0x3b8   :  { %3696 = vmatpush.bf16.msrb.mxu3 %v5537_v61  ;;  %v6203_v61 = vld [vmem:[#allocation3 + $0x384] sm:$0xf0]  ;;  %v6152_v2 = vld [vmem:[#allocation3 + $0x1f4] sm:$0xf]  ;;  %v5497_v4 = vor.u32 %v6155_v44, %v5496_v40  ;;  %v5624_v6 = vld [vmem:[#allocation3 + $0x300] sm:$0xf]  ;;  %v5365_v13 = vor.u32 %v6120_v0, %v5362_v1 }
 0x3b9   :  { %3709 = vmatpush.bf16.msra.mxu0 %v5601_v62  ;;  %v5633_v62 = vor.u32 %v6189_v42, %v5632_v28  ;;  %v6187_v7 = vld [vmem:[#allocation3 + $0x304] sm:$0xf0]  ;;  %v6136_v11 = vld [vmem:[#allocation3 + $0x174] sm:$0xf]  ;;  %v6102_v15 = vld [vmem:[#allocation3 + $0x64] sm:$0xf] }
 0x3ba   :  { %3735 = vmatpush.bf16.msra.mxu2 %v5729_v21  ;;  %v5298_v21 = vld [vmem:[#allocation3 + $0x78] sm:$0xf0]  ;;  %v6118_v17 = vld [vmem:[#allocation3 + $0xe4] sm:$0xf]  ;;  %v5625_v18 = vor.u32 %v6187_v7, %v5624_v6  ;;  %v5354_v19 = vld [vmem:[#allocation3 + $0xe8] sm:$0xf0] }
 0x3bb   :  { %3722 = vmatpush.bf16.msra.mxu1 %v5665_v3  ;;  %v5490_v3 = vld [vmem:[#allocation3 + $0x1f8] sm:$0xf0]  ;;  %v6150_v20 = vld [vmem:[#allocation3 + $0x1e4] sm:$0xf]  ;;  %v5418_v32 = vld [vmem:[#allocation3 + $0x168] sm:$0xf0] }
 0x3bc   :  { %3697 = vmatpush.bf16.msrb.mxu3 %v5529_v9  ;;  %v5689_v9 = vor.u32 %v6203_v61, %v5688_v60  ;;  %v5493_v14 = vor.u32 %v6152_v2, %v5490_v3  ;;  %v6134_v31 = vld [vmem:[#allocation3 + $0x164] sm:$0xf]  ;;  %v6100_v36 = vld [vmem:[#allocation3 + $0x54] sm:$0xf]  ;;  %v5282_v37 = vld [vmem:[#allocation3 + $0x58] sm:$0xf0] }
 0x3bd   :  { %3710 = vmatpush.bf16.msra.mxu0 %v5593_v10  ;;  %v5301_v10 = vor.u32 %v6104_v63, %v5298_v21  ;;  %v6116_v38 = vld [vmem:[#allocation3 + $0xd4] sm:$0xf]  ;;  %v5410_v47 = vld [vmem:[#allocation3 + $0x158] sm:$0xf0]  ;;  %v6098_v52 = vld [vmem:[#allocation3 + $0x44] sm:$0xf] }
 0x3be   :  { %3736 = vmatpush.bf16.msra.mxu2 %v5721_v12  ;;  %v5426_v12 = vld [vmem:[#allocation3 + $0x178] sm:$0xf0]  ;;  %v6132_v48 = vld [vmem:[#allocation3 + $0x154] sm:$0xf]  ;;  %v5274_v53 = vld [vmem:[#allocation3 + $0x48] sm:$0xf0] }
 0x3bf   :  { %3723 = vmatpush.bf16.msra.mxu1 %v5657_v16  ;;  %v5290_v16 = vld [vmem:[#allocation3 + $0x68] sm:$0xf0]  ;;  %v5429_v26 = vor.u32 %v6136_v11, %v5426_v12  ;;  %v6114_v28 = vld [vmem:[#allocation3 + $0xc4] sm:$0xf]  ;;  %v5277_v40 = vor.u32 %v6098_v52, %v5274_v53  ;;  %v6096_v60 = vld [vmem:[#allocation3 + $0x34] sm:$0xf] }
 0x3c0   :  { %3698 = vmatpush.bf16.msrb.mxu3 %v5521_v23  ;;  %v5482_v23 = vld [vmem:[#allocation3 + $0x1e8] sm:$0xf0]  ;;  %v5293_v30 = vor.u32 %v6102_v15, %v5290_v16  ;;  %v6146_v25 = vld [vmem:[#allocation3 + $0x1c4] sm:$0xf]  ;;  %v5266_v61 = vld [vmem:[#allocation3 + $0x38] sm:$0xf0] }
 0x3c1   :  { %3711 = vmatpush.bf16.msra.mxu0 %v5585_v24  ;;  %v6704_v24 = vpack.c.bf16 %v6671_v57, %v6671_v57  ;;  %v5357_v57 = vor.u32 %v6118_v17, %v5354_v19  ;;  %v5485_v35 = vor.u32 %v6150_v20, %v5482_v23  ;;  %v5338_v42 = vld [vmem:[#allocation3 + $0xc8] sm:$0xf0]  ;;  %v6130_v44 = vld [vmem:[#allocation3 + $0x144] sm:$0xf]  ;;  %v5330_v63 = vld [vmem:[#allocation3 + $0xb8] sm:$0xf0]  ;;  %v5269_v2 = vor.u32 %v6096_v60, %v5266_v61 }
 0x3c2   :  { %3737 = vmatpush.bf16.msra.mxu2 %v5713_v27  ;;  %v6708_v27 = vpack.c.bf16 %v6680_v43, %v6680_v43  ;;  %v5346_v43 = vld [vmem:[#allocation3 + $0xd8] sm:$0xf0]  ;;  %v5402_v58 = vld [vmem:[#allocation3 + $0x148] sm:$0xf0]  ;;  %v6144_v21 = vld [vmem:[#allocation3 + $0x1b4] sm:$0xf] }
 0x3c3   :  { %3724 = vmatpush.bf16.msra.mxu1 %v5649_v33  ;;  %v6712_v33 = vpack.c.bf16 %v6674_v8, %v6674_v8  ;;  %v5421_v8 = vor.u32 %v6134_v31, %v5418_v32  ;;  %v5349_v50 = vor.u32 %v6116_v38, %v5346_v43  ;;  %v5458_v0 = vld [vmem:[#allocation3 + $0x1b8] sm:$0xf0]  ;;  %v5405_v1 = vor.u32 %v6130_v44, %v5402_v58  ;;  %v6128_v3 = vld [vmem:[#allocation3 + $0x134] sm:$0xf]  ;;  %v6094_v7 = vld [vmem:[#allocation3 + $0x24] sm:$0xf] }
 0x3c4   :  { %3699 = vmatpush.bf16.msrb.mxu3 %v5513_v41  ;;  %v6148_v41 = vld [vmem:[#allocation3 + $0x1d4] sm:$0xf]  ;;  %v5461_v6 = vor.u32 %v6144_v21, %v5458_v0  ;;  %v5322_v11 = vld [vmem:[#allocation3 + $0xa8] sm:$0xf0]  ;;  %v6142_v12 = vld [vmem:[#allocation3 + $0x1a4] sm:$0xf] }
 0x3c5   :  { %3712 = vmatpush.bf16.msra.mxu0 %v5577_v46  ;;  %v5474_v46 = vld [vmem:[#allocation3 + $0x1d8] sm:$0xf0]  ;;  %v6126_v16 = vld [vmem:[#allocation3 + $0x124] sm:$0xf]  ;;  %v5386_v17 = vld [vmem:[#allocation3 + $0x128] sm:$0xf0] }
 0x3c6   :  { %3738 = vmatpush.bf16.msra.mxu2 %v5705_v22  ;;  %v5285_v22 = vor.u32 %v6100_v36, %v5282_v37  ;;  %v6092_v20 = vld [vmem:[#allocation3 + $0x14] sm:$0xf]  ;;  %v5250_v23 = vld [vmem:[#allocation3 + $0x18] sm:$0xf0]  ;;  %v6090_v38 = vld [vmem:[#allocation3 + $0x4] sm:$0xf] }
 0x3c7   :  { %3725 = vmatpush.bf16.msra.mxu1 %v5641_v29  ;;  %v5477_v29 = vor.u32 %v6148_v41, %v5474_v46  ;;  %v6140_v31 = vld [vmem:[#allocation3 + $0x194] sm:$0xf]  ;;  %v5442_v32 = vld [vmem:[#allocation3 + $0x198] sm:$0xf0]  ;;  %v5253_v36 = vor.u32 %v6092_v20, %v5250_v23  ;;  %v5242_v43 = vld [vmem:[#allocation3 + $0x8] sm:$0xf0] }
 0x3c8   :  { %3700 = vmatpush.bf16.msrb.mxu3 %v5505_v54  ;;  %v5466_v54 = vld [vmem:[#allocation3 + $0x1c8] sm:$0xf0]  ;;  %v5378_v37 = vld [vmem:[#allocation3 + $0x118] sm:$0xf0]  ;;  %v5445_v46 = vor.u32 %v6140_v31, %v5442_v32  ;;  %v6184_v53 = vld [vmem:[#allocation3 + $0x2f4] sm:$0xf] }
 0x3c9   :  { %3713 = vmatpush.bf16.msra.mxu0 %v5569_v55  ;;  %v5413_v55 = vor.u32 %v6132_v48, %v5410_v47  ;;  %v5469_v59 = vor.u32 %v6146_v25, %v5466_v54  ;;  %v6138_v48 = vld [vmem:[#allocation3 + $0x184] sm:$0xf]  ;;  %v5434_v47 = vld [vmem:[#allocation3 + $0x188] sm:$0xf0]  ;;  %v5245_v25 = vor.u32 %v6090_v38, %v5242_v43  ;;  %v5746_v54 = vld [vmem:[#allocation3 + $0x3f8] sm:$0xf0] }
 0x3ca   :  { %3739 = vmatpush.bf16.msra.mxu2 %v5697_v34  ;;  %v5341_v34 = vor.u32 %v6114_v28, %v5338_v42  ;;  %v5618_v28 = vld [vmem:[#allocation3 + $0x2f8] sm:$0xf0]  ;;  %v6216_v42 = vld [vmem:[#allocation3 + $0x3f4] sm:$0xf]  ;;  %v5437_v58 = vor.u32 %v6138_v48, %v5434_v47  ;;  %v5546_v0 = vld [vmem:[#allocation3 + $0x268] sm:$0xf0] }
 0x3cb   :  { %3726 = vmatpush.bf16.msra.mxu1 %v5633_v62  ;;  %v6112_v62 = vld [vmem:[#allocation3 + $0xb4] sm:$0xf]  ;;  %v5621_v61 = vor.u32 %v6184_v53, %v5618_v28  ;;  %v5666_v20 = vld [vmem:[#allocation3 + $0x358] sm:$0xf0]  ;;  %v5530_v32 = vld [vmem:[#allocation3 + $0x248] sm:$0xf0] }
 0x3cc   :  { %3701 = vmatpush.bf16.msrb.mxu3 %v5497_v4  ;;  %v5394_v4 = vld [vmem:[#allocation3 + $0x138] sm:$0xf0]  ;;  %v6194_v38 = vld [vmem:[#allocation3 + $0x344] sm:$0xf]  ;;  %vm3855_vm1 = vcmask 1040384  }
 0x3cd   :  { %3714 = vmatpush.bf16.msra.mxu0 %v5561_v5  ;;  %v5333_v5 = vor.u32 %v6112_v62, %v5330_v63  ;;  %v6166_v62 = vld [vmem:[#allocation3 + $0x264] sm:$0xf]  ;;  %v5749_v63 = vor.u32 %v6216_v42, %v5746_v54  ;;  %v5586_v48 = vld [vmem:[#allocation3 + $0x2b8] sm:$0xf0]  ;;  %v5514_v54 = vld [vmem:[#allocation3 + $0x228] sm:$0xf0] }
 0x3ce   :  { %3740 = vmatpush.bf16.msra.mxu2 %v5689_v9  ;;  %v5258_v9 = vld [vmem:[#allocation3 + $0x28] sm:$0xf0]  ;;  %v6158_v42 = vld [vmem:[#allocation3 + $0x224] sm:$0xf] }
 0x3cf   :  { %3727 = vmatpush.bf16.msra.mxu1 %v5625_v18  ;;  %3702 = vmatmul.bf16.vlgmr.msrb.gmra.mxu3 %v6704_v24  ;;  %v5261_v15 = vor.u32 %v6094_v7, %v5258_v9  ;;  %v5674_v7 = vld [vmem:[#allocation3 + $0x368] sm:$0xf0]  ;;  %v5549_v9 = vor.u32 %v6166_v62, %v5546_v0  ;;  %v5506_v0 = vld [vmem:[#allocation3 + $0x218] sm:$0xf0] }
 0x3d0   :  { %3746 = vmatpush.bf16.msra.mxu3 %v5301_v10  ;;  %3715 = vmatmul.bf16.vlgmr.msra.gmra.mxu0 %v6712_v33  ;;  %v6110_v10 = vld [vmem:[#allocation3 + $0xa4] sm:$0xf] }
 0x3d1   :  { %3759 = vmatpush.bf16.msrb.mxu0 %v5365_v13  ;;  %3741 = vmatmul.bf16.vlgmr.msra.gmra.mxu2 %v6708_v27  ;;  %v5450_v13 = vld [vmem:[#allocation3 + $0x1a8] sm:$0xf0]  ;;  %v5325_v18 = vor.u32 %v6110_v10, %v5322_v11  ;;  %v6164_v11 = vld [vmem:[#allocation3 + $0x254] sm:$0xf] }
 0x3d2   :  { %3785 = vmatpush.bf16.msrb.mxu2 %v5493_v14  ;;  %3728 = vmatmul.bf16.vlgmr.msra.gmra.mxu1 %v6717_v39  ;;  %v5397_v14 = vor.u32 %v6128_v3, %v5394_v4  ;;  %v5453_v19 = vor.u32 %v6142_v12, %v5450_v13  ;;  %v6214_v4 = vld [vmem:[#allocation3 + $0x3e4] sm:$0xf]  ;;  %v5538_v13 = vld [vmem:[#allocation3 + $0x258] sm:$0xf0] }
 0x3d3   :  { %3772 = vmatpush.bf16.msrb.mxu1 %v5429_v26  ;;  %v6108_v26 = vld [vmem:[#allocation3 + $0x94] sm:$0xf]  ;;  %v5541_v23 = vor.u32 %v6164_v11, %v5538_v13  ;;  %v6154_v11 = vld [vmem:[#allocation3 + $0x204] sm:$0xf]  ;;  %v5498_v13 = vld [vmem:[#allocation3 + $0x208] sm:$0xf0] }
 0x3d4   :  { %3747 = vmatpush.bf16.msra.mxu3 %v5293_v30  ;;  %v5314_v30 = vld [vmem:[#allocation3 + $0x98] sm:$0xf0] }
 0x3d5   :  { %3760 = vmatpush.bf16.msrb.mxu0 %v5357_v57  ;;  %v5389_v57 = vor.u32 %v6126_v16, %v5386_v17  ;;  %v5317_v41 = vor.u32 %v6108_v26, %v5314_v30  ;;  %v6212_v17 = vld [vmem:[#allocation3 + $0x3d4] sm:$0xf]  ;;  %v6162_v30 = vld [vmem:[#allocation3 + $0x244] sm:$0xf] }
 0x3d6   :  { %3786 = vmatpush.bf16.msrb.mxu2 %v5485_v35  ;;  %v6124_v35 = vld [vmem:[#allocation3 + $0x114] sm:$0xf] }
 0x3d7   :  { %3773 = vmatpush.bf16.msrb.mxu1 %v5421_v8  ;;  %v6106_v8 = vld [vmem:[#allocation3 + $0x84] sm:$0xf]  ;;  %v5381_v52 = vor.u32 %v6124_v35, %v5378_v37  ;;  %v5594_v35 = vld [vmem:[#allocation3 + $0x2c8] sm:$0xf0] }
 0x3d8   :  { %3748 = vmatpush.bf16.msra.mxu3 %v5285_v22  ;;  %v5306_v22 = vld [vmem:[#allocation3 + $0x88] sm:$0xf0] }
 0x3d9   :  { %3761 = vmatpush.bf16.msrb.mxu0 %v5349_v50  ;;  %v6168_v50 = vld [vmem:[#allocation3 + $0x274] sm:$0xf]  ;;  %v5309_v44 = vor.u32 %v6106_v8, %v5306_v22  ;;  %v5722_v37 = vld [vmem:[#allocation3 + $0x3c8] sm:$0xf0]  ;;  %v5522_v8 = vld [vmem:[#allocation3 + $0x238] sm:$0xf0] }
 0x3da   :  { %3787 = vmatpush.bf16.msrb.mxu2 %v5477_v29  ;;  %v5554_v29 = vld [vmem:[#allocation3 + $0x278] sm:$0xf0]  ;;  %v6176_v22 = vld [vmem:[#allocation3 + $0x2b4] sm:$0xf] }
 0x3db   :  { %3774 = vmatpush.bf16.msrb.mxu1 %v5413_v55  ;;  %v6122_v55 = vld [vmem:[#allocation3 + $0x104] sm:$0xf]  ;;  %v5557_v60 = vor.u32 %v6168_v50, %v5554_v29  ;;  %v6208_v50 = vld [vmem:[#allocation3 + $0x3b4] sm:$0xf]  ;;  %v5589_v28 = vor.u32 %v6176_v22, %v5586_v48 }
 0x3dc   :  { %3749 = vmatpush.bf16.msra.mxu3 %v5277_v40  ;;  %v5370_v40 = vld [vmem:[#allocation3 + $0x108] sm:$0xf0]  ;;  %v6192_v29 = vld [vmem:[#allocation3 + $0x334] sm:$0xf] }
 0x3dd   :  { %3762 = vmatpush.bf16.msrb.mxu0 %v5341_v34  ;;  %v6200_v34 = vld [vmem:[#allocation3 + $0x374] sm:$0xf]  ;;  %v5373_v21 = vor.u32 %v6122_v55, %v5370_v40  ;;  %v6174_v55 = vld [vmem:[#allocation3 + $0x2a4] sm:$0xf]  ;;  %v5578_v40 = vld [vmem:[#allocation3 + $0x2a8] sm:$0xf0] }
 0x3de   :  { %3788 = vmatpush.bf16.msrb.mxu2 %v5469_v59  ;;  %v5682_v59 = vld [vmem:[#allocation3 + $0x378] sm:$0xf0]  ;;  %v5581_v62 = vor.u32 %v6174_v55, %v5578_v40 }
 0x3df   :  { %3775 = vmatpush.bf16.msrb.mxu1 %v5405_v1  ;;  %v6182_v1 = vld [vmem:[#allocation3 + $0x2e4] sm:$0xf]  ;;  %v5685_v3 = vor.u32 %v6200_v34, %v5682_v59  ;;  %v5706_v34 = vld [vmem:[#allocation3 + $0x3a8] sm:$0xf0] }
 0x3e0   :  { %3750 = vmatpush.bf16.msra.mxu3 %v5269_v2  ;;  %v5610_v2 = vld [vmem:[#allocation3 + $0x2e8] sm:$0xf0]  ;;  %v6190_v59 = vld [vmem:[#allocation3 + $0x324] sm:$0xf] }
 0x3e1   :  { %3763 = vmatpush.bf16.msrb.mxu0 %v5333_v5  ;;  %v5738_v5 = vld [vmem:[#allocation3 + $0x3e8] sm:$0xf0]  ;;  %v5613_v10 = vor.u32 %v6182_v1, %v5610_v2  ;;  %v6172_v1 = vld [vmem:[#allocation3 + $0x294] sm:$0xf]  ;;  %v5570_v2 = vld [vmem:[#allocation3 + $0x298] sm:$0xf0] }
 0x3e2   :  { %3789 = vmatpush.bf16.msrb.mxu2 %v5461_v6  ;;  %v6198_v6 = vld [vmem:[#allocation3 + $0x364] sm:$0xf]  ;;  %v5741_v12 = vor.u32 %v6214_v4, %v5738_v5  ;;  %v6204_v4 = vld [vmem:[#allocation3 + $0x394] sm:$0xf]  ;;  %v5698_v5 = vld [vmem:[#allocation3 + $0x398] sm:$0xf0] }
 0x3e3   :  { %3776 = vmatpush.bf16.msrb.mxu1 %v5397_v14  ;;  %v6180_v14 = vld [vmem:[#allocation3 + $0x2d4] sm:$0xf]  ;;  %v5677_v16 = vor.u32 %v6198_v6, %v5674_v7  ;;  %v5634_v7 = vld [vmem:[#allocation3 + $0x318] sm:$0xf0] }
 0x3e4   :  { %3751 = vmatpush.bf16.msra.mxu3 %v5261_v15  ;;  %v5602_v15 = vld [vmem:[#allocation3 + $0x2d8] sm:$0xf0]  ;;  %v6188_v6 = vld [vmem:[#allocation3 + $0x314] sm:$0xf] }
 0x3e5   :  { %3764 = vmatpush.bf16.msrb.mxu0 %v5325_v18  ;;  %v5730_v18 = vld [vmem:[#allocation3 + $0x3d8] sm:$0xf0]  ;;  %v5605_v26 = vor.u32 %v6180_v14, %v5602_v15  ;;  %v6170_v14 = vld [vmem:[#allocation3 + $0x284] sm:$0xf]  ;;  %v5562_v15 = vld [vmem:[#allocation3 + $0x288] sm:$0xf0] }
 0x3e6   :  { %3790 = vmatpush.bf16.msrb.mxu2 %v5453_v19  ;;  %v6196_v19 = vld [vmem:[#allocation3 + $0x354] sm:$0xf]  ;;  %v5733_v31 = vor.u32 %v6212_v17, %v5730_v18  ;;  %v6202_v17 = vld [vmem:[#allocation3 + $0x384] sm:$0xf]  ;;  %v5690_v18 = vld [vmem:[#allocation3 + $0x388] sm:$0xf0] }
 0x3e7   :  { %3777 = vmatpush.bf16.msrb.mxu1 %v5389_v57  ;;  %v6178_v57 = vld [vmem:[#allocation3 + $0x2c4] sm:$0xf] }
 0x3e8   :  { %3752 = vmatpush.bf16.msra.mxu3 %v5253_v36  ;;  %v6210_v36 = vld [vmem:[#allocation3 + $0x3c4] sm:$0xf]  ;;  %v5597_v43 = vor.u32 %v6178_v57, %v5594_v35 }
 0x3e9   :  { %3765 = vmatpush.bf16.msrb.mxu0 %v5317_v41  ;;  %v6160_v41 = vld [vmem:[#allocation3 + $0x234] sm:$0xf] }
 0x3ea   :  { %3791 = vmatpush.bf16.msrb.mxu2 %v5445_v46  ;;  %v5725_v46 = vor.u32 %v6210_v36, %v5722_v37  ;;  %v5525_v53 = vor.u32 %v6160_v41, %v5522_v8 }
 0x3eb   :  { %3778 = vmatpush.bf16.msrb.mxu1 %v5381_v52  ;;  %v5650_v52 = vld [vmem:[#allocation3 + $0x338] sm:$0xf0] }
 0x3ec   :  { %3753 = vmatpush.bf16.msra.mxu3 %v5245_v25 }
 0x3ed   :  { %3766 = vmatpush.bf16.msrb.mxu0 %v5309_v44  ;;  %v5653_v44 = vor.u32 %v6192_v29, %v5650_v52 }
 0x3ee   :  { %3792 = vmatpush.bf16.msrb.mxu2 %v5437_v58  ;;  %v6206_v58 = vld [vmem:[#allocation3 + $0x3a4] sm:$0xf] }
 0x3ef   :  { %3779 = vmatpush.bf16.msrb.mxu1 %v5373_v21  ;;  %3754 = vmatmul.bf16.vlgmr.msra.gmra.mxu3 %v6684_v49  ;;  %v5669_v49 = vor.u32 %v6196_v19, %v5666_v20  ;;  %v5709_v21 = vor.u32 %v6206_v58, %v5706_v34  ;;  %v6186_v19 = vld [vmem:[#allocation3 + $0x304] sm:$0xf]  ;;  %v5626_v20 = vld [vmem:[#allocation3 + $0x308] sm:$0xf0] }
 0x3f0   :  { %3798 = vmatpush.bf16.msrb.mxu3 %v5557_v60  ;;  %3767 = vmatmul.bf16.vlgmr.msrb.gmra.mxu0 %v6692_v45  ;;  %v5533_v45 = vor.u32 %v6162_v30, %v5530_v32  ;;  %v5642_v60 = vld [vmem:[#allocation3 + $0x328] sm:$0xf0]  ;;  %v5693_v30 = vor.u32 %v6202_v17, %v5690_v18  ;;  %v2988_v32 = vld [vmem:[%s6746_s10] sm:$0x3] }
 0x3f1   :  { %3811 = vmatpush.bf16.msra.mxu0 %v5621_v61  ;;  %3793 = vmatmul.bf16.vlgmr.msrb.gmra.mxu2 %v6688_v51  ;;  %v5658_v51 = vld [vmem:[#allocation3 + $0x348] sm:$0xf0]  ;;  %v5517_v61 = vor.u32 %v6158_v42, %v5514_v54  ;;  %v2998_v35 = vperm.slane %v2988_v32, 0 }
 0x3f2   :  { %3837 = vmatpush.bf16.msra.mxu2 %v5749_v63  ;;  %3780 = vmatmul.bf16.vlgmr.msrb.gmra.mxu1 %v6696_v56  ;;  %v5661_v47 = vor.u32 %v6194_v38, %v5658_v51  ;;  %v5714_v56 = vld [vmem:[#allocation3 + $0x3b8] sm:$0xf0]  ;;  %v6156_v63 = vld [vmem:[#allocation3 + $0x214] sm:$0xf] }
 0x3f3   :  { %3824 = vmatpush.bf16.msra.mxu1 %v5685_v3  ;;  %v5717_v25 = vor.u32 %v6208_v50, %v5714_v56  ;;  %v5645_v3 = vor.u32 %v6190_v59, %v5642_v60  ;;  %v2999_v59 = vperm.slane %v2988_v32, 1 }
 0x3f4   :  { %3799 = vmatpush.bf16.msrb.mxu3 %v5549_v9  ;;  %v5509_v9 = vor.u32 %v6156_v63, %v5506_v0 }
 0x3f5   :  { %3812 = vmatpush.bf16.msra.mxu0 %v5613_v10  ;;  %v5573_v10 = vor.u32 %v6172_v1, %v5570_v2 }
 0x3f6   :  { %3838 = vmatpush.bf16.msra.mxu2 %v5741_v12  ;;  %v5701_v12 = vor.u32 %v6204_v4, %v5698_v5 }
 0x3f7   :  { %3825 = vmatpush.bf16.msra.mxu1 %v5677_v16  ;;  %v5637_v16 = vor.u32 %v6188_v6, %v5634_v7 }
 0x3f8   :  { %3800 = vmatpush.bf16.msrb.mxu3 %v5541_v23  ;;  %v5501_v23 = vor.u32 %v6154_v11, %v5498_v13 }
 0x3f9   :  { %3813 = vmatpush.bf16.msra.mxu0 %v5605_v26  ;;  %v5565_v26 = vor.u32 %v6170_v14, %v5562_v15 }
 0x3fa   :  { %3839 = vmatpush.bf16.msra.mxu2 %v5733_v31  ;;  %v5629_v31 = vor.u32 %v6186_v19, %v5626_v20 }
 0x3fb   :  { %3826 = vmatpush.bf16.msra.mxu1 %v5669_v49 }
 0x3fc   :  { %3801 = vmatpush.bf16.msrb.mxu3 %v5533_v45 }
 0x3fd   :  { %3814 = vmatpush.bf16.msra.mxu0 %v5597_v43 }
 0x3fe   :  { %3840 = vmatpush.bf16.msra.mxu2 %v5725_v46 }
 0x3ff   :  { %3827 = vmatpush.bf16.msra.mxu1 %v5661_v47 }
 0x400   :  { %3802 = vmatpush.bf16.msrb.mxu3 %v5525_v53 }
 0x401   :  { %3815 = vmatpush.bf16.msra.mxu0 %v5589_v28 }
 0x402   :  { %3841 = vmatpush.bf16.msra.mxu2 %v5717_v25 }
 0x403   :  { %3828 = vmatpush.bf16.msra.mxu1 %v5653_v44 }
 0x404   :  { %3803 = vmatpush.bf16.msrb.mxu3 %v5517_v61 }
 0x405   :  { %3816 = vmatpush.bf16.msra.mxu0 %v5581_v62 }
 0x406   :  { %3842 = vmatpush.bf16.msra.mxu2 %v5709_v21 }
 0x407   :  { %3829 = vmatpush.bf16.msra.mxu1 %v5645_v3 }
 0x408   :  { %3804 = vmatpush.bf16.msrb.mxu3 %v5509_v9 }
 0x409   :  { %3817 = vmatpush.bf16.msra.mxu0 %v5573_v10 }
 0x40a   :  { %3843 = vmatpush.bf16.msra.mxu2 %v5701_v12  ;;  %v3858_v12 = vlaneseq }
 0x40b   :  { %3830 = vmatpush.bf16.msra.mxu1 %v5637_v16 }
 0x40c   :  { %3805 = vmatpush.bf16.msrb.mxu3 %v5501_v23  ;;  %vm3860_vm2 = vcmp.lt.s32.totalorder %v3858_v12, 256 }
 0x40d   :  { %3818 = vmatpush.bf16.msra.mxu0 %v5565_v26 }
 0x40e   :  { %3844 = vmatpush.bf16.msra.mxu2 %v5693_v30 }
 0x40f   :  { %3831 = vmatpush.bf16.msra.mxu1 %v5629_v31  ;;  %3806 = vmatmul.bf16.vlgmr.msrb.gmra.mxu3 %v6704_v24 }
 0x410   :  { %3819 = vmatmul.bf16.vlgmr.msra.gmra.mxu0 %v6712_v33 }
 0x411   :  { %3845 = vmatmul.bf16.vlgmr.msra.gmra.mxu2 %v6708_v27 }
 0x412   :  { %3832 = vmatmul.bf16.vlgmr.msra.gmra.mxu1 %v6717_v39 }
 0x42d   :  { %v3664_v57 = vpop.f32.mrf.mxu0 }
 0x42f   :  { %v3677_v49 = vpop.f32.mrf.mxu1 }
 0x432   :  { %v3651_v36 = vpop.f32.mrf.mxu3 }
 0x433   :  { %v3652_v37 = vadd.f32 %v3651_v36, %v2998_v35 }
 0x434   :  { %v3690_v38 = vpop.f32.mrf.mxu2 }
 0x435   :  { %v3665_v51 = vadd.f32 %v3664_v57, %v3652_v37  ;;  %v3666_v45 = vpop.f32.mrf.mxu0 }
 0x437   :  { %v3678_v43 = vadd.f32 %v3677_v49, %v3665_v51  ;;  %v3679_v24 = vpop.f32.mrf.mxu1 }
 0x439   :  { %v3691_v41 = vadd.f32 %v3690_v38, %v3678_v43 }
 0x43a   :  { %v3653_v33 = vpop.f32.mrf.mxu3 }
 0x43c   :  { %v3692_v46 = vpop.f32.mrf.mxu2 }
 0x44d   :  { %v3716_v27 = vpop.f32.mrf.mxu0 }
 0x44f   :  { %v3729_v8 = vpop.f32.mrf.mxu1 }
 0x452   :  { %v3703_v39 = vpop.f32.mrf.mxu3 }
 0x453   :  { %v3704_v22 = vadd.f32 %v3703_v39, %v3691_v41 }
 0x454   :  { %v3742_v48 = vpop.f32.mrf.mxu2 }
 0x455   :  { %v3717_v47 = vadd.f32 %v3716_v27, %v3704_v22  ;;  %v3718_v50 = vpop.f32.mrf.mxu0 }
 0x457   :  { %v3730_v56 = vadd.f32 %v3729_v8, %v3717_v47  ;;  %v3731_v29 = vpop.f32.mrf.mxu1 }
 0x459   :  { %v3743_v52 = vadd.f32 %v3742_v48, %v3730_v56 }
 0x45a   :  { %v3705_v53 = vpop.f32.mrf.mxu3 }
 0x45c   :  { %v3744_v28 = vpop.f32.mrf.mxu2 }
 0x46d   :  { %v3768_v42 = vpop.f32.mrf.mxu0 }
 0x46f   :  { %v3781_v25 = vpop.f32.mrf.mxu1 }
 0x472   :  { %v3755_v54 = vpop.f32.mrf.mxu3 }
 0x473   :  { %v3756_v60 = vadd.f32 %v3755_v54, %v2999_v59 }
 0x474   :  { %v3794_v55 = vpop.f32.mrf.mxu2 }
 0x475   :  { %v3770_v40 = vpop.f32.mrf.mxu0  ;;  %v3769_v61 = vadd.f32 %v3768_v42, %v3756_v60 }
 0x477   :  { %v3783_v44 = vpop.f32.mrf.mxu1  ;;  %v3782_v63 = vadd.f32 %v3781_v25, %v3769_v61 }
 0x479   :  { %v3795_v0 = vadd.f32 %v3794_v55, %v3782_v63 }
 0x47a   :  { %v3757_v58 = vpop.f32.mrf.mxu3 }
 0x47c   :  { %v3796_v34 = vpop.f32.mrf.mxu2 }
 0x48d   :  { %v3820_v62 = vpop.f32.mrf.mxu0 }
 0x48f   :  { %v3833_v21 = vpop.f32.mrf.mxu1 }
 0x492   :  { %v3807_v1 = vpop.f32.mrf.mxu3 }
 0x493   :  { %v3808_v2 = vadd.f32 %v3807_v1, %v3795_v0 }
 0x494   :  { %v3846_v3 = vpop.f32.mrf.mxu2 }
 0x495   :  { %v3822_v4 = vpop.f32.mrf.mxu0  ;;  %v3821_v5 = vadd.f32 %v3820_v62, %v3808_v2 }
 0x497   :  { %v3835_v6 = vpop.f32.mrf.mxu1  ;;  %v3834_v7 = vadd.f32 %v3833_v21, %v3821_v5 }
 0x499   :  { %v3847_v9 = vadd.f32 %v3846_v3, %v3834_v7 }
 0x49a   :  { %v3809_v10 = vpop.f32.mrf.mxu3 }
 0x49b   :  { %6236 = vtanh.f32 %v3847_v9 }
 0x49c   :  { %v3848_v11 = vpop.f32.mrf.mxu2  ;;  %6238 = vtanh.f32 %v3743_v52 }
 0x4a1   :  { %v6237_v13 = vpop.eup %6236 }
 0x4a2   :  { %v3854_v14 = vrot.slane %v6237_v13, 7  ;;  %v6239_v15 = vpop.eup %6238 }
 0x4a4   :  { %v3856_v16 = vsel %vm3855_vm1, %v6239_v15, %v3854_v14 }
 0x4a5   :  { %3862 = vst.msk [vmem:[%s6747_s11] sm:$0x3] %vm3860_vm2, %v3856_v16 }
 0x4a6   :  { %3867 = vsyncpa [#allocation6], 1 }
 0x4a7   :  { %3868 = vsyncpa [#allocation8], 1 }
 0x4a8   :  { %3869 = vsyncpa [#allocation11], 1 }
 0x4a9   :  { %3870 = vsyncpa [#allocation14], 1 }
 0x4aa   :  { %3871 = vsyncpa [#allocation17], 1 }
 0x4ab   :  { %3872 = vsyncmov [#allocation4] }
 0x4ae   :  { %s3873_s25 = vpop.sfrf %3872 }
 0x4af   :  { %p5750_p0 = scmp.ne.s32.totalorder %s3873_s25, 0 }
 0x4b1   :  { %3877 = shalt.err (%p5750_p0)  }
 0x4b2   :  { %3879 = vsyncmov [#allocation4 + $0x1] }
 0x4b5   :  { %s3880_s26 = vpop.sfrf %3879 }
 0x4b6   :  { %p5751_p1 = scmp.ne.s32.totalorder %s3880_s26, 0 }
 0x4b8   :  { %3884 = shalt.err (%p5751_p1)  }

</bundles_post_ra>
